<compile_context>
chip_gen: v7x
topology: tpu7x:2x2x1
jax: 0.10.0
libtpu: 0.0.40
codegen_flags: <defaults>
</compile_context>

<pallas_src>
import functools

import jax
import jax.numpy as jnp
from jax.experimental import pallas as pl
from jax.experimental.pallas import tpu as pltpu

# Logical model dims (match the nn.Module: embedding_dim=100, DeepSim 200->400->200->2)
D = 100
HID = 2 * D        # 200
HID2 = 4 * D       # 400
OUT = 2

# Lane-padded dims (padded weight/bias positions are zero => semantics preserved).
DP = 128
HIDP = 256
HID2P = 512
OUTP = 128

_BF = jnp.bfloat16
_F32 = jnp.float32


def _vspec():
    return pl.BlockSpec(memory_space=pltpu.MemorySpace.VMEM)


def _mm(a, b):
    # MXU matmul: bf16 operands, f32 accumulation.
    return jnp.dot(a.astype(_BF), b.astype(_BF), preferred_element_type=_F32)


def _mm_nt(a, b):
    # a @ b.T (contraction over the last axis of both operands).
    return jax.lax.dot_general(a.astype(_BF), b.astype(_BF),
                               (((1,), (1,)), ((), ())),
                               preferred_element_type=_F32)


# ---------------------------------------------------------------------------
# Fused kernel: num_layers x GMNlayer  +  GlobalAttention pool  +  DeepSim head
# ---------------------------------------------------------------------------
def _gmn_fused_kernel(
    x1_ref, x2_ref,                         # node features        [N1,DP],[N2,DP] f32
    ew1_ref, ew2_ref,                       # edge-weight embeds   [E1,DP],[E2,DP] f32
    g1s_ref, g1t_ref, s1t_ref,              # graph1 gather src/tgt, scatter-add
    g2s_ref, g2t_ref, s2t_ref,              # graph2 gather src/tgt, scatter-add
    wm_ref, bm_ref,                         # fmessage Linear(3D,D)  [3*DP,DP],[1,DP]
    wih_ref, whh_ref, bih_ref, bhh_ref,     # GRUCell(2D,D)
    wg_ref, bg_ref,                         # GlobalAttention gate Linear(D,1)
    w1a_ref, b1a_ref, w1b_ref, b1b_ref,     # DeepSim mlp1
    w2a_ref, b2a_ref, w2b_ref, b2b_ref,     # DeepSim mlp2
    wl_ref, bl_ref,                         # DeepSim.liner Linear(200,2)
    out_ref,                                # logits [1, OUTP]
    *, num_layers,
):
    x1 = x1_ref[...]
    x2 = x2_ref[...]
    ew1 = ew1_ref[...]
    ew2 = ew2_ref[...]
    g1s, g1t, s1t = g1s_ref[...], g1t_ref[...], s1t_ref[...]
    g2s, g2t, s2t = g2s_ref[...], g2t_ref[...], s2t_ref[...]
    wm, bm = wm_ref[...], bm_ref[...]
    wih, whh = wih_ref[...], whh_ref[...]
    bih, bhh = bih_ref[...], bhh_ref[...]

    def message_agg(x, gs, gt, st, ew):
        # x_i = x[tgt], x_j = x[src] gathered via one-hot matmuls; one fused
        # fmessage matmul on cat([x_i, x_j, ew]); scatter_add as one-hot^T matmul.
        xi = _mm(gt, x)
        xj = _mm(gs, x)
        msg = jnp.maximum(_mm(jnp.concatenate([xi, xj, ew], axis=1), wm) + bm, 0.0)
        return _mm(st, msg)

    def row_softmax(s):
        m = jnp.max(s, axis=1, keepdims=True)
        e = jnp.exp(s - m)
        return e * pl.reciprocal(jnp.sum(e, axis=1, keepdims=True), approx=True)

    def gru(m, u, h):
        # torch.nn.GRUCell on input cat([m, u]); gates ordered r | z | n.
        gi = _mm(jnp.concatenate([m, u], axis=1), wih) + bih      # [N, 3*DP]
        gh = _mm(h, whh) + bhh                                    # [N, 3*DP]
        r = jax.nn.sigmoid(gi[:, 0 * DP:1 * DP] + gh[:, 0 * DP:1 * DP])
        z = jax.nn.sigmoid(gi[:, 1 * DP:2 * DP] + gh[:, 1 * DP:2 * DP])
        n = jnp.tanh(gi[:, 2 * DP:3 * DP] + r * gh[:, 2 * DP:3 * DP])
        return (1.0 - z) * n + z * h

    def layer(a1, a2):
        m1 = message_agg(a1, g1s, g1t, s1t, ew1)                  # [N1, DP]
        m2 = message_agg(a2, g2s, g2t, s2t, ew2)                  # [N2, DP]
        # cross-graph attention (scores_t == scores.T; recomputed with a tiny NT
        # dot instead of transposing the non-tile-aligned block).
        scores = _mm_nt(a1, a2)                                   # [N1, N2]
        scores_t = _mm_nt(a2, a1)                                 # [N2, N1]
        attn1 = row_softmax(scores)      # F.softmax(scores, dim=1)
        attn2 = row_softmax(scores_t)    # == F.softmax(scores, dim=0).t()
        u1 = a1 - _mm(attn1, a2)
        u2 = a2 - _mm(attn2, a1)
        return gru(m1, u1, a1), gru(m2, u2, a2)

    # Static unroll: weights stay resident in VMEM across all layers.
    for _ in range(num_layers):
        x1, x2 = layer(x1, x2)

    # GlobalAttention pooling: gate = sigmoid(Linear(x)); softmax over nodes;
    # weighted sum of node features.
    wg, bg = wg_ref[...], bg_ref[...]

    def pool(x):
        gate = jax.nn.sigmoid(jnp.sum(x * wg, axis=1, keepdims=True) + bg)    # [N, 1]
        m = jnp.max(gate, axis=0, keepdims=True)
        e = jnp.exp(gate - m)
        a = e * pl.reciprocal(jnp.sum(e, axis=0, keepdims=True), approx=True)
        return jnp.sum(a * x, axis=0, keepdims=True)                          # [1, DP]

    hg1 = pool(x1)
    hg2 = pool(x2)

    def mlp(inp, wa, ba, wb, bb):
        h = jnp.maximum(_mm(inp, wa) + ba, 0.0)
        return jnp.maximum(_mm(h, wb) + bb, 0.0)

    h1 = mlp(jnp.concatenate([hg1, hg2], axis=1),
             w1a_ref[...], b1a_ref[...], w1b_ref[...], b1b_ref[...])
    h2 = mlp(jnp.concatenate([hg2, hg1], axis=1),
             w2a_ref[...], b2a_ref[...], w2b_ref[...], b2b_ref[...])
    h = 0.5 * (h1 + h2)                  # torch.mean(cat((h1, h2), 0), dim=0)
    out_ref[...] = _mm(h, wl_ref[...]) + bl_ref[...]


# ---------------------------------------------------------------------------
# Parameters (deterministic synthetic init; zero in every padded position so the
# padded model is numerically identical to the D=100 / 200 / 400 / 2 model).
# ---------------------------------------------------------------------------
def _block_randn(key, shape, blocks, scale=0.1):
    out = jnp.zeros(shape, _F32)
    keys = jax.random.split(key, len(blocks))
    for k, (off, size) in zip(keys, blocks):
        vals = scale * jax.random.normal(k, size, dtype=_F32)
        idx = tuple(slice(o, o + s) for o, s in zip(off, size))
        out = out.at[idx].set(vals)
    return out


def init_params(key, vocablen):
    ks = iter(jax.random.split(key, 32))
    nxt = lambda: next(ks)

    p = {}
    p['embed'] = _block_randn(nxt(), (vocablen, DP), [((0, 0), (vocablen, D))])
    p['edge_embed'] = _block_randn(nxt(), (20, DP), [((0, 0), (20, D))])

    # fmessage Linear(3D, D): rows = [x_i | x_j | ew] slots, each DP wide.
    p['wm'] = _block_randn(nxt(), (3 * DP, DP),
                           [((i * DP, 0), (D, D)) for i in range(3)])
    p['bm'] = _block_randn(nxt(), (1, DP), [((0, 0), (1, D))])

    # GRUCell(2D, D): W_ih acts on cat([m, u]) (2 DP slots), gate cols r | z | n.
    p['wih'] = _block_randn(nxt(), (2 * DP, 3 * DP),
                            [((i * DP, j * DP), (D, D))
                             for i in range(2) for j in range(3)])
    p['whh'] = _block_randn(nxt(), (DP, 3 * DP),
                            [((0, j * DP), (D, D)) for j in range(3)])
    p['bih'] = _block_randn(nxt(), (1, 3 * DP), [((0, j * DP), (1, D)) for j in range(3)])
    p['bhh'] = _block_randn(nxt(), (1, 3 * DP), [((0, j * DP), (1, D)) for j in range(3)])

    # GlobalAttention gate: Linear(D, 1) + Sigmoid.
    p['wg'] = _block_randn(nxt(), (1, DP), [((0, 0), (1, D))])
    p['bg'] = 0.1 * jax.random.normal(nxt(), (1, 1), dtype=_F32)

    # DeepSim mlp1 / mlp2: Linear(200, 400)+ReLU, Linear(400, 200)+ReLU.
    def deep_mlp():
        wa = _block_randn(nxt(), (2 * DP, HID2P),
                          [((i * DP, 0), (D, HID2)) for i in range(2)])
        ba = _block_randn(nxt(), (1, HID2P), [((0, 0), (1, HID2))])
        wb = _block_randn(nxt(), (HID2P, HIDP), [((0, 0), (HID2, HID))])
        bb = _block_randn(nxt(), (1, HIDP), [((0, 0), (1, HID))])
        return wa, ba, wb, bb

    p['w1a'], p['b1a'], p['w1b'], p['b1b'] = deep_mlp()
    p['w2a'], p['b2a'], p['w2b'], p['b2b'] = deep_mlp()

    # DeepSim.liner Linear(200, 2), output lane-padded to OUTP.
    p['wl'] = _block_randn(nxt(), (HIDP, OUTP), [((0, 0), (HID, OUT))])
    p['bl'] = _block_randn(nxt(), (1, OUTP), [((0, 0), (1, OUT))])

    # MXU weight operands shipped as bf16 (f32 accumulation in-kernel).
    for name in ('wm', 'wih', 'whh', 'w1a', 'w1b', 'w2a', 'w2b', 'wl'):
        p[name] = p[name].astype(_BF)
    return p


# ---------------------------------------------------------------------------
# Forward (JAX glue: embeddings, one-hot edge operators, single fused kernel call).
# ---------------------------------------------------------------------------
def gmn_forward(data, params, num_layers):
    x1_idx, x2_idx, edge_index1, edge_index2, edge_attr1, edge_attr2 = data

    # embedding lookups (+ squeeze(1)) — glue
    x1 = params['embed'][x1_idx[:, 0]]
    x2 = params['embed'][x2_idx[:, 0]]
    ew1 = params['edge_embed'][edge_attr1[:, 0]]
    ew2 = params['edge_embed'][edge_attr2[:, 0]]

    n1, n2 = x1.shape[0], x2.shape[0]
    # flow='source_to_target': j = edge_index[0] (source), i = edge_index[1] (target)
    g1s = jax.nn.one_hot(edge_index1[0], n1, dtype=_F32)   # [E1, N1] gather x_j
    g1t = jax.nn.one_hot(edge_index1[1], n1, dtype=_F32)   # [E1, N1] gather x_i
    s1t = g1t.T                                            # [N1, E1] scatter-add (targets)
    g2s = jax.nn.one_hot(edge_index2[0], n2, dtype=_F32)
    g2t = jax.nn.one_hot(edge_index2[1], n2, dtype=_F32)
    s2t = g2t.T

    inputs = [
        x1, x2, ew1, ew2,
        g1s, g1t, s1t, g2s, g2t, s2t,
        params['wm'], params['bm'], params['wih'], params['whh'],
        params['bih'], params['bhh'],
        params['wg'], params['bg'],
        params['w1a'], params['b1a'], params['w1b'], params['b1b'],
        params['w2a'], params['b2a'], params['w2b'], params['b2b'],
        params['wl'], params['bl'],
    ]

    fused = pl.pallas_call(
        functools.partial(_gmn_fused_kernel, num_layers=num_layers),
        out_shape=jax.ShapeDtypeStruct((1, OUTP), _F32),
        in_specs=[_vspec()] * len(inputs),
        out_specs=_vspec(),
    )(*inputs)
    return fused[:, :OUT]


if __name__ == "__main__":
    key = jax.random.PRNGKey(0)
    kp, k1, k2, k3, k4, k5, k6 = jax.random.split(key, 7)

    vocablen = 50
    num_layers = 2
    n1, n2 = 12, 10       # nodes per graph
    e1, e2 = 24, 20       # edges per graph

    params = init_params(kp, vocablen)

    x1_idx = jax.random.randint(k1, (n1, 1), 0, vocablen, dtype=jnp.int32)
    x2_idx = jax.random.randint(k2, (n2, 1), 0, vocablen, dtype=jnp.int32)
    edge_index1 = jax.random.randint(k3, (2, e1), 0, n1, dtype=jnp.int32)
    edge_index2 = jax.random.randint(k4, (2, e2), 0, n2, dtype=jnp.int32)
    edge_attr1 = jax.random.randint(k5, (e1, 1), 0, 20, dtype=jnp.int32)
    edge_attr2 = jax.random.randint(k6, (e2, 1), 0, 20, dtype=jnp.int32)

    data = (x1_idx, x2_idx, edge_index1, edge_index2, edge_attr1, edge_attr2)
    logits = gmn_forward(data, params, num_layers)
    logits = jax.block_until_ready(logits)
    assert logits.shape == (1, OUT) and logits.dtype == jnp.float32
    # TODO(synk): GCNConv convolutional_pass / calculate_histogram are dead code in
    # GMNnet.forward and are intentionally not implemented.
    print("KERNEL_OK")
</pallas_src>

<mosaic_0001>
module attributes {stable_mosaic.version = 11 : i64} {
  func.func @_gmn_fused_kernel(%arg0: memref<12x128xf32, #tpu.memory_space<vmem>>, %arg1: memref<10x128xf32, #tpu.memory_space<vmem>>, %arg2: memref<24x128xf32, #tpu.memory_space<vmem>>, %arg3: memref<20x128xf32, #tpu.memory_space<vmem>>, %arg4: memref<24x12xf32, #tpu.memory_space<vmem>>, %arg5: memref<24x12xf32, #tpu.memory_space<vmem>>, %arg6: memref<12x24xf32, #tpu.memory_space<vmem>>, %arg7: memref<20x10xf32, #tpu.memory_space<vmem>>, %arg8: memref<20x10xf32, #tpu.memory_space<vmem>>, %arg9: memref<10x20xf32, #tpu.memory_space<vmem>>, %arg10: memref<384x128xbf16, #tpu.memory_space<vmem>>, %arg11: memref<1x128xf32, #tpu.memory_space<vmem>>, %arg12: memref<256x384xbf16, #tpu.memory_space<vmem>>, %arg13: memref<128x384xbf16, #tpu.memory_space<vmem>>, %arg14: memref<1x384xf32, #tpu.memory_space<vmem>>, %arg15: memref<1x384xf32, #tpu.memory_space<vmem>>, %arg16: memref<1x128xf32, #tpu.memory_space<vmem>>, %arg17: memref<1x1xf32, #tpu.memory_space<vmem>>, %arg18: memref<256x512xbf16, #tpu.memory_space<vmem>>, %arg19: memref<1x512xf32, #tpu.memory_space<vmem>>, %arg20: memref<512x256xbf16, #tpu.memory_space<vmem>>, %arg21: memref<1x256xf32, #tpu.memory_space<vmem>>, %arg22: memref<256x512xbf16, #tpu.memory_space<vmem>>, %arg23: memref<1x512xf32, #tpu.memory_space<vmem>>, %arg24: memref<512x256xbf16, #tpu.memory_space<vmem>>, %arg25: memref<1x256xf32, #tpu.memory_space<vmem>>, %arg26: memref<256x128xbf16, #tpu.memory_space<vmem>>, %arg27: memref<1x128xf32, #tpu.memory_space<vmem>>, %arg28: memref<1x128xf32, #tpu.memory_space<vmem>>) attributes {dimension_semantics = [], scalar_prefetch = 0 : i64, scratch_operands = 0 : i64, tpu.core_type = #tpu.core_type<tc>} {
    %c0 = arith.constant 0 : index
    %c0_0 = arith.constant 0 : index
    %0 = vector.load %arg0[%c0, %c0_0] : memref<12x128xf32, #tpu.memory_space<vmem>>, vector<12x128xf32>
    %c0_1 = arith.constant 0 : index
    %c0_2 = arith.constant 0 : index
    %1 = vector.load %arg1[%c0_1, %c0_2] : memref<10x128xf32, #tpu.memory_space<vmem>>, vector<10x128xf32>
    %c0_3 = arith.constant 0 : index
    %c0_4 = arith.constant 0 : index
    %2 = vector.load %arg2[%c0_3, %c0_4] : memref<24x128xf32, #tpu.memory_space<vmem>>, vector<24x128xf32>
    %c0_5 = arith.constant 0 : index
    %c0_6 = arith.constant 0 : index
    %3 = vector.load %arg3[%c0_5, %c0_6] : memref<20x128xf32, #tpu.memory_space<vmem>>, vector<20x128xf32>
    %c0_7 = arith.constant 0 : index
    %c0_8 = arith.constant 0 : index
    %4 = vector.load %arg4[%c0_7, %c0_8] : memref<24x12xf32, #tpu.memory_space<vmem>>, vector<24x12xf32>
    %c0_9 = arith.constant 0 : index
    %c0_10 = arith.constant 0 : index
    %5 = vector.load %arg5[%c0_9, %c0_10] : memref<24x12xf32, #tpu.memory_space<vmem>>, vector<24x12xf32>
    %c0_11 = arith.constant 0 : index
    %c0_12 = arith.constant 0 : index
    %6 = vector.load %arg6[%c0_11, %c0_12] : memref<12x24xf32, #tpu.memory_space<vmem>>, vector<12x24xf32>
    %c0_13 = arith.constant 0 : index
    %c0_14 = arith.constant 0 : index
    %7 = vector.load %arg7[%c0_13, %c0_14] : memref<20x10xf32, #tpu.memory_space<vmem>>, vector<20x10xf32>
    %c0_15 = arith.constant 0 : index
    %c0_16 = arith.constant 0 : index
    %8 = vector.load %arg8[%c0_15, %c0_16] : memref<20x10xf32, #tpu.memory_space<vmem>>, vector<20x10xf32>
    %c0_17 = arith.constant 0 : index
    %c0_18 = arith.constant 0 : index
    %9 = vector.load %arg9[%c0_17, %c0_18] : memref<10x20xf32, #tpu.memory_space<vmem>>, vector<10x20xf32>
    %c0_19 = arith.constant 0 : index
    %c0_20 = arith.constant 0 : index
    %10 = vector.load %arg10[%c0_19, %c0_20] : memref<384x128xbf16, #tpu.memory_space<vmem>>, vector<384x128xbf16>
    %c0_21 = arith.constant 0 : index
    %c0_22 = arith.constant 0 : index
    %11 = vector.load %arg11[%c0_21, %c0_22] : memref<1x128xf32, #tpu.memory_space<vmem>>, vector<1x128xf32>
    %c0_23 = arith.constant 0 : index
    %c0_24 = arith.constant 0 : index
    %12 = vector.load %arg12[%c0_23, %c0_24] : memref<256x384xbf16, #tpu.memory_space<vmem>>, vector<256x384xbf16>
    %c0_25 = arith.constant 0 : index
    %c0_26 = arith.constant 0 : index
    %13 = vector.load %arg13[%c0_25, %c0_26] : memref<128x384xbf16, #tpu.memory_space<vmem>>, vector<128x384xbf16>
    %c0_27 = arith.constant 0 : index
    %c0_28 = arith.constant 0 : index
    %14 = vector.load %arg14[%c0_27, %c0_28] : memref<1x384xf32, #tpu.memory_space<vmem>>, vector<1x384xf32>
    %c0_29 = arith.constant 0 : index
    %c0_30 = arith.constant 0 : index
    %15 = vector.load %arg15[%c0_29, %c0_30] : memref<1x384xf32, #tpu.memory_space<vmem>>, vector<1x384xf32>
    %16 = arith.truncf %5 : vector<24x12xf32> to vector<24x12xbf16>
    %17 = arith.truncf %0 : vector<12x128xf32> to vector<12x128xbf16>
    %cst = arith.constant dense<0.000000e+00> : vector<24x128xf32>
    %18 = tpu.matmul %16, %17, %cst {dimension_numbers = #tpu.dot_dimension_numbers<[1], [0], [0], [1], [0, 0, 1, 1], [], []>} : vector<24x12xbf16>, vector<12x128xbf16>, vector<24x128xf32> -> vector<24x128xf32>
    %19 = arith.truncf %4 : vector<24x12xf32> to vector<24x12xbf16>
    %20 = arith.truncf %0 : vector<12x128xf32> to vector<12x128xbf16>
    %cst_31 = arith.constant dense<0.000000e+00> : vector<24x128xf32>
    %21 = tpu.matmul %19, %20, %cst_31 {dimension_numbers = #tpu.dot_dimension_numbers<[1], [0], [0], [1], [0, 0, 1, 1], [], []>} : vector<24x12xbf16>, vector<12x128xbf16>, vector<24x128xf32> -> vector<24x128xf32>
    %22 = tpu.concatenate %18, %21, %2 in 1 : vector<24x128xf32>, vector<24x128xf32>, vector<24x128xf32> -> vector<24x384xf32>
    %23 = arith.truncf %22 : vector<24x384xf32> to vector<24x384xbf16>
    %cst_32 = arith.constant dense<0.000000e+00> : vector<24x128xf32>
    %24 = tpu.matmul %23, %10, %cst_32 {dimension_numbers = #tpu.dot_dimension_numbers<[1], [0], [0], [1], [0, 0, 1, 1], [], []>} : vector<24x384xbf16>, vector<384x128xbf16>, vector<24x128xf32> -> vector<24x128xf32>
    %25 = vector.broadcast %11 : vector<1x128xf32> to vector<24x128xf32>
    %26 = arith.addf %24, %25 : vector<24x128xf32>
    %cst_33 = arith.constant 0.000000e+00 : f32
    %27 = vector.broadcast %cst_33 : f32 to vector<24x128xf32>
    %28 = arith.maximumf %26, %27 : vector<24x128xf32>
    %29 = arith.truncf %6 : vector<12x24xf32> to vector<12x24xbf16>
    %30 = arith.truncf %28 : vector<24x128xf32> to vector<24x128xbf16>
    %cst_34 = arith.constant dense<0.000000e+00> : vector<12x128xf32>
    %31 = tpu.matmul %29, %30, %cst_34 {dimension_numbers = #tpu.dot_dimension_numbers<[1], [0], [0], [1], [0, 0, 1, 1], [], []>} : vector<12x24xbf16>, vector<24x128xbf16>, vector<12x128xf32> -> vector<12x128xf32>
    %32 = arith.truncf %8 : vector<20x10xf32> to vector<20x10xbf16>
    %33 = arith.truncf %1 : vector<10x128xf32> to vector<10x128xbf16>
    %cst_35 = arith.constant dense<0.000000e+00> : vector<20x128xf32>
    %34 = tpu.matmul %32, %33, %cst_35 {dimension_numbers = #tpu.dot_dimension_numbers<[1], [0], [0], [1], [0, 0, 1, 1], [], []>} : vector<20x10xbf16>, vector<10x128xbf16>, vector<20x128xf32> -> vector<20x128xf32>
    %35 = arith.truncf %7 : vector<20x10xf32> to vector<20x10xbf16>
    %36 = arith.truncf %1 : vector<10x128xf32> to vector<10x128xbf16>
    %cst_36 = arith.constant dense<0.000000e+00> : vector<20x128xf32>
    %37 = tpu.matmul %35, %36, %cst_36 {dimension_numbers = #tpu.dot_dimension_numbers<[1], [0], [0], [1], [0, 0, 1, 1], [], []>} : vector<20x10xbf16>, vector<10x128xbf16>, vector<20x128xf32> -> vector<20x128xf32>
    %38 = tpu.concatenate %34, %37, %3 in 1 : vector<20x128xf32>, vector<20x128xf32>, vector<20x128xf32> -> vector<20x384xf32>
    %39 = arith.truncf %38 : vector<20x384xf32> to vector<20x384xbf16>
    %cst_37 = arith.constant dense<0.000000e+00> : vector<20x128xf32>
    %40 = tpu.matmul %39, %10, %cst_37 {dimension_numbers = #tpu.dot_dimension_numbers<[1], [0], [0], [1], [0, 0, 1, 1], [], []>} : vector<20x384xbf16>, vector<384x128xbf16>, vector<20x128xf32> -> vector<20x128xf32>
    %41 = vector.broadcast %11 : vector<1x128xf32> to vector<20x128xf32>
    %42 = arith.addf %40, %41 : vector<20x128xf32>
    %cst_38 = arith.constant 0.000000e+00 : f32
    %43 = vector.broadcast %cst_38 : f32 to vector<20x128xf32>
    %44 = arith.maximumf %42, %43 : vector<20x128xf32>
    %45 = arith.truncf %9 : vector<10x20xf32> to vector<10x20xbf16>
    %46 = arith.truncf %44 : vector<20x128xf32> to vector<20x128xbf16>
    %cst_39 = arith.constant dense<0.000000e+00> : vector<10x128xf32>
    %47 = tpu.matmul %45, %46, %cst_39 {dimension_numbers = #tpu.dot_dimension_numbers<[1], [0], [0], [1], [0, 0, 1, 1], [], []>} : vector<10x20xbf16>, vector<20x128xbf16>, vector<10x128xf32> -> vector<10x128xf32>
    %48 = arith.truncf %0 : vector<12x128xf32> to vector<12x128xbf16>
    %49 = arith.truncf %1 : vector<10x128xf32> to vector<10x128xbf16>
    %cst_40 = arith.constant dense<0.000000e+00> : vector<12x10xf32>
    %50 = tpu.matmul %48, %49, %cst_40 {dimension_numbers = #tpu.dot_dimension_numbers<[1], [1], [0], [0], [0, 0, 1, 0], [], []>} : vector<12x128xbf16>, vector<10x128xbf16>, vector<12x10xf32> -> vector<12x10xf32>
    %51 = arith.truncf %1 : vector<10x128xf32> to vector<10x128xbf16>
    %52 = arith.truncf %0 : vector<12x128xf32> to vector<12x128xbf16>
    %cst_41 = arith.constant dense<0.000000e+00> : vector<10x12xf32>
    %53 = tpu.matmul %51, %52, %cst_41 {dimension_numbers = #tpu.dot_dimension_numbers<[1], [1], [0], [0], [0, 0, 1, 0], [], []>} : vector<10x128xbf16>, vector<12x128xbf16>, vector<10x12xf32> -> vector<10x12xf32>
    %cst_42 = arith.constant dense<0xFF800000> : vector<12xf32>
    %54 = vector.multi_reduction <maximumf>, %50, %cst_42 [1] : vector<12x10xf32> to vector<12xf32>
    %55 = vector.shape_cast %54 : vector<12xf32> to vector<12x1xf32>
    %56 = vector.broadcast %55 : vector<12x1xf32> to vector<12x10xf32>
    %57 = arith.subf %50, %56 : vector<12x10xf32>
    %58 = math.exp %57 : vector<12x10xf32>
    %cst_43 = arith.constant dense<0.000000e+00> : vector<12xf32>
    %59 = vector.multi_reduction <add>, %58, %cst_43 [1] : vector<12x10xf32> to vector<12xf32>
    %60 = vector.shape_cast %59 : vector<12xf32> to vector<12x1xf32>
    %61 = tpu.reciprocal %60 {approx = true} : vector<12x1xf32> -> vector<12x1xf32>
    %62 = vector.broadcast %61 : vector<12x1xf32> to vector<12x10xf32>
    %63 = arith.mulf %58, %62 : vector<12x10xf32>
    %cst_44 = arith.constant dense<0xFF800000> : vector<10xf32>
    %64 = vector.multi_reduction <maximumf>, %53, %cst_44 [1] : vector<10x12xf32> to vector<10xf32>
    %65 = vector.shape_cast %64 : vector<10xf32> to vector<10x1xf32>
    %66 = vector.broadcast %65 : vector<10x1xf32> to vector<10x12xf32>
    %67 = arith.subf %53, %66 : vector<10x12xf32>
    %68 = math.exp %67 : vector<10x12xf32>
    %cst_45 = arith.constant dense<0.000000e+00> : vector<10xf32>
    %69 = vector.multi_reduction <add>, %68, %cst_45 [1] : vector<10x12xf32> to vector<10xf32>
    %70 = vector.shape_cast %69 : vector<10xf32> to vector<10x1xf32>
    %71 = tpu.reciprocal %70 {approx = true} : vector<10x1xf32> -> vector<10x1xf32>
    %72 = vector.broadcast %71 : vector<10x1xf32> to vector<10x12xf32>
    %73 = arith.mulf %68, %72 : vector<10x12xf32>
    %74 = arith.truncf %63 : vector<12x10xf32> to vector<12x10xbf16>
    %75 = arith.truncf %1 : vector<10x128xf32> to vector<10x128xbf16>
    %cst_46 = arith.constant dense<0.000000e+00> : vector<12x128xf32>
    %76 = tpu.matmul %74, %75, %cst_46 {dimension_numbers = #tpu.dot_dimension_numbers<[1], [0], [0], [1], [0, 0, 1, 1], [], []>} : vector<12x10xbf16>, vector<10x128xbf16>, vector<12x128xf32> -> vector<12x128xf32>
    %77 = arith.subf %0, %76 : vector<12x128xf32>
    %78 = arith.truncf %73 : vector<10x12xf32> to vector<10x12xbf16>
    %79 = arith.truncf %0 : vector<12x128xf32> to vector<12x128xbf16>
    %cst_47 = arith.constant dense<0.000000e+00> : vector<10x128xf32>
    %80 = tpu.matmul %78, %79, %cst_47 {dimension_numbers = #tpu.dot_dimension_numbers<[1], [0], [0], [1], [0, 0, 1, 1], [], []>} : vector<10x12xbf16>, vector<12x128xbf16>, vector<10x128xf32> -> vector<10x128xf32>
    %81 = arith.subf %1, %80 : vector<10x128xf32>
    %82 = tpu.concatenate %31, %77 in 1 : vector<12x128xf32>, vector<12x128xf32> -> vector<12x256xf32>
    %83 = arith.truncf %82 : vector<12x256xf32> to vector<12x256xbf16>
    %cst_48 = arith.constant dense<0.000000e+00> : vector<12x384xf32>
    %84 = tpu.matmul %83, %12, %cst_48 {dimension_numbers = #tpu.dot_dimension_numbers<[1], [0], [0], [1], [0, 0, 1, 1], [], []>} : vector<12x256xbf16>, vector<256x384xbf16>, vector<12x384xf32> -> vector<12x384xf32>
    %85 = vector.broadcast %14 : vector<1x384xf32> to vector<12x384xf32>
    %86 = arith.addf %84, %85 : vector<12x384xf32>
    %87 = arith.truncf %0 : vector<12x128xf32> to vector<12x128xbf16>
    %cst_49 = arith.constant dense<0.000000e+00> : vector<12x384xf32>
    %88 = tpu.matmul %87, %13, %cst_49 {dimension_numbers = #tpu.dot_dimension_numbers<[1], [0], [0], [1], [0, 0, 1, 1], [], []>} : vector<12x128xbf16>, vector<128x384xbf16>, vector<12x384xf32> -> vector<12x384xf32>
    %89 = vector.broadcast %15 : vector<1x384xf32> to vector<12x384xf32>
    %90 = arith.addf %88, %89 : vector<12x384xf32>
    %91 = vector.extract_strided_slice %86 {offsets = [0, 0], sizes = [12, 128], strides = [1, 1]} : vector<12x384xf32> to vector<12x128xf32>
    %92 = vector.extract_strided_slice %90 {offsets = [0, 0], sizes = [12, 128], strides = [1, 1]} : vector<12x384xf32> to vector<12x128xf32>
    %93 = arith.addf %91, %92 : vector<12x128xf32>
    %94 = arith.negf %93 : vector<12x128xf32>
    %95 = math.exp %94 : vector<12x128xf32>
    %cst_50 = arith.constant 1.000000e+00 : f32
    %96 = vector.broadcast %cst_50 : f32 to vector<12x128xf32>
    %97 = arith.addf %96, %95 : vector<12x128xf32>
    %98 = arith.divf %96, %97 : vector<12x128xf32>
    %99 = vector.extract_strided_slice %86 {offsets = [0, 128], sizes = [12, 128], strides = [1, 1]} : vector<12x384xf32> to vector<12x128xf32>
    %100 = vector.extract_strided_slice %90 {offsets = [0, 128], sizes = [12, 128], strides = [1, 1]} : vector<12x384xf32> to vector<12x128xf32>
    %101 = arith.addf %99, %100 : vector<12x128xf32>
    %102 = arith.negf %101 : vector<12x128xf32>
    %103 = math.exp %102 : vector<12x128xf32>
    %cst_51 = arith.constant 1.000000e+00 : f32
    %104 = vector.broadcast %cst_51 : f32 to vector<12x128xf32>
    %105 = arith.addf %104, %103 : vector<12x128xf32>
    %106 = arith.divf %104, %105 : vector<12x128xf32>
    %107 = vector.extract_strided_slice %86 {offsets = [0, 256], sizes = [12, 128], strides = [1, 1]} : vector<12x384xf32> to vector<12x128xf32>
    %108 = vector.extract_strided_slice %90 {offsets = [0, 256], sizes = [12, 128], strides = [1, 1]} : vector<12x384xf32> to vector<12x128xf32>
    %109 = arith.mulf %98, %108 : vector<12x128xf32>
    %110 = arith.addf %107, %109 : vector<12x128xf32>
    %111 = math.tanh %110 : vector<12x128xf32>
    %cst_52 = arith.constant 1.000000e+00 : f32
    %112 = vector.broadcast %cst_52 : f32 to vector<12x128xf32>
    %113 = arith.subf %112, %106 : vector<12x128xf32>
    %114 = arith.mulf %113, %111 : vector<12x128xf32>
    %115 = arith.mulf %106, %0 : vector<12x128xf32>
    %116 = arith.addf %114, %115 : vector<12x128xf32>
    %117 = tpu.concatenate %47, %81 in 1 : vector<10x128xf32>, vector<10x128xf32> -> vector<10x256xf32>
    %118 = arith.truncf %117 : vector<10x256xf32> to vector<10x256xbf16>
    %cst_53 = arith.constant dense<0.000000e+00> : vector<10x384xf32>
    %119 = tpu.matmul %118, %12, %cst_53 {dimension_numbers = #tpu.dot_dimension_numbers<[1], [0], [0], [1], [0, 0, 1, 1], [], []>} : vector<10x256xbf16>, vector<256x384xbf16>, vector<10x384xf32> -> vector<10x384xf32>
    %120 = vector.broadcast %14 : vector<1x384xf32> to vector<10x384xf32>
    %121 = arith.addf %119, %120 : vector<10x384xf32>
    %122 = arith.truncf %1 : vector<10x128xf32> to vector<10x128xbf16>
    %cst_54 = arith.constant dense<0.000000e+00> : vector<10x384xf32>
    %123 = tpu.matmul %122, %13, %cst_54 {dimension_numbers = #tpu.dot_dimension_numbers<[1], [0], [0], [1], [0, 0, 1, 1], [], []>} : vector<10x128xbf16>, vector<128x384xbf16>, vector<10x384xf32> -> vector<10x384xf32>
    %124 = vector.broadcast %15 : vector<1x384xf32> to vector<10x384xf32>
    %125 = arith.addf %123, %124 : vector<10x384xf32>
    %126 = vector.extract_strided_slice %121 {offsets = [0, 0], sizes = [10, 128], strides = [1, 1]} : vector<10x384xf32> to vector<10x128xf32>
    %127 = vector.extract_strided_slice %125 {offsets = [0, 0], sizes = [10, 128], strides = [1, 1]} : vector<10x384xf32> to vector<10x128xf32>
    %128 = arith.addf %126, %127 : vector<10x128xf32>
    %129 = arith.negf %128 : vector<10x128xf32>
    %130 = math.exp %129 : vector<10x128xf32>
    %cst_55 = arith.constant 1.000000e+00 : f32
    %131 = vector.broadcast %cst_55 : f32 to vector<10x128xf32>
    %132 = arith.addf %131, %130 : vector<10x128xf32>
    %133 = arith.divf %131, %132 : vector<10x128xf32>
    %134 = vector.extract_strided_slice %121 {offsets = [0, 128], sizes = [10, 128], strides = [1, 1]} : vector<10x384xf32> to vector<10x128xf32>
    %135 = vector.extract_strided_slice %125 {offsets = [0, 128], sizes = [10, 128], strides = [1, 1]} : vector<10x384xf32> to vector<10x128xf32>
    %136 = arith.addf %134, %135 : vector<10x128xf32>
    %137 = arith.negf %136 : vector<10x128xf32>
    %138 = math.exp %137 : vector<10x128xf32>
    %cst_56 = arith.constant 1.000000e+00 : f32
    %139 = vector.broadcast %cst_56 : f32 to vector<10x128xf32>
    %140 = arith.addf %139, %138 : vector<10x128xf32>
    %141 = arith.divf %139, %140 : vector<10x128xf32>
    %142 = vector.extract_strided_slice %121 {offsets = [0, 256], sizes = [10, 128], strides = [1, 1]} : vector<10x384xf32> to vector<10x128xf32>
    %143 = vector.extract_strided_slice %125 {offsets = [0, 256], sizes = [10, 128], strides = [1, 1]} : vector<10x384xf32> to vector<10x128xf32>
    %144 = arith.mulf %133, %143 : vector<10x128xf32>
    %145 = arith.addf %142, %144 : vector<10x128xf32>
    %146 = math.tanh %145 : vector<10x128xf32>
    %cst_57 = arith.constant 1.000000e+00 : f32
    %147 = vector.broadcast %cst_57 : f32 to vector<10x128xf32>
    %148 = arith.subf %147, %141 : vector<10x128xf32>
    %149 = arith.mulf %148, %146 : vector<10x128xf32>
    %150 = arith.mulf %141, %1 : vector<10x128xf32>
    %151 = arith.addf %149, %150 : vector<10x128xf32>
    %152 = arith.truncf %5 : vector<24x12xf32> to vector<24x12xbf16>
    %153 = arith.truncf %116 : vector<12x128xf32> to vector<12x128xbf16>
    %cst_58 = arith.constant dense<0.000000e+00> : vector<24x128xf32>
    %154 = tpu.matmul %152, %153, %cst_58 {dimension_numbers = #tpu.dot_dimension_numbers<[1], [0], [0], [1], [0, 0, 1, 1], [], []>} : vector<24x12xbf16>, vector<12x128xbf16>, vector<24x128xf32> -> vector<24x128xf32>
    %155 = arith.truncf %4 : vector<24x12xf32> to vector<24x12xbf16>
    %156 = arith.truncf %116 : vector<12x128xf32> to vector<12x128xbf16>
    %cst_59 = arith.constant dense<0.000000e+00> : vector<24x128xf32>
    %157 = tpu.matmul %155, %156, %cst_59 {dimension_numbers = #tpu.dot_dimension_numbers<[1], [0], [0], [1], [0, 0, 1, 1], [], []>} : vector<24x12xbf16>, vector<12x128xbf16>, vector<24x128xf32> -> vector<24x128xf32>
    %158 = tpu.concatenate %154, %157, %2 in 1 : vector<24x128xf32>, vector<24x128xf32>, vector<24x128xf32> -> vector<24x384xf32>
    %159 = arith.truncf %158 : vector<24x384xf32> to vector<24x384xbf16>
    %cst_60 = arith.constant dense<0.000000e+00> : vector<24x128xf32>
    %160 = tpu.matmul %159, %10, %cst_60 {dimension_numbers = #tpu.dot_dimension_numbers<[1], [0], [0], [1], [0, 0, 1, 1], [], []>} : vector<24x384xbf16>, vector<384x128xbf16>, vector<24x128xf32> -> vector<24x128xf32>
    %161 = vector.broadcast %11 : vector<1x128xf32> to vector<24x128xf32>
    %162 = arith.addf %160, %161 : vector<24x128xf32>
    %cst_61 = arith.constant 0.000000e+00 : f32
    %163 = vector.broadcast %cst_61 : f32 to vector<24x128xf32>
    %164 = arith.maximumf %162, %163 : vector<24x128xf32>
    %165 = arith.truncf %6 : vector<12x24xf32> to vector<12x24xbf16>
    %166 = arith.truncf %164 : vector<24x128xf32> to vector<24x128xbf16>
    %cst_62 = arith.constant dense<0.000000e+00> : vector<12x128xf32>
    %167 = tpu.matmul %165, %166, %cst_62 {dimension_numbers = #tpu.dot_dimension_numbers<[1], [0], [0], [1], [0, 0, 1, 1], [], []>} : vector<12x24xbf16>, vector<24x128xbf16>, vector<12x128xf32> -> vector<12x128xf32>
    %168 = arith.truncf %8 : vector<20x10xf32> to vector<20x10xbf16>
    %169 = arith.truncf %151 : vector<10x128xf32> to vector<10x128xbf16>
    %cst_63 = arith.constant dense<0.000000e+00> : vector<20x128xf32>
    %170 = tpu.matmul %168, %169, %cst_63 {dimension_numbers = #tpu.dot_dimension_numbers<[1], [0], [0], [1], [0, 0, 1, 1], [], []>} : vector<20x10xbf16>, vector<10x128xbf16>, vector<20x128xf32> -> vector<20x128xf32>
    %171 = arith.truncf %7 : vector<20x10xf32> to vector<20x10xbf16>
    %172 = arith.truncf %151 : vector<10x128xf32> to vector<10x128xbf16>
    %cst_64 = arith.constant dense<0.000000e+00> : vector<20x128xf32>
    %173 = tpu.matmul %171, %172, %cst_64 {dimension_numbers = #tpu.dot_dimension_numbers<[1], [0], [0], [1], [0, 0, 1, 1], [], []>} : vector<20x10xbf16>, vector<10x128xbf16>, vector<20x128xf32> -> vector<20x128xf32>
    %174 = tpu.concatenate %170, %173, %3 in 1 : vector<20x128xf32>, vector<20x128xf32>, vector<20x128xf32> -> vector<20x384xf32>
    %175 = arith.truncf %174 : vector<20x384xf32> to vector<20x384xbf16>
    %cst_65 = arith.constant dense<0.000000e+00> : vector<20x128xf32>
    %176 = tpu.matmul %175, %10, %cst_65 {dimension_numbers = #tpu.dot_dimension_numbers<[1], [0], [0], [1], [0, 0, 1, 1], [], []>} : vector<20x384xbf16>, vector<384x128xbf16>, vector<20x128xf32> -> vector<20x128xf32>
    %177 = vector.broadcast %11 : vector<1x128xf32> to vector<20x128xf32>
    %178 = arith.addf %176, %177 : vector<20x128xf32>
    %cst_66 = arith.constant 0.000000e+00 : f32
    %179 = vector.broadcast %cst_66 : f32 to vector<20x128xf32>
    %180 = arith.maximumf %178, %179 : vector<20x128xf32>
    %181 = arith.truncf %9 : vector<10x20xf32> to vector<10x20xbf16>
    %182 = arith.truncf %180 : vector<20x128xf32> to vector<20x128xbf16>
    %cst_67 = arith.constant dense<0.000000e+00> : vector<10x128xf32>
    %183 = tpu.matmul %181, %182, %cst_67 {dimension_numbers = #tpu.dot_dimension_numbers<[1], [0], [0], [1], [0, 0, 1, 1], [], []>} : vector<10x20xbf16>, vector<20x128xbf16>, vector<10x128xf32> -> vector<10x128xf32>
    %184 = arith.truncf %116 : vector<12x128xf32> to vector<12x128xbf16>
    %185 = arith.truncf %151 : vector<10x128xf32> to vector<10x128xbf16>
    %cst_68 = arith.constant dense<0.000000e+00> : vector<12x10xf32>
    %186 = tpu.matmul %184, %185, %cst_68 {dimension_numbers = #tpu.dot_dimension_numbers<[1], [1], [0], [0], [0, 0, 1, 0], [], []>} : vector<12x128xbf16>, vector<10x128xbf16>, vector<12x10xf32> -> vector<12x10xf32>
    %187 = arith.truncf %151 : vector<10x128xf32> to vector<10x128xbf16>
    %188 = arith.truncf %116 : vector<12x128xf32> to vector<12x128xbf16>
    %cst_69 = arith.constant dense<0.000000e+00> : vector<10x12xf32>
    %189 = tpu.matmul %187, %188, %cst_69 {dimension_numbers = #tpu.dot_dimension_numbers<[1], [1], [0], [0], [0, 0, 1, 0], [], []>} : vector<10x128xbf16>, vector<12x128xbf16>, vector<10x12xf32> -> vector<10x12xf32>
    %cst_70 = arith.constant dense<0xFF800000> : vector<12xf32>
    %190 = vector.multi_reduction <maximumf>, %186, %cst_70 [1] : vector<12x10xf32> to vector<12xf32>
    %191 = vector.shape_cast %190 : vector<12xf32> to vector<12x1xf32>
    %192 = vector.broadcast %191 : vector<12x1xf32> to vector<12x10xf32>
    %193 = arith.subf %186, %192 : vector<12x10xf32>
    %194 = math.exp %193 : vector<12x10xf32>
    %cst_71 = arith.constant dense<0.000000e+00> : vector<12xf32>
    %195 = vector.multi_reduction <add>, %194, %cst_71 [1] : vector<12x10xf32> to vector<12xf32>
    %196 = vector.shape_cast %195 : vector<12xf32> to vector<12x1xf32>
    %197 = tpu.reciprocal %196 {approx = true} : vector<12x1xf32> -> vector<12x1xf32>
    %198 = vector.broadcast %197 : vector<12x1xf32> to vector<12x10xf32>
    %199 = arith.mulf %194, %198 : vector<12x10xf32>
    %cst_72 = arith.constant dense<0xFF800000> : vector<10xf32>
    %200 = vector.multi_reduction <maximumf>, %189, %cst_72 [1] : vector<10x12xf32> to vector<10xf32>
    %201 = vector.shape_cast %200 : vector<10xf32> to vector<10x1xf32>
    %202 = vector.broadcast %201 : vector<10x1xf32> to vector<10x12xf32>
    %203 = arith.subf %189, %202 : vector<10x12xf32>
    %204 = math.exp %203 : vector<10x12xf32>
    %cst_73 = arith.constant dense<0.000000e+00> : vector<10xf32>
    %205 = vector.multi_reduction <add>, %204, %cst_73 [1] : vector<10x12xf32> to vector<10xf32>
    %206 = vector.shape_cast %205 : vector<10xf32> to vector<10x1xf32>
    %207 = tpu.reciprocal %206 {approx = true} : vector<10x1xf32> -> vector<10x1xf32>
    %208 = vector.broadcast %207 : vector<10x1xf32> to vector<10x12xf32>
    %209 = arith.mulf %204, %208 : vector<10x12xf32>
    %210 = arith.truncf %199 : vector<12x10xf32> to vector<12x10xbf16>
    %211 = arith.truncf %151 : vector<10x128xf32> to vector<10x128xbf16>
    %cst_74 = arith.constant dense<0.000000e+00> : vector<12x128xf32>
    %212 = tpu.matmul %210, %211, %cst_74 {dimension_numbers = #tpu.dot_dimension_numbers<[1], [0], [0], [1], [0, 0, 1, 1], [], []>} : vector<12x10xbf16>, vector<10x128xbf16>, vector<12x128xf32> -> vector<12x128xf32>
    %213 = arith.subf %116, %212 : vector<12x128xf32>
    %214 = arith.truncf %209 : vector<10x12xf32> to vector<10x12xbf16>
    %215 = arith.truncf %116 : vector<12x128xf32> to vector<12x128xbf16>
    %cst_75 = arith.constant dense<0.000000e+00> : vector<10x128xf32>
    %216 = tpu.matmul %214, %215, %cst_75 {dimension_numbers = #tpu.dot_dimension_numbers<[1], [0], [0], [1], [0, 0, 1, 1], [], []>} : vector<10x12xbf16>, vector<12x128xbf16>, vector<10x128xf32> -> vector<10x128xf32>
    %217 = arith.subf %151, %216 : vector<10x128xf32>
    %218 = tpu.concatenate %167, %213 in 1 : vector<12x128xf32>, vector<12x128xf32> -> vector<12x256xf32>
    %219 = arith.truncf %218 : vector<12x256xf32> to vector<12x256xbf16>
    %cst_76 = arith.constant dense<0.000000e+00> : vector<12x384xf32>
    %220 = tpu.matmul %219, %12, %cst_76 {dimension_numbers = #tpu.dot_dimension_numbers<[1], [0], [0], [1], [0, 0, 1, 1], [], []>} : vector<12x256xbf16>, vector<256x384xbf16>, vector<12x384xf32> -> vector<12x384xf32>
    %221 = vector.broadcast %14 : vector<1x384xf32> to vector<12x384xf32>
    %222 = arith.addf %220, %221 : vector<12x384xf32>
    %223 = arith.truncf %116 : vector<12x128xf32> to vector<12x128xbf16>
    %cst_77 = arith.constant dense<0.000000e+00> : vector<12x384xf32>
    %224 = tpu.matmul %223, %13, %cst_77 {dimension_numbers = #tpu.dot_dimension_numbers<[1], [0], [0], [1], [0, 0, 1, 1], [], []>} : vector<12x128xbf16>, vector<128x384xbf16>, vector<12x384xf32> -> vector<12x384xf32>
    %225 = vector.broadcast %15 : vector<1x384xf32> to vector<12x384xf32>
    %226 = arith.addf %224, %225 : vector<12x384xf32>
    %227 = vector.extract_strided_slice %222 {offsets = [0, 0], sizes = [12, 128], strides = [1, 1]} : vector<12x384xf32> to vector<12x128xf32>
    %228 = vector.extract_strided_slice %226 {offsets = [0, 0], sizes = [12, 128], strides = [1, 1]} : vector<12x384xf32> to vector<12x128xf32>
    %229 = arith.addf %227, %228 : vector<12x128xf32>
    %230 = arith.negf %229 : vector<12x128xf32>
    %231 = math.exp %230 : vector<12x128xf32>
    %cst_78 = arith.constant 1.000000e+00 : f32
    %232 = vector.broadcast %cst_78 : f32 to vector<12x128xf32>
    %233 = arith.addf %232, %231 : vector<12x128xf32>
    %234 = arith.divf %232, %233 : vector<12x128xf32>
    %235 = vector.extract_strided_slice %222 {offsets = [0, 128], sizes = [12, 128], strides = [1, 1]} : vector<12x384xf32> to vector<12x128xf32>
    %236 = vector.extract_strided_slice %226 {offsets = [0, 128], sizes = [12, 128], strides = [1, 1]} : vector<12x384xf32> to vector<12x128xf32>
    %237 = arith.addf %235, %236 : vector<12x128xf32>
    %238 = arith.negf %237 : vector<12x128xf32>
    %239 = math.exp %238 : vector<12x128xf32>
    %cst_79 = arith.constant 1.000000e+00 : f32
    %240 = vector.broadcast %cst_79 : f32 to vector<12x128xf32>
    %241 = arith.addf %240, %239 : vector<12x128xf32>
    %242 = arith.divf %240, %241 : vector<12x128xf32>
    %243 = vector.extract_strided_slice %222 {offsets = [0, 256], sizes = [12, 128], strides = [1, 1]} : vector<12x384xf32> to vector<12x128xf32>
    %244 = vector.extract_strided_slice %226 {offsets = [0, 256], sizes = [12, 128], strides = [1, 1]} : vector<12x384xf32> to vector<12x128xf32>
    %245 = arith.mulf %234, %244 : vector<12x128xf32>
    %246 = arith.addf %243, %245 : vector<12x128xf32>
    %247 = math.tanh %246 : vector<12x128xf32>
    %cst_80 = arith.constant 1.000000e+00 : f32
    %248 = vector.broadcast %cst_80 : f32 to vector<12x128xf32>
    %249 = arith.subf %248, %242 : vector<12x128xf32>
    %250 = arith.mulf %249, %247 : vector<12x128xf32>
    %251 = arith.mulf %242, %116 : vector<12x128xf32>
    %252 = arith.addf %250, %251 : vector<12x128xf32>
    %253 = tpu.concatenate %183, %217 in 1 : vector<10x128xf32>, vector<10x128xf32> -> vector<10x256xf32>
    %254 = arith.truncf %253 : vector<10x256xf32> to vector<10x256xbf16>
    %cst_81 = arith.constant dense<0.000000e+00> : vector<10x384xf32>
    %255 = tpu.matmul %254, %12, %cst_81 {dimension_numbers = #tpu.dot_dimension_numbers<[1], [0], [0], [1], [0, 0, 1, 1], [], []>} : vector<10x256xbf16>, vector<256x384xbf16>, vector<10x384xf32> -> vector<10x384xf32>
    %256 = vector.broadcast %14 : vector<1x384xf32> to vector<10x384xf32>
    %257 = arith.addf %255, %256 : vector<10x384xf32>
    %258 = arith.truncf %151 : vector<10x128xf32> to vector<10x128xbf16>
    %cst_82 = arith.constant dense<0.000000e+00> : vector<10x384xf32>
    %259 = tpu.matmul %258, %13, %cst_82 {dimension_numbers = #tpu.dot_dimension_numbers<[1], [0], [0], [1], [0, 0, 1, 1], [], []>} : vector<10x128xbf16>, vector<128x384xbf16>, vector<10x384xf32> -> vector<10x384xf32>
    %260 = vector.broadcast %15 : vector<1x384xf32> to vector<10x384xf32>
    %261 = arith.addf %259, %260 : vector<10x384xf32>
    %262 = vector.extract_strided_slice %257 {offsets = [0, 0], sizes = [10, 128], strides = [1, 1]} : vector<10x384xf32> to vector<10x128xf32>
    %263 = vector.extract_strided_slice %261 {offsets = [0, 0], sizes = [10, 128], strides = [1, 1]} : vector<10x384xf32> to vector<10x128xf32>
    %264 = arith.addf %262, %263 : vector<10x128xf32>
    %265 = arith.negf %264 : vector<10x128xf32>
    %266 = math.exp %265 : vector<10x128xf32>
    %cst_83 = arith.constant 1.000000e+00 : f32
    %267 = vector.broadcast %cst_83 : f32 to vector<10x128xf32>
    %268 = arith.addf %267, %266 : vector<10x128xf32>
    %269 = arith.divf %267, %268 : vector<10x128xf32>
    %270 = vector.extract_strided_slice %257 {offsets = [0, 128], sizes = [10, 128], strides = [1, 1]} : vector<10x384xf32> to vector<10x128xf32>
    %271 = vector.extract_strided_slice %261 {offsets = [0, 128], sizes = [10, 128], strides = [1, 1]} : vector<10x384xf32> to vector<10x128xf32>
    %272 = arith.addf %270, %271 : vector<10x128xf32>
    %273 = arith.negf %272 : vector<10x128xf32>
    %274 = math.exp %273 : vector<10x128xf32>
    %cst_84 = arith.constant 1.000000e+00 : f32
    %275 = vector.broadcast %cst_84 : f32 to vector<10x128xf32>
    %276 = arith.addf %275, %274 : vector<10x128xf32>
    %277 = arith.divf %275, %276 : vector<10x128xf32>
    %278 = vector.extract_strided_slice %257 {offsets = [0, 256], sizes = [10, 128], strides = [1, 1]} : vector<10x384xf32> to vector<10x128xf32>
    %279 = vector.extract_strided_slice %261 {offsets = [0, 256], sizes = [10, 128], strides = [1, 1]} : vector<10x384xf32> to vector<10x128xf32>
    %280 = arith.mulf %269, %279 : vector<10x128xf32>
    %281 = arith.addf %278, %280 : vector<10x128xf32>
    %282 = math.tanh %281 : vector<10x128xf32>
    %cst_85 = arith.constant 1.000000e+00 : f32
    %283 = vector.broadcast %cst_85 : f32 to vector<10x128xf32>
    %284 = arith.subf %283, %277 : vector<10x128xf32>
    %285 = arith.mulf %284, %282 : vector<10x128xf32>
    %286 = arith.mulf %277, %151 : vector<10x128xf32>
    %287 = arith.addf %285, %286 : vector<10x128xf32>
    %c0_86 = arith.constant 0 : index
    %c0_87 = arith.constant 0 : index
    %288 = vector.load %arg16[%c0_86, %c0_87] : memref<1x128xf32, #tpu.memory_space<vmem>>, vector<1x128xf32>
    %c0_88 = arith.constant 0 : index
    %c0_89 = arith.constant 0 : index
    %289 = vector.load %arg17[%c0_88, %c0_89] : memref<1x1xf32, #tpu.memory_space<vmem>>, vector<1x1xf32>
    %290 = vector.broadcast %288 : vector<1x128xf32> to vector<12x128xf32>
    %291 = arith.mulf %252, %290 : vector<12x128xf32>
    %cst_90 = arith.constant dense<0.000000e+00> : vector<12xf32>
    %292 = vector.multi_reduction <add>, %291, %cst_90 [1] : vector<12x128xf32> to vector<12xf32>
    %293 = vector.shape_cast %292 : vector<12xf32> to vector<12x1xf32>
    %294 = vector.broadcast %289 : vector<1x1xf32> to vector<12x1xf32>
    %295 = arith.addf %293, %294 : vector<12x1xf32>
    %296 = arith.negf %295 : vector<12x1xf32>
    %297 = math.exp %296 : vector<12x1xf32>
    %cst_91 = arith.constant 1.000000e+00 : f32
    %298 = vector.broadcast %cst_91 : f32 to vector<12x1xf32>
    %299 = arith.addf %298, %297 : vector<12x1xf32>
    %300 = arith.divf %298, %299 : vector<12x1xf32>
    %cst_92 = arith.constant dense<0xFF800000> : vector<1xf32>
    %301 = vector.multi_reduction <maximumf>, %300, %cst_92 [0] : vector<12x1xf32> to vector<1xf32>
    %302 = vector.shape_cast %301 : vector<1xf32> to vector<1x1xf32>
    %303 = vector.broadcast %302 : vector<1x1xf32> to vector<12x1xf32>
    %304 = arith.subf %300, %303 : vector<12x1xf32>
    %305 = math.exp %304 : vector<12x1xf32>
    %cst_93 = arith.constant dense<0.000000e+00> : vector<1xf32>
    %306 = vector.multi_reduction <add>, %305, %cst_93 [0] : vector<12x1xf32> to vector<1xf32>
    %307 = vector.shape_cast %306 : vector<1xf32> to vector<1x1xf32>
    %308 = tpu.reciprocal %307 {approx = true} : vector<1x1xf32> -> vector<1x1xf32>
    %309 = vector.broadcast %308 : vector<1x1xf32> to vector<12x1xf32>
    %310 = arith.mulf %305, %309 : vector<12x1xf32>
    %311 = vector.broadcast %310 : vector<12x1xf32> to vector<12x128xf32>
    %312 = arith.mulf %311, %252 : vector<12x128xf32>
    %cst_94 = arith.constant dense<0.000000e+00> : vector<128xf32>
    %313 = vector.multi_reduction <add>, %312, %cst_94 [0] : vector<12x128xf32> to vector<128xf32>
    %314 = vector.shape_cast %313 : vector<128xf32> to vector<1x128xf32>
    %315 = vector.broadcast %288 : vector<1x128xf32> to vector<10x128xf32>
    %316 = arith.mulf %287, %315 : vector<10x128xf32>
    %cst_95 = arith.constant dense<0.000000e+00> : vector<10xf32>
    %317 = vector.multi_reduction <add>, %316, %cst_95 [1] : vector<10x128xf32> to vector<10xf32>
    %318 = vector.shape_cast %317 : vector<10xf32> to vector<10x1xf32>
    %319 = vector.broadcast %289 : vector<1x1xf32> to vector<10x1xf32>
    %320 = arith.addf %318, %319 : vector<10x1xf32>
    %321 = arith.negf %320 : vector<10x1xf32>
    %322 = math.exp %321 : vector<10x1xf32>
    %cst_96 = arith.constant 1.000000e+00 : f32
    %323 = vector.broadcast %cst_96 : f32 to vector<10x1xf32>
    %324 = arith.addf %323, %322 : vector<10x1xf32>
    %325 = arith.divf %323, %324 : vector<10x1xf32>
    %cst_97 = arith.constant dense<0xFF800000> : vector<1xf32>
    %326 = vector.multi_reduction <maximumf>, %325, %cst_97 [0] : vector<10x1xf32> to vector<1xf32>
    %327 = vector.shape_cast %326 : vector<1xf32> to vector<1x1xf32>
    %328 = vector.broadcast %327 : vector<1x1xf32> to vector<10x1xf32>
    %329 = arith.subf %325, %328 : vector<10x1xf32>
    %330 = math.exp %329 : vector<10x1xf32>
    %cst_98 = arith.constant dense<0.000000e+00> : vector<1xf32>
    %331 = vector.multi_reduction <add>, %330, %cst_98 [0] : vector<10x1xf32> to vector<1xf32>
    %332 = vector.shape_cast %331 : vector<1xf32> to vector<1x1xf32>
    %333 = tpu.reciprocal %332 {approx = true} : vector<1x1xf32> -> vector<1x1xf32>
    %334 = vector.broadcast %333 : vector<1x1xf32> to vector<10x1xf32>
    %335 = arith.mulf %330, %334 : vector<10x1xf32>
    %336 = vector.broadcast %335 : vector<10x1xf32> to vector<10x128xf32>
    %337 = arith.mulf %336, %287 : vector<10x128xf32>
    %cst_99 = arith.constant dense<0.000000e+00> : vector<128xf32>
    %338 = vector.multi_reduction <add>, %337, %cst_99 [0] : vector<10x128xf32> to vector<128xf32>
    %339 = vector.shape_cast %338 : vector<128xf32> to vector<1x128xf32>
    %340 = tpu.concatenate %314, %339 in 1 : vector<1x128xf32>, vector<1x128xf32> -> vector<1x256xf32>
    %c0_100 = arith.constant 0 : index
    %c0_101 = arith.constant 0 : index
    %341 = vector.load %arg18[%c0_100, %c0_101] : memref<256x512xbf16, #tpu.memory_space<vmem>>, vector<256x512xbf16>
    %c0_102 = arith.constant 0 : index
    %c0_103 = arith.constant 0 : index
    %342 = vector.load %arg19[%c0_102, %c0_103] : memref<1x512xf32, #tpu.memory_space<vmem>>, vector<1x512xf32>
    %c0_104 = arith.constant 0 : index
    %c0_105 = arith.constant 0 : index
    %343 = vector.load %arg20[%c0_104, %c0_105] : memref<512x256xbf16, #tpu.memory_space<vmem>>, vector<512x256xbf16>
    %c0_106 = arith.constant 0 : index
    %c0_107 = arith.constant 0 : index
    %344 = vector.load %arg21[%c0_106, %c0_107] : memref<1x256xf32, #tpu.memory_space<vmem>>, vector<1x256xf32>
    %345 = arith.truncf %340 : vector<1x256xf32> to vector<1x256xbf16>
    %cst_108 = arith.constant dense<0.000000e+00> : vector<1x512xf32>
    %346 = tpu.matmul %345, %341, %cst_108 {dimension_numbers = #tpu.dot_dimension_numbers<[1], [0], [0], [1], [0, 0, 1, 1], [], []>} : vector<1x256xbf16>, vector<256x512xbf16>, vector<1x512xf32> -> vector<1x512xf32>
    %347 = arith.addf %346, %342 : vector<1x512xf32>
    %cst_109 = arith.constant 0.000000e+00 : f32
    %348 = vector.broadcast %cst_109 : f32 to vector<1x512xf32>
    %349 = arith.maximumf %347, %348 : vector<1x512xf32>
    %350 = arith.truncf %349 : vector<1x512xf32> to vector<1x512xbf16>
    %cst_110 = arith.constant dense<0.000000e+00> : vector<1x256xf32>
    %351 = tpu.matmul %350, %343, %cst_110 {dimension_numbers = #tpu.dot_dimension_numbers<[1], [0], [0], [1], [0, 0, 1, 1], [], []>} : vector<1x512xbf16>, vector<512x256xbf16>, vector<1x256xf32> -> vector<1x256xf32>
    %352 = arith.addf %351, %344 : vector<1x256xf32>
    %cst_111 = arith.constant 0.000000e+00 : f32
    %353 = vector.broadcast %cst_111 : f32 to vector<1x256xf32>
    %354 = arith.maximumf %352, %353 : vector<1x256xf32>
    %355 = tpu.concatenate %339, %314 in 1 : vector<1x128xf32>, vector<1x128xf32> -> vector<1x256xf32>
    %c0_112 = arith.constant 0 : index
    %c0_113 = arith.constant 0 : index
    %356 = vector.load %arg22[%c0_112, %c0_113] : memref<256x512xbf16, #tpu.memory_space<vmem>>, vector<256x512xbf16>
    %c0_114 = arith.constant 0 : index
    %c0_115 = arith.constant 0 : index
    %357 = vector.load %arg23[%c0_114, %c0_115] : memref<1x512xf32, #tpu.memory_space<vmem>>, vector<1x512xf32>
    %c0_116 = arith.constant 0 : index
    %c0_117 = arith.constant 0 : index
    %358 = vector.load %arg24[%c0_116, %c0_117] : memref<512x256xbf16, #tpu.memory_space<vmem>>, vector<512x256xbf16>
    %c0_118 = arith.constant 0 : index
    %c0_119 = arith.constant 0 : index
    %359 = vector.load %arg25[%c0_118, %c0_119] : memref<1x256xf32, #tpu.memory_space<vmem>>, vector<1x256xf32>
    %360 = arith.truncf %355 : vector<1x256xf32> to vector<1x256xbf16>
    %cst_120 = arith.constant dense<0.000000e+00> : vector<1x512xf32>
    %361 = tpu.matmul %360, %356, %cst_120 {dimension_numbers = #tpu.dot_dimension_numbers<[1], [0], [0], [1], [0, 0, 1, 1], [], []>} : vector<1x256xbf16>, vector<256x512xbf16>, vector<1x512xf32> -> vector<1x512xf32>
    %362 = arith.addf %361, %357 : vector<1x512xf32>
    %cst_121 = arith.constant 0.000000e+00 : f32
    %363 = vector.broadcast %cst_121 : f32 to vector<1x512xf32>
    %364 = arith.maximumf %362, %363 : vector<1x512xf32>
    %365 = arith.truncf %364 : vector<1x512xf32> to vector<1x512xbf16>
    %cst_122 = arith.constant dense<0.000000e+00> : vector<1x256xf32>
    %366 = tpu.matmul %365, %358, %cst_122 {dimension_numbers = #tpu.dot_dimension_numbers<[1], [0], [0], [1], [0, 0, 1, 1], [], []>} : vector<1x512xbf16>, vector<512x256xbf16>, vector<1x256xf32> -> vector<1x256xf32>
    %367 = arith.addf %366, %359 : vector<1x256xf32>
    %cst_123 = arith.constant 0.000000e+00 : f32
    %368 = vector.broadcast %cst_123 : f32 to vector<1x256xf32>
    %369 = arith.maximumf %367, %368 : vector<1x256xf32>
    %370 = arith.addf %354, %369 : vector<1x256xf32>
    %cst_124 = arith.constant 5.000000e-01 : f32
    %371 = vector.broadcast %cst_124 : f32 to vector<1x256xf32>
    %372 = arith.mulf %371, %370 : vector<1x256xf32>
    %c0_125 = arith.constant 0 : index
    %c0_126 = arith.constant 0 : index
    %373 = vector.load %arg26[%c0_125, %c0_126] : memref<256x128xbf16, #tpu.memory_space<vmem>>, vector<256x128xbf16>
    %374 = arith.truncf %372 : vector<1x256xf32> to vector<1x256xbf16>
    %cst_127 = arith.constant dense<0.000000e+00> : vector<1x128xf32>
    %375 = tpu.matmul %374, %373, %cst_127 {dimension_numbers = #tpu.dot_dimension_numbers<[1], [0], [0], [1], [0, 0, 1, 1], [], []>} : vector<1x256xbf16>, vector<256x128xbf16>, vector<1x128xf32> -> vector<1x128xf32>
    %c0_128 = arith.constant 0 : index
    %c0_129 = arith.constant 0 : index
    %376 = vector.load %arg27[%c0_128, %c0_129] : memref<1x128xf32, #tpu.memory_space<vmem>>, vector<1x128xf32>
    %377 = arith.addf %375, %376 : vector<1x128xf32>
    %c0_130 = arith.constant 0 : index
    %c0_131 = arith.constant 0 : index
    %378 = vector.load %arg28[%c0_130, %c0_131] : memref<1x128xf32, #tpu.memory_space<vmem>>, vector<1x128xf32>
    tpu.vector_store %arg28[%c0_130, %c0_131], %377 {strides = array<i32>} : memref<1x128xf32, #tpu.memory_space<vmem>>, vector<1x128xf32>,
    return
  }
}

</mosaic_0001>

<bundles_post_ra>
// kernel: tpu_custom_call.1
= control target key start
LH: loop header
LB: loop body
LE: loop exit
PB: predicated region body
PF: predicated region fallthrough
CT: control target
= control target key end

     0   :  { %s9670_s0 = inlined_call_operand.hbm [shape: f32[12,128], index: 0, kind: input, shape index: {}]   ;;  %s9671_s1 = inlined_call_operand.hbm [shape: f32[10,128], index: 1, kind: input, shape index: {}]   ;;  %s9672_s2 = inlined_call_operand.hbm [shape: f32[24,128], index: 2, kind: input, shape index: {}]   ;;  %s9673_s3 = inlined_call_operand.hbm [shape: f32[20,128], index: 3, kind: input, shape index: {}]   ;;  %s9674_s4 = inlined_call_operand.vmem [shape: f32[24,12], index: 4, kind: input, shape index: {}]   ;;  %s9675_s5 = inlined_call_operand.vmem [shape: f32[24,12], index: 5, kind: input, shape index: {}]   ;;  %s9676_s6 = inlined_call_operand.hbm [shape: f32[12,24], index: 6, kind: input, shape index: {}]   ;;  %s9677_s7 = inlined_call_operand.vmem [shape: f32[20,10], index: 7, kind: input, shape index: {}]   ;;  %s9678_s8 = inlined_call_operand.vmem [shape: f32[20,10], index: 8, kind: input, shape index: {}]   ;;  %s9679_s9 = inlined_call_operand.hbm [shape: f32[10,20], index: 9, kind: input, shape index: {}]   ;;  %s9680_s10 = inlined_call_operand.vmem [shape: bf16[384,128], index: 10, kind: input, shape index: {}]   ;;  %s9681_s11 = inlined_call_operand.hbm [shape: f32[1,128], index: 11, kind: input, shape index: {}]   ;;  %s9682_s12 = inlined_call_operand.hbm [shape: bf16[256,384], index: 12, kind: input, shape index: {}]   ;;  %s9683_s13 = inlined_call_operand.hbm [shape: bf16[128,384], index: 13, kind: input, shape index: {}]   ;;  %s9684_s14 = inlined_call_operand.vmem [shape: f32[1,384], index: 14, kind: input, shape index: {}]   ;;  %s9685_s15 = inlined_call_operand.vmem [shape: f32[1,384], index: 15, kind: input, shape index: {}]   ;;  %s9686_s16 = inlined_call_operand.vmem [shape: f32[1,128], index: 16, kind: input, shape index: {}]   ;;  %s9687_s17 = inlined_call_operand.<no memory space> [shape: f32[1,1], index: 17, kind: input, shape index: {}]   ;;  %s9688_s18 = inlined_call_operand.hbm [shape: bf16[256,512], index: 18, kind: input, shape index: {}]   ;;  %s9689_s19 = inlined_call_operand.vmem [shape: f32[1,512], index: 19, kind: input, shape index: {}]   ;;  %s9690_s20 = inlined_call_operand.hbm [shape: bf16[512,256], index: 20, kind: input, shape index: {}]   ;;  %s9691_s21 = inlined_call_operand.vmem [shape: f32[1,256], index: 21, kind: input, shape index: {}]   ;;  %s9692_s22 = inlined_call_operand.hbm [shape: bf16[256,512], index: 22, kind: input, shape index: {}]   ;;  %s9693_s23 = inlined_call_operand.vmem [shape: f32[1,512], index: 23, kind: input, shape index: {}]   ;;  %s9694_s24 = inlined_call_operand.hbm [shape: bf16[512,256], index: 24, kind: input, shape index: {}]   ;;  %s9695_s25 = inlined_call_operand.vmem [shape: f32[1,256], index: 25, kind: input, shape index: {}]   ;;  %s9696_s26 = inlined_call_operand.hbm [shape: bf16[256,128], index: 26, kind: input, shape index: {}]   ;;  %s9697_s27 = inlined_call_operand.vmem [shape: f32[1,128], index: 27, kind: input, shape index: {}]   ;;  %s9698_s28 = inlined_call_operand.hbm [shape: f32[1,128], index: 28, kind: output, shape index: {}]  }
   0x1   :  { %9772 = sst [smem:[#allocation63_spill]] %s9670_s0  ;;  %v33_v0 = vstv %s9687_s17 }
   0x2   :  { %9773 = sst [smem:[#allocation64_spill]] %s9671_s1  ;;  %34 = vst [vmem:[#allocation2] sm:$0x1] %v33_v0 }
   0x3   :  { %9774 = sst [smem:[#allocation65_spill]] %s9672_s2 }
   0x4   :  { %9775 = sst [smem:[#allocation66_spill]] %s9673_s3 }
   0x5   :  { %9776 = sst [smem:[#allocation67_spill]] %s9674_s4 }
   0x6   :  { %9777 = sst [smem:[#allocation68_spill]] %s9675_s5 }
   0x7   :  { %9778 = sst [smem:[#allocation69_spill]] %s9676_s6 }
   0x8   :  { %9779 = sst [smem:[#allocation70_spill]] %s9677_s7 }
   0x9   :  { %9780 = sst [smem:[#allocation71_spill]] %s9678_s8 }
   0xa   :  { %9781 = sst [smem:[#allocation72_spill]] %s9679_s9 }
   0xb   :  { %9782 = sst [smem:[#allocation73_spill]] %s9680_s10 }
   0xc   :  { %9783 = sst [smem:[#allocation74_spill]] %s9681_s11 }
   0xd   :  { %9784 = sst [smem:[#allocation75_spill]] %s9682_s12 }
   0xe   :  { %9785 = sst [smem:[#allocation76_spill]] %s9697_s27 }
   0xf   :  { %9786 = sst [smem:[#allocation77_spill]] %s9698_s28 }
  0x10   :  { %35 = vsyncpa [#allocation4], 0 }
  0x11   :  { %36 = vsyncpa [#allocation7], 0 }
  0x12   :  { %37 = vsyncpa [#allocation10], 0 }
  0x13   :  { %38 = vsyncpa [#allocation13], 0 }
  0x14   :  { %39 = vsyncpa [#allocation16], 0 }
  0x15   :  { %40 = vsyncpa [#allocation19], 0 }
  0x16   :  { %41 = vsyncpa [#allocation22], 0 }
  0x17   :  { %42 = vsyncpa [#allocation25], 0 }
  0x18   :  { %43 = vsyncpa [#allocation5], 0  ;;  %s7926_s9 = smov [#allocation6]   ;;  %s7927_s3 = smov [#allocation9]  }
  0x19   :  { %s61_s30 = sshll.u32 %s7926_s9, 4  ;;  %s85_s6 = sshll.u32 %s7927_s3, 4  ;;  %s62_s30 = int_to_ptr.vmem [resolvable:$true] %s61_s30  ;;  %s8100_s6 = int_to_ptr.vmem [resolvable:$true] %s85_s6 }
  0x1a   :  { %s9787_s17 = sld [smem:[#allocation64_spill]] }
  0x20   :  { %s7578_s11 = scalar_lea.hbm %s9787_s17, 256 }
  0x21   :  { %p7579_p0 = scmp.ne.s32.totalorder %s9787_s17, %s7578_s11  ;;  %p7582_p1 = scmp.lt.u32.totalorder %s7578_s11, %s9787_s17 }
  0x23   :  { %p7584_p2 = pnand %p7582_p1, %p7579_p0 }
  0x25   :  { %7587 = shalt.err (!%p7584_p2)
}
  0x26   :  { %s7588_s1 = scalar_lea.vmem %s62_s30, 256  ;;  %p7593_p4 = scmp.lt.s32.totalorder %s62_s30, %s62_s30 }
  0x27   :  { %p7589_p3 = scmp.ne.s32.totalorder %s62_s30, %s7588_s1  ;;  %p7594_p5 = scmp.lt.s32.totalorder %s7588_s1, %s7588_s1 }
  0x29   :  { %p7595_p6 = por %p7594_p5, %p7593_p4 }
  0x2b   :  { %p7596_p7 = pnand %p7595_p6, %p7589_p3 }
  0x2d   :  { %7599 = shalt.err (!%p7596_p7)
}
  0x2e   :  { %s7928_s4 = smov 128   ;;  %s7929_s8 = smov 8  }
  0x2f   :  { %67 = dma.hbm_to_vmem [thread:$0]  %s9787_s17, 256, %s62_s30, [#allocation7], %s7928_s4, %s7928_s4, %s7929_s8  }
  0x30   :  { %s9788_s0 = sld [smem:[#allocation66_spill]] }
  0x36   :  { %s7600_s11 = scalar_lea.hbm %s9788_s0, 384 }
  0x37   :  { %p7601_p8 = scmp.ne.s32.totalorder %s9788_s0, %s7600_s11  ;;  %p7604_p9 = scmp.lt.u32.totalorder %s7600_s11, %s9788_s0 }
  0x39   :  { %p7606_p10 = pnand %p7604_p9, %p7601_p8 }
  0x3b   :  { %7609 = shalt.err (!%p7606_p10)
}
  0x3c   :  { %s7610_s1 = scalar_lea.vmem %s8100_s6, 384  ;;  %p7615_p12 = scmp.lt.s32.totalorder %s8100_s6, %s8100_s6 }
  0x3d   :  { %p7611_p11 = scmp.ne.s32.totalorder %s8100_s6, %s7610_s1  ;;  %p7616_p13 = scmp.lt.s32.totalorder %s7610_s1, %s7610_s1 }
  0x3f   :  { %p7617_p0 = por %p7616_p13, %p7615_p12 }
  0x41   :  { %p7618_p1 = pnand %p7617_p0, %p7611_p11 }
  0x43   :  { %7621 = shalt.err (!%p7618_p1)
}
  0x44   :  { %91 = dma.hbm_to_vmem [thread:$0]  %s9788_s0, 384, %s8100_s6, [#allocation10], %s7928_s4, %s7928_s4, %s7929_s8  }
  0x45   :  { %s7930_s5 = smov [#allocation12]   ;;  %s7931_s3 = smov [#allocation15]  }
  0x46   :  { %s117_s9 = sshll.u32 %s7930_s5, 4  ;;  %s141_s10 = sshll.u32 %s7931_s3, 4  ;;  %s118_s9 = int_to_ptr.vmem [resolvable:$true] %s117_s9  ;;  %s8137_s10 = int_to_ptr.vmem [resolvable:$true] %s141_s10 }
  0x47   :  { %s9789_s2 = sld [smem:[#allocation72_spill]] }
  0x4d   :  { %s7622_s7 = scalar_lea.hbm %s9789_s2, 256 }
  0x4e   :  { %p7623_p2 = scmp.ne.s32.totalorder %s9789_s2, %s7622_s7  ;;  %p7626_p3 = scmp.lt.u32.totalorder %s7622_s7, %s9789_s2 }
  0x50   :  { %p7628_p4 = pnand %p7626_p3, %p7623_p2 }
  0x52   :  { %7631 = shalt.err (!%p7628_p4)
}
  0x53   :  { %s7632_s6 = scalar_lea.vmem %s118_s9, 256  ;;  %p7637_p6 = scmp.lt.s32.totalorder %s118_s9, %s118_s9 }
  0x54   :  { %p7633_p5 = scmp.ne.s32.totalorder %s118_s9, %s7632_s6  ;;  %p7638_p7 = scmp.lt.s32.totalorder %s7632_s6, %s7632_s6 }
  0x56   :  { %p7639_p8 = por %p7638_p7, %p7637_p6 }
  0x58   :  { %p7640_p9 = pnand %p7639_p8, %p7633_p5 }
  0x5a   :  { %7643 = shalt.err (!%p7640_p9)
}
  0x5b   :  { %123 = dma.hbm_to_vmem [thread:$0]  %s9789_s2, 256, %s118_s9, [#allocation13], %s7928_s4, %s7928_s4, %s7929_s8  }
  0x5c   :  { %s9790_s27 = sld [smem:[#allocation75_spill]] }
  0x62   :  { %s7644_s28 = scalar_lea.hbm %s9790_s27, 6144 }
  0x63   :  { %p7645_p10 = scmp.ne.s32.totalorder %s9790_s27, %s7644_s28  ;;  %p7648_p11 = scmp.lt.u32.totalorder %s7644_s28, %s9790_s27 }
  0x65   :  { %p7650_p12 = pnand %p7648_p11, %p7645_p10 }
  0x67   :  { %7653 = shalt.err (!%p7650_p12)
}
  0x68   :  { %s7654_s12 = scalar_lea.vmem %s8137_s10, 6144  ;;  %p7659_p0 = scmp.lt.s32.totalorder %s8137_s10, %s8137_s10 }
  0x69   :  { %p7655_p13 = scmp.ne.s32.totalorder %s8137_s10, %s7654_s12  ;;  %p7660_p1 = scmp.lt.s32.totalorder %s7654_s12, %s7654_s12 }
  0x6b   :  { %p7661_p2 = por %p7660_p1, %p7659_p0 }
  0x6d   :  { %p7662_p3 = pnand %p7661_p2, %p7655_p13 }
  0x6f   :  { %7665 = shalt.err (!%p7662_p3)
}
  0x70   :  { %s9713_s9 = smov 192   ;;  %s9714_s2 = smov 12  }
  0x71   :  { %147 = dma.hbm_to_vmem [thread:$0]  %s9790_s27, 6144, %s8137_s10, [#allocation16], %s9713_s9, %s9713_s9, %s9714_s2  }
  0x72   :  { %s7934_s0 = smov [#allocation18]   ;;  %s7666_s28 = scalar_lea.hbm %s9688_s18, 8192 }
  0x73   :  { %s173_s30 = sshll.u32 %s7934_s0, 4  ;;  %p7667_p4 = scmp.ne.s32.totalorder %s9688_s18, %s7666_s28  ;;  %s174_s30 = int_to_ptr.vmem [resolvable:$true] %s173_s30 }
  0x74   :  { %p7670_p5 = scmp.lt.u32.totalorder %s7666_s28, %s9688_s18 }
  0x76   :  { %p7672_p6 = pnand %p7670_p5, %p7667_p4 }
  0x78   :  { %7675 = shalt.err (!%p7672_p6)
}
  0x79   :  { %s7676_s12 = scalar_lea.vmem %s174_s30, 8192  ;;  %p7681_p8 = scmp.lt.s32.totalorder %s174_s30, %s174_s30 }
  0x7a   :  { %p7677_p7 = scmp.ne.s32.totalorder %s174_s30, %s7676_s12  ;;  %p7682_p9 = scmp.lt.s32.totalorder %s7676_s12, %s7676_s12 }
  0x7c   :  { %p7683_p10 = por %p7682_p9, %p7681_p8 }
  0x7e   :  { %p7684_p11 = pnand %p7683_p10, %p7677_p7 }
  0x80   :  { %7687 = shalt.err (!%p7684_p11)
}
  0x81   :  { %s7935_s10 = smov 256   ;;  %s7936_s27 = smov 16  }
  0x82   :  { %179 = dma.hbm_to_vmem [thread:$0]  %s9688_s18, 8192, %s174_s30, [#allocation19], %s7935_s10, %s7935_s10, %s7936_s27  }
  0x83   :  { %s7937_s0 = smov [#allocation21]   ;;  %s7938_s5 = smov [#allocation3]  }
  0x84   :  { %s201_s17 = sshll.u32 %s7937_s0, 4  ;;  %s49_s28 = sshll.u32 %s7938_s5, 4  ;;  %s202_s17 = int_to_ptr.vmem [resolvable:$true] %s201_s17  ;;  %s50_s28 = int_to_ptr.vmem [resolvable:$true] %s49_s28 }
  0x85   :  { %s7688_s29 = scalar_lea.hbm %s9692_s22, 8192 }
  0x86   :  { %p7689_p12 = scmp.ne.s32.totalorder %s9692_s22, %s7688_s29  ;;  %p7692_p13 = scmp.lt.u32.totalorder %s7688_s29, %s9692_s22 }
  0x88   :  { %p7694_p0 = pnand %p7692_p13, %p7689_p12 }
  0x8a   :  { %7697 = shalt.err (!%p7694_p0)
}
  0x8b   :  { %s7698_s18 = scalar_lea.vmem %s202_s17, 8192  ;;  %p7703_p2 = scmp.lt.s32.totalorder %s202_s17, %s202_s17 }
  0x8c   :  { %p7699_p1 = scmp.ne.s32.totalorder %s202_s17, %s7698_s18  ;;  %p7704_p3 = scmp.lt.s32.totalorder %s7698_s18, %s7698_s18 }
  0x8e   :  { %p7705_p4 = por %p7704_p3, %p7703_p2 }
  0x90   :  { %p7706_p5 = pnand %p7705_p4, %p7699_p1 }
  0x92   :  { %7709 = shalt.err (!%p7706_p5)
}
  0x93   :  { %207 = dma.hbm_to_vmem [thread:$0]  %s9692_s22, 8192, %s202_s17, [#allocation22], %s7935_s10, %s7935_s10, %s7936_s27  }
  0x94   :  { %s9791_s5 = sld [smem:[#allocation63_spill]] }
  0x9a   :  { %s7710_s3 = scalar_lea.hbm %s9791_s5, 256 }
  0x9b   :  { %p7711_p6 = scmp.ne.s32.totalorder %s9791_s5, %s7710_s3  ;;  %p7714_p7 = scmp.lt.u32.totalorder %s7710_s3, %s9791_s5 }
  0x9d   :  { %p7716_p8 = pnand %p7714_p7, %p7711_p6 }
  0x9f   :  { %7719 = shalt.err (!%p7716_p8)
}
  0xa0   :  { %s7720_s7 = scalar_lea.vmem %s50_s28, 256  ;;  %p7725_p10 = scmp.lt.s32.totalorder %s50_s28, %s50_s28 }
  0xa1   :  { %p7721_p9 = scmp.ne.s32.totalorder %s50_s28, %s7720_s7  ;;  %p7726_p11 = scmp.lt.s32.totalorder %s7720_s7, %s7720_s7 }
  0xa3   :  { %p7727_p12 = por %p7726_p11, %p7725_p10 }
  0xa5   :  { %p7728_p13 = pnand %p7727_p12, %p7721_p9 }
  0xa7   :  { %7731 = shalt.err (!%p7728_p13)
}
  0xa8   :  { %55 = dma.hbm_to_vmem [thread:$0]  %s9791_s5, 256, %s50_s28, [#allocation4], %s7928_s4, %s7928_s4, %s7929_s8  }
  0xa9   :  { %s7939_s27 = smov [#allocation8]   ;;  %s7940_s12 = smov [#allocation11]  }
  0xaa   :  { %s73_s17 = sshll.u32 %s7939_s27, 4  ;;  %s101_s18 = sshll.u32 %s7940_s12, 4  ;;  %s74_s17 = int_to_ptr.vmem [resolvable:$true] %s73_s17  ;;  %s102_s18 = int_to_ptr.vmem [resolvable:$true] %s101_s18 }
  0xab   :  { %s9792_s6 = sld [smem:[#allocation65_spill]] }
  0xb1   :  { %s7732_s0 = scalar_lea.hbm %s9792_s6, 384 }
  0xb2   :  { %p7733_p0 = scmp.ne.s32.totalorder %s9792_s6, %s7732_s0  ;;  %p7736_p1 = scmp.lt.u32.totalorder %s7732_s0, %s9792_s6 }
  0xb4   :  { %p7738_p2 = pnand %p7736_p1, %p7733_p0 }
  0xb6   :  { %7741 = shalt.err (!%p7738_p2)
}
  0xb7   :  { %s7742_s28 = scalar_lea.vmem %s74_s17, 384  ;;  %p7747_p4 = scmp.lt.s32.totalorder %s74_s17, %s74_s17 }
  0xb8   :  { %p7743_p3 = scmp.ne.s32.totalorder %s74_s17, %s7742_s28  ;;  %p7748_p5 = scmp.lt.s32.totalorder %s7742_s28, %s7742_s28 }
  0xba   :  { %p7749_p6 = por %p7748_p5, %p7747_p4 }
  0xbc   :  { %p7750_p7 = pnand %p7749_p6, %p7743_p3 }
  0xbe   :  { %7753 = shalt.err (!%p7750_p7)
}
  0xbf   :  { %79 = dma.hbm_to_vmem [thread:$0]  %s9792_s6, 384, %s74_s17, [#allocation7], %s7928_s4, %s7928_s4, %s7929_s8  }
  0xc0   :  { %s9793_s10 = sld [smem:[#allocation69_spill]] }
  0xc6   :  { %s7754_s27 = scalar_lea.hbm %s9793_s10, 256 }
  0xc7   :  { %p7755_p8 = scmp.ne.s32.totalorder %s9793_s10, %s7754_s27  ;;  %p7758_p9 = scmp.lt.u32.totalorder %s7754_s27, %s9793_s10 }
  0xc9   :  { %p7760_p10 = pnand %p7758_p9, %p7755_p8 }
  0xcb   :  { %7763 = shalt.err (!%p7760_p10)
}
  0xcc   :  { %s7764_s3 = scalar_lea.vmem %s102_s18, 256  ;;  %p7769_p12 = scmp.lt.s32.totalorder %s102_s18, %s102_s18 }
  0xcd   :  { %p7765_p11 = scmp.ne.s32.totalorder %s102_s18, %s7764_s3  ;;  %p7770_p13 = scmp.lt.s32.totalorder %s7764_s3, %s7764_s3 }
  0xcf   :  { %p7771_p0 = por %p7770_p13, %p7769_p12 }
  0xd1   :  { %p7772_p1 = pnand %p7771_p0, %p7765_p11 }
  0xd3   :  { %7775 = shalt.err (!%p7772_p1)
}
  0xd4   :  { %107 = dma.hbm_to_vmem [thread:$0]  %s9793_s10, 256, %s102_s18, [#allocation10], %s7928_s4, %s7928_s4, %s7929_s8  }
  0xd5   :  { %s7941_s9 = smov [#allocation14]   ;;  %s7942_s11 = smov [#allocation17]  }
  0xd6   :  { %s132_s2 = sshll.u32 %s7941_s9, 4  ;;  %s153_s28 = sshll.u32 %s7942_s11, 4  ;;  %s133_s2 = int_to_ptr.vmem [resolvable:$true] %s132_s2  ;;  %s154_s28 = int_to_ptr.vmem [resolvable:$true] %s153_s28 }
  0xd7   :  { %s9794_s7 = sld [smem:[#allocation74_spill]] }
  0xdd   :  { %s7776_s22 = scalar_lea.hbm %s9794_s7, 16 }
  0xde   :  { %p7777_p2 = scmp.ne.s32.totalorder %s9794_s7, %s7776_s22  ;;  %p7780_p3 = scmp.lt.u32.totalorder %s7776_s22, %s9794_s7 }
  0xe0   :  { %p7782_p4 = pnand %p7780_p3, %p7777_p2 }
  0xe2   :  { %7785 = shalt.err (!%p7782_p4)
}
  0xe3   :  { %s7786_s18 = scalar_lea.vmem %s133_s2, 16  ;;  %s7790_s10 = scalar_lea.vmem %s133_s2, 32 }
  0xe4   :  { %p7787_p5 = scmp.ne.s32.totalorder %s133_s2, %s7786_s18  ;;  %p7791_p6 = scmp.lt.s32.totalorder %s133_s2, %s133_s2 }
  0xe5   :  { %p7792_p7 = scmp.lt.s32.totalorder %s7790_s10, %s7786_s18 }
  0xe7   :  { %p7793_p8 = por %p7792_p7, %p7791_p6 }
  0xe9   :  { %p7794_p9 = pnand %p7793_p8, %p7787_p5 }
  0xeb   :  { %7797 = shalt.err (!%p7794_p9)
}
  0xec   :  { %135 = dma.hbm_to_vmem [thread:$0]  %s9794_s7, 16, %s133_s2, [#allocation13]  }
  0xed   :  { %s7798_s9 = scalar_lea.hbm %s9683_s13, 3072 }
  0xee   :  { %p7799_p10 = scmp.ne.s32.totalorder %s9683_s13, %s7798_s9  ;;  %p7802_p11 = scmp.lt.u32.totalorder %s7798_s9, %s9683_s13 }
  0xf0   :  { %p7804_p12 = pnand %p7802_p11, %p7799_p10 }
  0xf2   :  { %7807 = shalt.err (!%p7804_p12)
}
  0xf3   :  { %s7808_s27 = scalar_lea.vmem %s154_s28, 3072  ;;  %p7813_p0 = scmp.lt.s32.totalorder %s154_s28, %s154_s28 }
  0xf4   :  { %p7809_p13 = scmp.ne.s32.totalorder %s154_s28, %s7808_s27  ;;  %p7814_p1 = scmp.lt.s32.totalorder %s7808_s27, %s7808_s27 }
  0xf6   :  { %p7815_p2 = por %p7814_p1, %p7813_p0 }
  0xf8   :  { %p7816_p3 = pnand %p7815_p2, %p7809_p13 }
  0xfa   :  { %7819 = shalt.err (!%p7816_p3)
}
  0xfb   :  { %s9795_s2 = smov 12   ;;  %s9796_s7 = smov 192  }
  0xfc   :  { %159 = dma.hbm_to_vmem [thread:$0]  %s9683_s13, 3072, %s154_s28, [#allocation16], %s9796_s7, %s9796_s7, %s9795_s2  }
  0xfd   :  { %s7943_s1 = smov [#allocation20]   ;;  %s7944_s10 = smov [#allocation23]  }
  0xfe   :  { %s187_s18 = sshll.u32 %s7943_s1, 4  ;;  %s215_s0 = sshll.u32 %s7944_s10, 4  ;;  %s188_s18 = int_to_ptr.vmem [resolvable:$true] %s187_s18  ;;  %s216_s0 = int_to_ptr.vmem [resolvable:$true] %s215_s0 }
  0xff   :  { %s7820_s6 = scalar_lea.hbm %s9690_s20, 8192 }
 0x100   :  { %p7821_p4 = scmp.ne.s32.totalorder %s9690_s20, %s7820_s6  ;;  %p7824_p5 = scmp.lt.u32.totalorder %s7820_s6, %s9690_s20 }
 0x102   :  { %p7826_p6 = pnand %p7824_p5, %p7821_p4 }
 0x104   :  { %7829 = shalt.err (!%p7826_p6)
}
 0x105   :  { %s7830_s13 = scalar_lea.vmem %s188_s18, 8192  ;;  %p7835_p8 = scmp.lt.s32.totalorder %s188_s18, %s188_s18 }
 0x106   :  { %p7831_p7 = scmp.ne.s32.totalorder %s188_s18, %s7830_s13  ;;  %p7836_p9 = scmp.lt.s32.totalorder %s7830_s13, %s7830_s13 }
 0x108   :  { %p7837_p10 = por %p7836_p9, %p7835_p8 }
 0x10a   :  { %p7838_p11 = pnand %p7837_p10, %p7831_p7 }
 0x10c   :  { %7841 = shalt.err (!%p7838_p11)
}
 0x10d   :  { %193 = dma.hbm_to_vmem [thread:$0]  %s9690_s20, 8192, %s188_s18, [#allocation19], %s7928_s4, %s7928_s4, %s7929_s8  }
 0x10e   :  { %s7842_s7 = scalar_lea.hbm %s9694_s24, 8192 }
 0x10f   :  { %p7843_p12 = scmp.ne.s32.totalorder %s9694_s24, %s7842_s7  ;;  %p7846_p13 = scmp.lt.u32.totalorder %s7842_s7, %s9694_s24 }
 0x111   :  { %p7848_p0 = pnand %p7846_p13, %p7843_p12 }
 0x113   :  { %7851 = shalt.err (!%p7848_p0)
}
 0x114   :  { %s7852_s3 = scalar_lea.vmem %s216_s0, 8192  ;;  %p7857_p2 = scmp.lt.s32.totalorder %s216_s0, %s216_s0 }
 0x115   :  { %p7853_p1 = scmp.ne.s32.totalorder %s216_s0, %s7852_s3  ;;  %p7858_p3 = scmp.lt.s32.totalorder %s7852_s3, %s7852_s3 }
 0x117   :  { %p7859_p4 = por %p7858_p3, %p7857_p2 }
 0x119   :  { %p7860_p5 = pnand %p7859_p4, %p7853_p1 }
 0x11b   :  { %7863 = shalt.err (!%p7860_p5)
}
 0x11c   :  { %221 = dma.hbm_to_vmem [thread:$0]  %s9694_s24, 8192, %s216_s0, [#allocation22], %s7928_s4, %s7928_s4, %s7929_s8  }
 0x11d   :  { %s7945_s17 = smov [#allocation24]   ;;  %s7864_s5 = scalar_lea.hbm %s9696_s26, 2048 }
 0x11e   :  { %s229_s6 = sshll.u32 %s7945_s17, 4  ;;  %p7865_p6 = scmp.ne.s32.totalorder %s9696_s26, %s7864_s5  ;;  %s230_s6 = int_to_ptr.vmem [resolvable:$true] %s229_s6 }
 0x11f   :  { %p7868_p7 = scmp.lt.u32.totalorder %s7864_s5, %s9696_s26 }
 0x121   :  { %p7870_p8 = pnand %p7868_p7, %p7865_p6 }
 0x123   :  { %7873 = shalt.err (!%p7870_p8)
}
 0x124   :  { %s7874_s27 = scalar_lea.vmem %s230_s6, 2048  ;;  %p7879_p10 = scmp.lt.s32.totalorder %s230_s6, %s230_s6 }
 0x125   :  { %p7875_p9 = scmp.ne.s32.totalorder %s230_s6, %s7874_s27  ;;  %p7880_p11 = scmp.lt.s32.totalorder %s7874_s27, %s7874_s27 }
 0x127   :  { %p7881_p12 = por %p7880_p11, %p7879_p10 }
 0x129   :  { %p7882_p13 = pnand %p7881_p12, %p7875_p9 }
 0x12b   :  { %7885 = shalt.err (!%p7882_p13)
}
 0x12c   :  { %s7946_s24 = smov 64   ;;  %s7947_s4 = smov 4  }
 0x12d   :  { %235 = dma.hbm_to_vmem [thread:$0]  %s9696_s26, 2048, %s230_s6, [#allocation25], %s7946_s24, %s7946_s24, %s7947_s4  }
 0x12e   :  { %7908 = dma.done.wait [#allocation4], 256  }
 0x12f   :  { %7909 = vsyncadd [#allocation4], 4294967040 }
 0x130   :  { %7910 = dma.done.wait [#allocation7], 640  }
 0x131   :  { %7911 = vsyncadd [#allocation7], 4294966656 }
 0x132   :  { %7912 = dma.done.wait [#allocation10], 640  }
 0x133   :  { %7913 = vsyncadd [#allocation10], 4294966656 }
 0x134   :  { %7914 = dma.done.wait [#allocation13], 272  }
 0x135   :  { %7915 = vsyncadd [#allocation13], 4294967024 }
 0x136   :  { %7916 = dma.done.wait [#allocation16], 9216  }
 0x137   :  { %7917 = vsyncadd [#allocation16], 4294958080 }
 0x138   :  { %7918 = dma.done.wait [#allocation19], 16384  }
 0x139   :  { %7919 = vsyncadd [#allocation19], 4294950912 }
 0x13a   :  { %7920 = dma.done.wait [#allocation22], 16384  }
 0x13b   :  { %7921 = vsyncadd [#allocation22], 4294950912 }
 0x13c   :  { %7922 = dma.done.wait [#allocation25], 2048  }
 0x13d   :  { %7923 = vsyncadd [#allocation25], 4294965248  ;;  %v281_v1 = vld [vmem:[#allocation3] sm:$0xff]  ;;  %v282_v2 = vld [vmem:[#allocation3 + $0x8] sm:$0xf]  ;;  %vm464_vm0 = vcmask 1045504  }
 0x13e   :  { %s9797_s7 = sld [smem:[#allocation68_spill]]  ;;  %v8315_v4 = vpack.c.bf16 %v282_v2, %v281_v1  ;;  %s9798_s3 = sld [smem:[#allocation67_spill]]  ;;  %vm457_vm1 = vcmask 97280   ;;  %v285_v45 = vld [vmem:[#allocation8] sm:$0xff]  ;;  %v286_v46 = vld [vmem:[#allocation8 + $0x8] sm:$0xff]  ;;  %v287_v54 = vld [vmem:[#allocation8 + $0x10] sm:$0xff] }
 0x13f   :  { %s9803_s13 = sld [smem:[#allocation73_spill]]  ;;  %v8458_v47 = vpack.c.bf16 %v286_v46, %v285_v45  ;;  %v8497_v55 = vpack.c.bf16 %v287_v54, %v287_v54  ;;  %v9715_v56 = vmov 0.0   ;;  %vm7949_vm2 = vmmov 0   ;;  %v8504_v57 = vld [vmem:[#allocation6] sm:$0xff]  ;;  %v8506_v58 = vld [vmem:[#allocation6 + $0x8] sm:$0x3] }
 0x140   :  { %6776 = vmatprep.subr.msk.bf16.mxu0 %vm464_vm0, %v8315_v4  ;;  %6777 = vmatprep.subr.msk.bf16.mxu1 %vm464_vm0, %v8315_v4  ;;  %v8342_v12 = vsel %vm464_vm0, %v8315_v4, 0  ;;  %v8510_v59 = vpack.c.bf16 %v8506_v58, %v8504_v57  ;;  %vm889_vm3 = vcmask 1044480   ;;  %s9807_s27 = sld [smem:[#allocation71_spill]]  ;;  %vm882_vm4 = vcmask 80896   ;;  %s9810_s9 = sld [smem:[#allocation70_spill]] }
 0x141   :  { %6429 = vmatpush3.bf16.msra.mxu0 %v8342_v12  ;;  %6435 = vmatpush3.bf16.msra.mxu1 %v8342_v12  ;;  %9804 = vst [vmem:[#allocation40_spill] sm:$0xff] %v8458_v47  ;;  %9805 = vst [vmem:[#allocation41_spill] sm:$0xff] %v8497_v55  ;;  %vm834_vm5 = vcmask 1043456   ;;  %vm830_vm6 = vcmask 195584   ;;  %vm1239_vm7 = vcmask 76800   ;;  %vm1109_vm8 = vcmask 1041408  }
 0x142   :  { %9806 = vst [vmem:[#allocation42_spill] sm:$0xff] %v8510_v59  ;;  %6778 = vmatprep.subr.msk.bf16.mxu0 %vm889_vm3, %v8510_v59  ;;  %v8527_v0 = vsel %vm889_vm3, %v8510_v59, 0  ;;  %vm1105_vm9 = vcmask 162816   ;;  %vm1262_vm10 = vcmask 91136   ;;  %vm3393_vm11 = vcmask 7168   ;;  %s9890_s26 = sld [smem:[#allocation76_spill]] }
 0x143   :  { %vm3464_vm12 = vcmask 1024   ;;  %vm3395_vm13 = vcmask 3072   ;;  %s7951_s2 = smov [#allocation26]  }
 0x144   :  { %v294_v3 = vld [vmem:[%s9797_s7] sm:$0xff]  ;;  %v295_v5 = vld [vmem:[%s9797_s7 + $0x8] sm:$0xff]  ;;  %v296_v10 = vld [vmem:[%s9797_s7 + $0x10] sm:$0xff]  ;;  %s5647_s7 = sshll.u32 %s7951_s2, 4  ;;  %s5648_s7 = int_to_ptr.vmem [resolvable:$true] %s5647_s7 }
 0x145   :  { %v291_v6 = vld [vmem:[%s9798_s3] sm:$0xff]  ;;  %v292_v7 = vld [vmem:[%s9798_s3 + $0x8] sm:$0xff]  ;;  %v8326_v8 = vpack.c.bf16 %v295_v5, %v294_v3  ;;  %v293_v11 = vld [vmem:[%s9798_s3 + $0x10] sm:$0xff]  ;;  %v8344_v13 = vpack.c.bf16 %v296_v10, %v296_v10  ;;  %s7886_s12 = scalar_lea.vmem %s5648_s7, 16  ;;  %s7890_s30 = scalar_lea.vmem %s5648_s7, 32 }
 0x146   :  { %v8328_v9 = vpack.c.bf16 %v292_v7, %v291_v6  ;;  %v8346_v14 = vpack.c.bf16 %v293_v11, %v293_v11  ;;  %v6812_v15 = vld [vmem:[%s9803_s13 + $0x40] sm:$0xff]   ;;  %v6814_v17 = vld [vmem:[%s9803_s13 + $0x48] sm:$0xff]   ;;  %v6816_v19 = vld [vmem:[%s9803_s13 + $0x50] sm:$0xff]   ;;  %p7887_p0 = scmp.ne.s32.totalorder %s5648_s7, %s7886_s12  ;;  %p7891_p1 = scmp.lt.s32.totalorder %s5648_s7, %s5648_s7 }
 0x147   :  { %9799 = vst [vmem:[#allocation36_spill] sm:$0xff] %v8326_v8  ;;  %9801 = vst [vmem:[#allocation38_spill] sm:$0xff] %v8344_v13  ;;  %v6813_v16 = vld [vmem:[%s9803_s13] sm:$0xff]   ;;  %6430 = vmatprep.mubr.msk.bf16.mxu0 %vm457_vm1, %v8326_v8  ;;  %6084 = vmatprep.subr.bf16.mxu1 %v6812_v15  ;;  %v6815_v18 = vld [vmem:[%s9803_s13 + $0x8] sm:$0xff]   ;;  %p7892_p2 = scmp.lt.s32.totalorder %s7890_s30, %s7886_s12 }
 0x148   :  { %9800 = vst [vmem:[#allocation37_spill] sm:$0xff] %v8328_v9  ;;  %9802 = vst [vmem:[#allocation39_spill] sm:$0xff] %v8346_v14  ;;  %6436 = vmatprep.mubr.msk.bf16.mxu1 %vm457_vm1, %v8328_v9  ;;  %6431 = vmatmul.mubr.msk.bf16.vlgmr.msra.gmra.mrb[0].mxu0 %vm457_vm1, %v8344_v13  ;;  %v8376_v20 = vld [vmem:[%s9803_s13 + $0x10] sm:$0xff]   ;;  %v8381_v21 = vld [vmem:[%s9803_s13 + $0x58] sm:$0xff]  }
 0x149   :  { %6437 = vmatmul.mubr.msk.bf16.vlgmr.msra.gmra.mrb[0].mxu1 %vm457_vm1, %v8346_v14  ;;  %v8386_v22 = vld [vmem:[%s9803_s13 + $0x18] sm:$0xff]   ;;  %v8392_v23 = vld [vmem:[%s9803_s13 + $0x60] sm:$0xff]   ;;  %v8403_v25 = vld [vmem:[%s9803_s13 + $0x68] sm:$0xff]   ;;  %6469 = vmatpush3.bf16.msra.mxu0 %v8527_v0  ;;  %p7893_p3 = por %p7892_p2, %p7891_p1 }
 0x14a   :  { %6085 = vmatpush3.bf16.msra.mxu1 %v6813_v16  ;;  %v8398_v24 = vld [vmem:[%s9803_s13 + $0x20] sm:$0xff]   ;;  %v8410_v26 = vld [vmem:[%s9803_s13 + $0x28] sm:$0xff]   ;;  %v8415_v27 = vld [vmem:[%s9803_s13 + $0x70] sm:$0xff]  }
 0x14b   :  { %6086 = vmatprep.subr.bf16.mxu1 %v6814_v17  ;;  %v8422_v28 = vld [vmem:[%s9803_s13 + $0x30] sm:$0xff]   ;;  %v8430_v29 = vld [vmem:[%s9803_s13 + $0x78] sm:$0xff]   ;;  %v8442_v31 = vld [vmem:[%s9803_s13 + $0x80] sm:$0xff]   ;;  %p7894_p4 = pnand %p7893_p3, %p7887_p0 }
 0x14c   :  { %v8435_v30 = vld [vmem:[%s9803_s13 + $0x38] sm:$0xff]   ;;  %v8448_v42 = vld [vmem:[%s9803_s13 + $0x88] sm:$0xff]   ;;  %v8455_v44 = vld [vmem:[%s9803_s13 + $0x90] sm:$0xff]  }
 0x14d   :  { %v8464_v49 = vld [vmem:[%s9803_s13 + $0x98] sm:$0xff]   ;;  %v8472_v50 = vld [vmem:[%s9803_s13 + $0xa0] sm:$0xff]   ;;  %v8479_v51 = vld [vmem:[%s9803_s13 + $0xa8] sm:$0xff]  }
 0x14e   :  { %6087 = vmatpush3.bf16.msra.mxu1 %v6815_v18  ;;  %v8486_v52 = vld [vmem:[%s9803_s13 + $0xb0] sm:$0xff]   ;;  %v8493_v53 = vld [vmem:[%s9803_s13 + $0xb8] sm:$0xff]   ;;  %v302_v60 = vld [vmem:[%s9807_s27] sm:$0xff] }
 0x14f   :  { %6088 = vmatprep.subr.bf16.mxu1 %v6816_v19  ;;  %v303_v61 = vld [vmem:[%s9807_s27 + $0x8] sm:$0xff]  ;;  %v304_v63 = vld [vmem:[%s9807_s27 + $0x10] sm:$0xf]  ;;  %v7472_v2 = vld [vmem:[%s9803_s13 + $0x40] sm:$0xff]  }
 0x150   :  { %v8518_v62 = vpack.c.bf16 %v303_v61, %v302_v60  ;;  %v8529_v1 = vpack.c.bf16 %v304_v63, %v304_v63  ;;  %6131 = vmatprep.subr.bf16.mxu0 %v7472_v2  ;;  %v7473_v3 = vld [vmem:[%s9803_s13] sm:$0xff]   ;;  %v7474_v5 = vld [vmem:[%s9803_s13 + $0x48] sm:$0xff]   ;;  %v7476_v7 = vld [vmem:[%s9803_s13 + $0x50] sm:$0xff]  }
 0x151   :  { %v7475_v6 = vld [vmem:[%s9803_s13 + $0x8] sm:$0xff]   ;;  %v299_v45 = vld [vmem:[%s9810_s9] sm:$0xff]  ;;  %v301_v61 = vld [vmem:[%s9810_s9 + $0x10] sm:$0xf] }
 0x152   :  { %6089 = vmatpush3.bf16.msra.mxu1 %v8376_v20  ;;  %9808 = vst [vmem:[#allocation43_spill] sm:$0xff] %v8518_v62  ;;  %9809 = vst [vmem:[#allocation44_spill] sm:$0xff] %v8529_v1  ;;  %6470 = vmatprep.mubr.msk.bf16.mxu0 %vm882_vm4, %v8518_v62  ;;  %v300_v46 = vld [vmem:[%s9810_s9 + $0x8] sm:$0xff]  ;;  %v8591_v63 = vpack.c.bf16 %v301_v61, %v301_v61  ;;  %v8798_v13 = vld [vmem:[#allocation17 + $0x64] ss:$12 sps:$4 sm:$0xff]  }
 0x153   :  { %6090 = vmatprep.subr.bf16.mxu1 %v8381_v21  ;;  %6471 = vmatmul.mubr.msk.bf16.vlgmr.msra.gmra.mrb[4].mxu0 %vm882_vm4, %v8529_v1  ;;  %v8578_v60 = vpack.c.bf16 %v300_v46, %v299_v45  ;;  %v6894_v62 = vld [vmem:[#allocation15 + $0x8] ss:$12 sps:$4 sm:$0xff]   ;;  %9820 = vst [vmem:[#allocation53_spill] sm:$0xff] %v8798_v13  ;;  %v6899_v14 = vld [vmem:[#allocation15 + $0x20] ss:$12 sps:$4 sm:$0xff]  }
 0x154   :  { %6132 = vmatpush3.bf16.msra.mxu0 %v7473_v3  ;;  %9813 = vst [vmem:[#allocation47_spill] sm:$0xff] %v8591_v63  ;;  %v289_v3 = vld [vmem:[#allocation9 + $0x8] sm:$0xff] }
 0x155   :  { %6133 = vmatprep.subr.bf16.mxu0 %v7474_v5  ;;  %9812 = vst [vmem:[#allocation46_spill] sm:$0xff] %v8578_v60  ;;  %v8817_v8 = vld [vmem:[#allocation17 + $0xac] ss:$12 sps:$4 sm:$0xff]   ;;  %v6914_v9 = vld [vmem:[#allocation15 + $0x68] ss:$12 sps:$4 sm:$0xff]  }
 0x156   :  { %6091 = vmatpush3.bf16.msra.mxu1 %v8386_v22  ;;  %9826 = vst [vmem:[#allocation59_spill] sm:$0xff] %v8817_v8 }
 0x157   :  { %6092 = vmatprep.subr.bf16.mxu1 %v8392_v23 }
 0x158   :  { %6134 = vmatpush3.bf16.msra.mxu0 %v7475_v6 }
 0x159   :  { %6135 = vmatprep.subr.bf16.mxu0 %v7476_v7 }
 0x15a   :  { %6093 = vmatpush3.bf16.msra.mxu1 %v8398_v24 }
 0x15b   :  { %6094 = vmatprep.subr.bf16.mxu1 %v8403_v25 }
 0x15c   :  { %6136 = vmatpush3.bf16.msra.mxu0 %v8376_v20 }
 0x15d   :  { %6137 = vmatprep.subr.bf16.mxu0 %v8381_v21 }
 0x15e   :  { %6095 = vmatpush3.bf16.msra.mxu1 %v8410_v26 }
 0x15f   :  { %6096 = vmatprep.subr.bf16.mxu1 %v8415_v27 }
 0x160   :  { %6138 = vmatpush3.bf16.msra.mxu0 %v8386_v22 }
 0x161   :  { %6139 = vmatprep.subr.bf16.mxu0 %v8392_v23 }
 0x162   :  { %6097 = vmatpush3.bf16.msra.mxu1 %v8422_v28 }
 0x163   :  { %6098 = vmatprep.subr.bf16.mxu1 %v8430_v29 }
 0x164   :  { %6140 = vmatpush3.bf16.msra.mxu0 %v8398_v24  ;;  %v8563_v24 = vld [vmem:[#allocation14] ss:$0 sm:$0xff] }
 0x165   :  { %6141 = vmatprep.subr.bf16.mxu0 %v8403_v25 }
 0x166   :  { %6099 = vmatpush3.bf16.msra.mxu1 %v8435_v30 }
 0x167   :  { %6440 = vmatprep.subr.bf16.mxu1 %v8442_v31 }
 0x168   :  { %6142 = vmatpush3.bf16.msra.mxu0 %v8410_v26 }
 0x169   :  { %6143 = vmatprep.subr.bf16.mxu0 %v8415_v27 }
 0x16c   :  { %6144 = vmatpush3.bf16.msra.mxu0 %v8422_v28 }
 0x16d   :  { %6145 = vmatprep.subr.bf16.mxu0 %v8430_v29 }
 0x170   :  { %6146 = vmatpush3.bf16.msra.mxu0 %v8435_v30 }
 0x171   :  { %6508 = vmatprep.subr.bf16.mxu0 %v9715_v56 }
 0x21b   :  { %v6432_v32 = vpop.f32.mrb[0].mxu0 }
 0x21c   :  { %v6438_v33 = vpop.f32.mrb[0].mxu1  ;;  %v502_v34 = vpop.f32.mrb[1].mxu0  ;;  %v575_v48 = vpack.c.bf16 %v6432_v32, %v6432_v32 }
 0x21d   :  { %v558_v35 = vpop.f32.mrb[1].mxu1  ;;  %v6433_v36 = vpop.f32.mrb[2].mxu0  ;;  %v576_v43 = vpack.c.bf16 %v6438_v33, %v6438_v33 }
 0x21e   :  { %v6439_v37 = vpop.f32.mrb[2].mxu1  ;;  %v505_v38 = vpop.f32.mrb[3].mxu0 }
 0x21f   :  { %v561_v39 = vpop.f32.mrb[3].mxu1  ;;  %v572_v40 = vpack.c.bf16 %v505_v38, %v502_v34 }
 0x220   :  { %v573_v41 = vpack.c.bf16 %v561_v39, %v558_v35 }
 0x222   :  { %760 = vmatprep.mubr.bf16.mxu1 %v573_v41  ;;  %v297_v41 = vld [vmem:[#allocation11] sm:$0xff] }
 0x223   :  { %761 = vmatmul.mubr.bf16.vlgmr.msra.gmra.mrb[4].mxu1 %v572_v40 }
 0x224   :  { %6441 = vmatpush3.bf16.msra.mxu1 %v8442_v31  ;;  %768 = vmatprep.mubr.bf16.mxu1 %v576_v43  ;;  %v298_v43 = vld [vmem:[#allocation11 + $0x8] sm:$0xf] }
 0x225   :  { %6442 = vmatprep.subr.bf16.mxu1 %v8448_v42  ;;  %v8576_v54 = vpack.c.bf16 %v298_v43, %v297_v41 }
 0x227   :  { %9811 = vst [vmem:[#allocation45_spill] sm:$0xff] %v8576_v54 }
 0x228   :  { %6443 = vmatpush3.bf16.msra.mxu1 %v8448_v42 }
 0x229   :  { %6444 = vmatprep.subr.bf16.mxu1 %v8455_v44 }
 0x22b   :  { %769 = vmatmul.mubr.bf16.gmra.mrb[8].mxu1 %v575_v48 }
 0x22c   :  { %6445 = vmatpush3.bf16.msra.mxu1 %v8455_v44  ;;  %6456 = vmatprep.mubr.bf16.mxu1 %v8458_v47  ;;  %v6898_v47 = vld [vmem:[#allocation15 + $0xe0] ss:$12 sps:$4 sm:$0xff]  }
 0x22d   :  { %6446 = vmatprep.subr.bf16.mxu1 %v8464_v49 }
 0x230   :  { %6447 = vmatpush3.bf16.msra.mxu1 %v8464_v49 }
 0x231   :  { %6448 = vmatprep.subr.bf16.mxu1 %v8472_v50 }
 0x234   :  { %6449 = vmatpush3.bf16.msra.mxu1 %v8472_v50 }
 0x235   :  { %6450 = vmatprep.subr.bf16.mxu1 %v8479_v51 }
 0x238   :  { %6451 = vmatpush3.bf16.msra.mxu1 %v8479_v51 }
 0x239   :  { %6452 = vmatprep.subr.bf16.mxu1 %v8486_v52 }
 0x23c   :  { %6453 = vmatpush3.bf16.msra.mxu1 %v8486_v52 }
 0x23d   :  { %6454 = vmatprep.subr.bf16.mxu1 %v8493_v53 }
 0x240   :  { %6455 = vmatpush3.bf16.msra.mxu1 %v8493_v53 }
 0x241   :  { %6460 = vmatprep.subr.bf16.mxu1 %v9715_v56 }
 0x243   :  { %6457 = vmatmul.mubr.bf16.vlgmr.msra.gmra.mrb[12].mxu1 %v8497_v55  ;;  %v8795_v55 = vld [vmem:[#allocation17 + $0x48] ss:$12 sps:$4 sm:$0xff]  }
 0x244   :  { %6464 = vmatprep.mubr.msk.bf16.mxu1 %vm7949_vm2, %v9715_v56 }
 0x2f6   :  { %v6100_v10 = vpop.f32.mrb[4].mxu1 }
 0x2f7   :  { %v6101_v11 = vpop.f32.mrb[5].mxu1 }
 0x2f8   :  { %v6102_v15 = vadd.f32 %v6101_v11, %v6100_v10  ;;  %v6103_v16 = vpop.f32.mrb[6].mxu1 }
 0x2f9   :  { %v6104_v17 = vpop.f32.mrb[7].mxu1 }
 0x2fa   :  { %v6105_v18 = vadd.f32 %v6104_v17, %v6103_v16  ;;  %v763_v27 = vadd.f32 %v6102_v15, %v8563_v24 }
 0x2fc   :  { %v766_v33 = vadd.f32 %v6105_v18, %v8563_v24 }
 0x2fe   :  { %v6106_v19 = vpop.f32.mrb[8].mxu1 }
 0x2ff   :  { %v6107_v20 = vpop.f32.mrb[9].mxu1 }
 0x300   :  { %v6108_v21 = vadd.f32 %v6107_v20, %v6106_v19  ;;  %v6109_v22 = vpop.f32.mrb[10].mxu1 }
 0x301   :  { %v6110_v23 = vpop.f32.mrb[11].mxu1 }
 0x302   :  { %v771_v25 = vadd.f32 %v6108_v21, %v8563_v24 }
 0x316   :  { %v6458_v26 = vpop.f32.mrb[12].mxu1 }
 0x317   :  { %v819_v28 = vadd.f32 %v6458_v26, %v771_v25  ;;  %v810_v29 = vpop.f32.mrb[13].mxu1 }
 0x318   :  { %v811_v30 = vadd.f32 %v810_v29, %v763_v27  ;;  %v6459_v32 = vpop.f32.mrb[14].mxu1 }
 0x319   :  { %v813_v34 = vpop.f32.mrb[15].mxu1  ;;  %v826_v36 = vmax.f32 %v819_v28, 0.0 }
 0x31a   :  { %v814_v35 = vadd.f32 %v813_v34, %v766_v33  ;;  %v824_v37 = vmax.f32 %v811_v30, 0.0 }
 0x31b   :  { %v829_v40 = vpack.c.bf16 %v826_v36, %v826_v36 }
 0x31c   :  { %v825_v38 = vmax.f32 %v814_v35, 0.0 }
 0x31d   :  { %v836_v48 = vsel %vm834_vm5, %v829_v40, 0 }
 0x31e   :  { %v828_v39 = vpack.c.bf16 %v825_v38, %v824_v37 }
 0x320   :  { %6461 = vmatpush3.bf16.msra.mxu1 %v828_v39 }
 0x321   :  { %6462 = vmatprep.subr.bf16.mxu1 %v9715_v56 }
 0x324   :  { %6463 = vmatpush3.bf16.msra.mxu1 %v836_v48 }
 0x325   :  { %6779 = vmatprep.subr.msk.bf16.mxu1 %vm889_vm3, %v8510_v59 }
 0x327   :  { %6465 = vmatmul.mubr.msk.bf16.vlgmr.msra.gmra.mrb[16].mxu1 %vm830_vm6, %v8576_v54 }
 0x328   :  { %6475 = vmatpush3.bf16.msra.mxu1 %v8527_v0  ;;  %6476 = vmatprep.mubr.msk.bf16.mxu1 %vm882_vm4, %v8578_v60  ;;  %v8776_v60 = vld [vmem:[#allocation17] ss:$12 sps:$4 sm:$0xff]  }
 0x329   :  { %6480 = vmatprep.subr.bf16.mxu1 %v8442_v31 }
 0x32f   :  { %6477 = vmatmul.mubr.msk.bf16.vlgmr.msra.gmra.mrb[20].mxu1 %vm882_vm4, %v8591_v63 }
 0x330   :  { %6481 = vmatpush3.bf16.msra.mxu1 %v8442_v31  ;;  %v6472_v31 = vpop.f32.mrb[4].mxu0 }
 0x331   :  { %6482 = vmatprep.subr.bf16.mxu1 %v8448_v42  ;;  %v1000_v21 = vpack.c.bf16 %v6472_v31, %v6472_v31 }
 0x334   :  { %6483 = vmatpush3.bf16.msra.mxu1 %v8448_v42  ;;  %v927_v42 = vpop.f32.mrb[5].mxu0 }
 0x335   :  { %6484 = vmatprep.subr.bf16.mxu1 %v8455_v44 }
 0x338   :  { %6485 = vmatpush3.bf16.msra.mxu1 %v8455_v44  ;;  %v6473_v44 = vpop.f32.mrb[6].mxu0 }
 0x339   :  { %6486 = vmatprep.subr.bf16.mxu1 %v8464_v49 }
 0x33c   :  { %6487 = vmatpush3.bf16.msra.mxu1 %v8464_v49  ;;  %v930_v49 = vpop.f32.mrb[7].mxu0 }
 0x33d   :  { %6488 = vmatprep.subr.bf16.mxu1 %v8472_v50  ;;  %v997_v2 = vpack.c.bf16 %v930_v49, %v927_v42 }
 0x340   :  { %6489 = vmatpush3.bf16.msra.mxu1 %v8472_v50  ;;  %v288_v50 = vld [vmem:[#allocation9] sm:$0xff] }
 0x341   :  { %6490 = vmatprep.subr.bf16.mxu1 %v8479_v51  ;;  %v8611_v5 = vpack.c.bf16 %v289_v3, %v288_v50  ;;  %v306_v50 = vld [vmem:[#allocation12 + $0x8] sm:$0x3] }
 0x343   :  { %9814 = vst [vmem:[#allocation48_spill] sm:$0xff] %v8611_v5  ;;  %6496 = vmatprep.mubr.bf16.mxu1 %v8611_v5 }
 0x344   :  { %6491 = vmatpush3.bf16.msra.mxu1 %v8479_v51  ;;  %v290_v51 = vld [vmem:[#allocation9 + $0x10] sm:$0xf] }
 0x345   :  { %6492 = vmatprep.subr.bf16.mxu1 %v8486_v52  ;;  %v8613_v6 = vpack.c.bf16 %v290_v51, %v290_v51 }
 0x347   :  { %9815 = vst [vmem:[#allocation49_spill] sm:$0xff] %v8613_v6 }
 0x348   :  { %6493 = vmatpush3.bf16.msra.mxu1 %v8486_v52 }
 0x349   :  { %6494 = vmatprep.subr.bf16.mxu1 %v8493_v53 }
 0x34c   :  { %6495 = vmatpush3.bf16.msra.mxu1 %v8493_v53 }
 0x34d   :  { %6500 = vmatprep.subr.bf16.mxu1 %v9715_v56 }
 0x34f   :  { %6497 = vmatmul.mubr.bf16.vlgmr.msra.gmra.mrb[24].mxu1 %v8613_v6 }
 0x350   :  { %6504 = vmatprep.mubr.msk.bf16.mxu1 %vm7949_vm2, %v9715_v56 }
 0x3fa   :  { %v872_v52 = vpop.f32.mrb[16].mxu1 }
 0x3fb   :  { %v6466_v53 = vpop.f32.mrb[17].mxu1 }
 0x3fc   :  { %v875_v7 = vpop.f32.mrb[18].mxu1 }
 0x3fd   :  { %v8619_v10 = vpack.c.bf16 %v875_v7, %v872_v52  ;;  %v6467_v11 = vpop.f32.mrb[19].mxu1 }
 0x402   :  { %v6478_v15 = vpop.f32.mrb[20].mxu1 }
 0x403   :  { %v983_v16 = vpop.f32.mrb[21].mxu1  ;;  %v1001_v20 = vpack.c.bf16 %v6478_v15, %v6478_v15 }
 0x404   :  { %v6479_v17 = vpop.f32.mrb[22].mxu1 }
 0x405   :  { %v986_v18 = vpop.f32.mrb[23].mxu1 }
 0x406   :  { %v998_v19 = vpack.c.bf16 %v986_v18, %v983_v16 }
 0x408   :  { %1035 = vmatprep.mubr.bf16.mxu0 %v998_v19 }
 0x409   :  { %1036 = vmatmul.mubr.bf16.vlgmr.msra.gmra.mrb[8].mxu0 %v997_v2  ;;  %v305_v2 = vld [vmem:[#allocation12] sm:$0xff] }
 0x40a   :  { %1043 = vmatprep.mubr.bf16.mxu0 %v1001_v20  ;;  %6509 = vmatpush3.bf16.xpose.msra.mxu0 %v8510_v59  ;;  %v8636_v7 = vpack.c.bf16 %v306_v50, %v305_v2  ;;  %v8688_v2 = vld [vmem:[#allocation15 + $0x60] ss:$12 sps:$4 sm:$0xff]   ;;  %v8691_v50 = vld [vmem:[#allocation15 + $0x7c] ss:$12 sps:$4 sm:$0xff]  }
 0x40b   :  { %6520 = vmatprep.subr.bf16.mxu0 %v9715_v56 }
 0x40c   :  { %9816 = vst [vmem:[#allocation50_spill] sm:$0xff] %v8636_v7 }
 0x411   :  { %1044 = vmatmul.mubr.bf16.gmra.mrb[12].mxu0 %v1000_v21 }
 0x412   :  { %6510 = vmatprep.mubr.msk.bf16.mxu0 %vm7949_vm2, %v9715_v56 }
 0x419   :  { %6511 = vmatmul.mubr.bf16.vlgmr.msra.gmra.mrb[16].mxu0 %v8315_v4 }
 0x41a   :  { %6521 = vmatpush3.bf16.msra.mxu0 %v8527_v0  ;;  %6522 = vmatprep.mubr.msk.bf16.mxu0 %vm7949_vm2, %v9715_v56 }
 0x422   :  { %v6498_v22 = vpop.f32.mrb[24].mxu1 }
 0x423   :  { %v1085_v23 = vpop.f32.mrb[25].mxu1 }
 0x424   :  { %v6499_v25 = vpop.f32.mrb[26].mxu1 }
 0x425   :  { %v1088_v26 = vpop.f32.mrb[27].mxu1 }
 0x4dc   :  { %v6147_v27 = vpop.f32.mrb[8].mxu0 }
 0x4dd   :  { %v6148_v28 = vpop.f32.mrb[9].mxu0 }
 0x4de   :  { %v6149_v29 = vadd.f32 %v6148_v28, %v6147_v27  ;;  %v6150_v30 = vpop.f32.mrb[10].mxu0 }
 0x4df   :  { %v6151_v32 = vpop.f32.mrb[11].mxu0 }
 0x4e0   :  { %v6152_v33 = vadd.f32 %v6151_v32, %v6150_v30  ;;  %v1038_v34 = vadd.f32 %v6149_v29, %v8563_v24 }
 0x4e2   :  { %v1086_v35 = vadd.f32 %v1085_v23, %v1038_v34  ;;  %v1041_v36 = vadd.f32 %v6152_v33, %v8563_v24 }
 0x4e4   :  { %v1089_v37 = vadd.f32 %v1088_v26, %v1041_v36  ;;  %v6153_v0 = vpop.f32.mrb[12].mxu0  ;;  %v1099_v39 = vmax.f32 %v1086_v35, 0.0  ;;  %v8661_v36 = vld [vmem:[#allocation15 + $0x4] ss:$12 sps:$4 sm:$0xff]  }
 0x4e5   :  { %v6154_v38 = vpop.f32.mrb[13].mxu0  ;;  %1650 = vmatprep.subr.bf16.mxu0 %v8661_v36 }
 0x4e6   :  { %v1100_v40 = vmax.f32 %v1089_v37, 0.0  ;;  %v6155_v41 = vadd.f32 %v6154_v38, %v6153_v0  ;;  %v6156_v43 = vpop.f32.mrb[14].mxu0 }
 0x4e7   :  { %v6157_v45 = vpop.f32.mrb[15].mxu0  ;;  %v8664_v43 = vld [vmem:[#allocation15] ss:$12 sps:$4 sm:$0xff]  }
 0x4e8   :  { %v1103_v46 = vpack.c.bf16 %v1100_v40, %v1099_v39  ;;  %v1046_v48 = vadd.f32 %v6155_v41, %v8563_v24 }
 0x4ea   :  { %v1094_v61 = vadd.f32 %v6498_v22, %v1046_v48  ;;  %6501 = vmatpush3.bf16.msra.mxu1 %v1103_v46  ;;  %v8666_v46 = vld [vmem:[#allocation15 + $0x1c] ss:$12 sps:$4 sm:$0xff]   ;;  %v8670_v48 = vld [vmem:[#allocation15 + $0x18] ss:$12 sps:$4 sm:$0xff]  }
 0x4eb   :  { %6502 = vmatprep.subr.bf16.mxu1 %v9715_v56 }
 0x4ec   :  { %v1101_v31 = vmax.f32 %v1094_v61, 0.0  ;;  %v1188_v42 = vpop.f32.mrb[16].mxu0  ;;  %v8673_v61 = vld [vmem:[#allocation15 + $0x34] ss:$12 sps:$4 sm:$0xff]  }
 0x4ed   :  { %v1236_v44 = vsel %vm882_vm4, %v1188_v42, -inf  ;;  %v6512_v49 = vpop.f32.mrb[17].mxu0 }
 0x4ee   :  { %1237 = vmax.xlane.f32.xlu0 %v1236_v44  ;;  %v1191_v3 = vpop.f32.mrb[18].mxu0  ;;  %v1104_v51 = vpack.c.bf16 %v1101_v31, %v1101_v31  ;;  %v8676_v31 = vld [vmem:[#allocation15 + $0x30] ss:$12 sps:$4 sm:$0xff]   ;;  %v8682_v44 = vld [vmem:[#allocation15 + $0x48] ss:$12 sps:$4 sm:$0xff]  }
 0x4ef   :  { %v1240_v52 = vsel %vm1239_vm7, %v1191_v3, -inf  ;;  %v6513_v53 = vpop.f32.mrb[19].mxu0  ;;  %v8685_v49 = vld [vmem:[#allocation15 + $0x64] ss:$12 sps:$4 sm:$0xff]  }
 0x4f0   :  { %v1111_v24 = vsel %vm1109_vm8, %v1104_v51, 0  ;;  %v8697_v51 = vld [vmem:[#allocation15 + $0x94] ss:$12 sps:$4 sm:$0xff]   ;;  %v8703_v53 = vld [vmem:[#allocation15 + $0xac] ss:$12 sps:$4 sm:$0xff]  }
 0x4f1   :  { %6503 = vmatpush3.bf16.msra.mxu1 %v1111_v24  ;;  %v8706_v24 = vld [vmem:[#allocation15 + $0xa8] ss:$12 sps:$4 sm:$0xff]  }
 0x4f2   :  { %1241 = vmax.xlane.f32.xlu0 %v1240_v52  ;;  %6514 = vmatprep.subr.bf16.mxu1 %v9715_v56  ;;  %v8700_v52 = vld [vmem:[#allocation15 + $0x90] ss:$12 sps:$4 sm:$0xff]  }
 0x4f4   :  { %6505 = vmatmul.mubr.msk.bf16.vlgmr.msra.gmra.mrb[28].mxu1 %vm1105_vm9, %v8636_v7 }
 0x4f5   :  { %6516 = vmatprep.mubr.msk.bf16.mxu1 %vm7949_vm2, %v9715_v56 }
 0x4fa   :  { %6515 = vmatpush3.bf16.xpose.msra.mxu1 %v8315_v4 }
 0x4fb   :  { %6526 = vmatprep.subr.bf16.mxu1 %v9715_v56 }
 0x501   :  { %6517 = vmatmul.mubr.bf16.vlgmr.msra.gmra.mrb[32].mxu1 %v8510_v59  ;;  %v8820_v59 = vld [vmem:[#allocation17 + $0xa8] ss:$12 sps:$4 sm:$0xff]  }
 0x502   :  { %6527 = vmatpush3.bf16.msra.mxu1 %v8342_v12  ;;  %6528 = vmatprep.mubr.msk.bf16.mxu1 %vm7949_vm2, %v9715_v56  ;;  %v8773_v56 = vld [vmem:[#allocation3 + $0x8] sm:$0xf]  ;;  %9827 = vst [vmem:[#allocation60_spill] sm:$0xff] %v8820_v59 }
 0x503   :  { %9818 = vst [vmem:[#allocation52_spill] sm:$0xff] %v8773_v56 }
 0x57b   :  { %v1238_v11 = vpop.xlane.xlu0 %1237 }
 0x57c   :  { %v1243_v15 = vsub.f32 %v1188_v42, %v1238_v11  ;;  %v8679_v42 = vld [vmem:[#allocation15 + $0x4c] ss:$12 sps:$4 sm:$0xff]   ;;  %v8709_v11 = vld [vmem:[#allocation15 + $0xc4] ss:$12 sps:$4 sm:$0xff]  }
 0x57e   :  { %v1245_v16 = vmul.f32 1.442695, %v1243_v15  ;;  %v8712_v15 = vld [vmem:[#allocation15 + $0xc0] ss:$12 sps:$4 sm:$0xff]  }
 0x57f   :  { %v1242_v17 = vpop.xlane.xlu0 %1241 }
 0x580   :  { %7332 = vpow2.f32 %v1245_v16  ;;  %v1244_v18 = vsub.f32 %v1191_v3, %v1242_v17  ;;  %v8694_v3 = vld [vmem:[#allocation15 + $0x78] ss:$12 sps:$4 sm:$0xff]   ;;  %v8715_v16 = vld [vmem:[#allocation15 + $0xdc] ss:$12 sps:$4 sm:$0xff]  }
 0x581   :  { %v8718_v17 = vld [vmem:[#allocation15 + $0xd8] ss:$12 sps:$4 sm:$0xff]  }
 0x582   :  { %v1247_v19 = vmul.f32 1.442695, %v1244_v18  ;;  %v8721_v18 = vld [vmem:[#allocation15 + $0xf4] ss:$12 sps:$4 sm:$0xff]  }
 0x584   :  { %7334 = vpow2.f32 %v1247_v19  ;;  %v8724_v19 = vld [vmem:[#allocation15 + $0xf0] ss:$12 sps:$4 sm:$0xff]  }
 0x58a   :  { %v7333_v20 = vpop.eup %7332 }
 0x58b   :  { %v1249_v21 = vsel %vm882_vm4, %v7333_v20, 0.0 }
 0x58c   :  { %1250 = vadd.xlane.f32.xlu1 %v1249_v21  ;;  %v8730_v21 = vld [vmem:[#allocation15 + $0x108] ss:$12 sps:$4 sm:$0xff]  }
 0x58e   :  { %v7335_v22 = vpop.eup %7334 }
 0x58f   :  { %v1252_v23 = vsel %vm1239_vm7, %v7335_v22, 0.0 }
 0x590   :  { %1253 = vadd.xlane.f32.xlu1 %v1252_v23  ;;  %v8736_v23 = vld [vmem:[#allocation15 + $0x120] ss:$12 sps:$4 sm:$0xff]  }
 0x5c7   :  { %v1147_v12 = vpop.f32.mrb[28].mxu1 }
 0x5c8   :  { %v6506_v25 = vpop.f32.mrb[29].mxu1 }
 0x5c9   :  { %v1150_v26 = vpop.f32.mrb[30].mxu1  ;;  %v8742_v25 = vld [vmem:[#allocation15 + $0x138] ss:$12 sps:$4 sm:$0xff]  }
 0x5ca   :  { %v8651_v27 = vpack.c.bf16 %v1150_v26, %v1147_v12  ;;  %v6507_v28 = vpop.f32.mrb[31].mxu1  ;;  %v8739_v12 = vld [vmem:[#allocation15 + $0x13c] ss:$12 sps:$4 sm:$0xff]   ;;  %v8745_v26 = vld [vmem:[#allocation15 + $0x154] ss:$12 sps:$4 sm:$0xff]  }
 0x5d4   :  { %v8653_v29 = vpop.f32.mrb[32].mxu1 }
 0x5d5   :  { %v6518_v30 = vpop.f32.mrb[33].mxu1  ;;  %v1259_v32 = vsel %vm457_vm1, %v8653_v29, -inf }
 0x5d6   :  { %1260 = vmax.xlane.f32.xlu0 %v1259_v32  ;;  %v8657_v33 = vpop.f32.mrb[34].mxu1 }
 0x5d7   :  { %v6519_v34 = vpop.f32.mrb[35].mxu1  ;;  %v1263_v35 = vsel %vm1262_vm10, %v8657_v33, -inf }
 0x5d8   :  { %1264 = vmax.xlane.f32.xlu1 %v1263_v35 }
 0x619   :  { %v1251_v37 = vpop.xlane.xlu1 %1250 }
 0x61a   :  { %7336 = vrcp.f32 %v1251_v37 }
 0x61d   :  { %v1254_v0 = vpop.xlane.xlu1 %1253 }
 0x61e   :  { %7338 = vrcp.f32 %v1254_v0 }
 0x624   :  { %v7337_v38 = vpop.eup %7336 }
 0x625   :  { %v1257_v40 = vmul.f32 %v7337_v38, %v7333_v20  ;;  %v8727_v20 = vld [vmem:[#allocation15 + $0x10c] ss:$12 sps:$4 sm:$0xff]  }
 0x628   :  { %v7339_v39 = vpop.eup %7338 }
 0x629   :  { %v1258_v41 = vmul.f32 %v7339_v39, %v7335_v22  ;;  %v8733_v22 = vld [vmem:[#allocation15 + $0x124] ss:$12 sps:$4 sm:$0xff]  }
 0x62b   :  { %v1282_v45 = vpack.c.bf16 %v1258_v41, %v1257_v40  ;;  %v8753_v41 = vld [vmem:[#allocation15 + $0x150] ss:$12 sps:$4 sm:$0xff]  }
 0x62d   :  { %6523 = vmatmul.mubr.msk.bf16.vlgmr.msra.gmra.mrb[20].mxu0 %vm882_vm4, %v1282_v45  ;;  %v8758_v45 = vld [vmem:[#allocation15 + $0x168] ss:$12 sps:$4 sm:$0xff]  }
 0x62e   :  { %1651 = vmatpush1.bf16.msra.mxu0 %v8664_v43 }
 0x62f   :  { %1652 = vmatprep.subr.bf16.mxu0 %v8666_v46 }
 0x632   :  { %1653 = vmatpush1.bf16.msra.mxu0 %v8670_v48 }
 0x633   :  { %1654 = vmatprep.subr.bf16.mxu0 %v8673_v61 }
 0x636   :  { %1655 = vmatpush1.bf16.msra.mxu0 %v8676_v31 }
 0x637   :  { %1656 = vmatprep.subr.bf16.mxu0 %v8679_v42 }
 0x63a   :  { %1657 = vmatpush1.bf16.msra.mxu0 %v8682_v44 }
 0x63b   :  { %1658 = vmatprep.subr.bf16.mxu0 %v8685_v49 }
 0x63e   :  { %1659 = vmatpush1.bf16.msra.mxu0 %v8688_v2 }
 0x63f   :  { %1660 = vmatprep.subr.bf16.mxu0 %v8691_v50 }
 0x642   :  { %1661 = vmatpush1.bf16.msra.mxu0 %v8694_v3 }
 0x643   :  { %1662 = vmatprep.subr.bf16.mxu0 %v8697_v51 }
 0x646   :  { %1663 = vmatpush1.bf16.msra.mxu0 %v8700_v52 }
 0x647   :  { %1664 = vmatprep.subr.bf16.mxu0 %v8703_v53 }
 0x64a   :  { %1665 = vmatpush1.bf16.msra.mxu0 %v8706_v24 }
 0x64b   :  { %1666 = vmatprep.subr.bf16.mxu0 %v8709_v11 }
 0x64e   :  { %1667 = vmatpush1.bf16.msra.mxu0 %v8712_v15 }
 0x64f   :  { %1668 = vmatprep.subr.bf16.mxu0 %v8715_v16 }
 0x652   :  { %1669 = vmatpush1.bf16.msra.mxu0 %v8718_v17 }
 0x653   :  { %1670 = vmatprep.subr.bf16.mxu0 %v8721_v18 }
 0x656   :  { %1671 = vmatpush1.bf16.msra.mxu0 %v8724_v19 }
 0x657   :  { %1672 = vmatprep.subr.bf16.mxu0 %v8727_v20 }
 0x65a   :  { %1673 = vmatpush1.bf16.msra.mxu0 %v8730_v21 }
 0x65b   :  { %1674 = vmatprep.subr.bf16.mxu0 %v8733_v22 }
 0x65e   :  { %1675 = vmatpush1.bf16.msra.mxu0 %v8736_v23 }
 0x65f   :  { %1676 = vmatprep.subr.bf16.mxu0 %v8739_v12 }
 0x662   :  { %1677 = vmatpush1.bf16.msra.mxu0 %v8742_v25 }
 0x663   :  { %v1261_v28 = vpop.xlane.xlu0 %1260  ;;  %1678 = vmatprep.subr.bf16.mxu0 %v8745_v26 }
 0x664   :  { %v1266_v30 = vsub.f32 %v8653_v29, %v1261_v28  ;;  %v8756_v29 = vld [vmem:[#allocation15 + $0x16c] ss:$12 sps:$4 sm:$0xff]   ;;  %v8765_v28 = vld [vmem:[#allocation15 + $0xc8] ss:$12 sps:$4 sm:$0xff]  }
 0x665   :  { %v1265_v32 = vpop.xlane.xlu1 %1264  ;;  %6180 = vmatprep.subr.bf16.mxu1 %v8765_v28 }
 0x666   :  { %v1268_v34 = vmul.f32 1.442695, %v1266_v30  ;;  %v1267_v35 = vsub.f32 %v8657_v33, %v1265_v32  ;;  %1679 = vmatpush1.bf16.msra.mxu0 %v8753_v41  ;;  %v8762_v33 = vld [vmem:[#allocation17 + $0x4] ss:$12 sps:$4 sm:$0xff]   ;;  %v9722_v30 = vmov 0  }
 0x667   :  { %1680 = vmatprep.subr.bf16.mxu0 %v8756_v29  ;;  %6810 = vset.pattern.permute.xlu0 %v9722_v30 }
 0x668   :  { %7340 = vpow2.f32 %v1268_v34  ;;  %v1270_v37 = vmul.f32 1.442695, %v1267_v35  ;;  %6811 = vset.pattern.permute.xlu1 %v9722_v30  ;;  %v8778_v30 = vld [vmem:[#allocation17 + $0x1c] ss:$12 sps:$4 sm:$0xff]  }
 0x66a   :  { %7342 = vpow2.f32 %v1270_v37  ;;  %1681 = vmatpush1.bf16.msra.mxu0 %v8758_v45 }
 0x66b   :  { %1878 = vmatprep.subr.bf16.mxu0 %v8762_v33 }
 0x672   :  { %v7341_v0 = vpop.eup %7340 }
 0x673   :  { %v1272_v38 = vsel %vm457_vm1, %v7341_v0, 0.0 }
 0x674   :  { %v7343_v39 = vpop.eup %7342  ;;  %1273 = vadd.xlane.f32.xlu0 %v1272_v38  ;;  %v8770_v38 = vld [vmem:[#allocation3] sm:$0xff] }
 0x675   :  { %v1275_v40 = vsel %vm1262_vm10, %v7343_v39, 0.0  ;;  %9817 = vst [vmem:[#allocation51_spill] sm:$0xff] %v8770_v38 }
 0x676   :  { %1276 = vadd.xlane.f32.xlu1 %v1275_v40 }
 0x700   :  { %v1320_v32 = vpop.f32.mrb[20].mxu0 }
 0x701   :  { %v6524_v34 = vpop.f32.mrb[21].mxu0  ;;  %v1274_v35 = vpop.xlane.xlu0 %1273  ;;  %v1327_v40 = vsub.f32 %v8770_v38, %v1320_v32  ;;  %v9819_v32 = vmov 0   ;;  %v6913_v38 = vld [vmem:[#allocation15 + $0x128] ss:$12 sps:$4 sm:$0xff]  }
 0x702   :  { %7344 = vrcp.f32 %v1274_v35  ;;  %v1323_v37 = vpop.f32.mrb[22].mxu0  ;;  %v8782_v34 = vld [vmem:[#allocation17 + $0x18] ss:$12 sps:$4 sm:$0xff]   ;;  %v8786_v35 = vld [vmem:[#allocation17 + $0x34] ss:$12 sps:$4 sm:$0xff]  }
 0x703   :  { %v1328_v7 = vsub.f32 %v8773_v56, %v1323_v37  ;;  %v6525_v6 = vpop.f32.mrb[23].mxu0  ;;  %v1277_v5 = vpop.xlane.xlu1 %1276  ;;  %v8792_v37 = vld [vmem:[#allocation17 + $0x4c] ss:$12 sps:$4 sm:$0xff]   ;;  %v8814_v56 = vld [vmem:[#allocation17 + $0x90] ss:$12 sps:$4 sm:$0xff]  }
 0x704   :  { %7346 = vrcp.f32 %v1277_v5  ;;  %v8789_v5 = vld [vmem:[#allocation17 + $0x30] ss:$12 sps:$4 sm:$0xff]   ;;  %9825 = vst [vmem:[#allocation58_spill] sm:$0xff] %v8814_v56 }
 0x705   :  { %v1377_v63 = vpack.c.bf16 %v1328_v7, %v1327_v40 }
 0x707   :  { %1682 = vmatprep.mubr.bf16.mxu0 %v1377_v63 }
 0x708   :  { %1683 = vmatmul.mubr.bf16.vlgmr.msra.gmra.mrb[24].mxu0 %v8619_v10 }
 0x709   :  { %1879 = vmatpush1.bf16.msra.mxu0 %v8776_v60  ;;  %1910 = vmatprep.mubr.bf16.mxu0 %v9819_v32 }
 0x70a   :  { %1880 = vmatprep.subr.bf16.mxu0 %v8778_v30 }
 0x70c   :  { %v7345_v6 = vpop.eup %7344 }
 0x70d   :  { %1881 = vmatpush1.bf16.msra.mxu0 %v8782_v34  ;;  %v1280_v40 = vmul.f32 %v7345_v6, %v7341_v0  ;;  %v8802_v0 = vld [vmem:[#allocation17 + $0x60] ss:$12 sps:$4 sm:$0xff]   ;;  %v6904_v6 = vld [vmem:[#allocation15 + $0x38] ss:$12 sps:$4 sm:$0xff]  }
 0x70e   :  { %v7347_v7 = vpop.eup %7346  ;;  %1882 = vmatprep.subr.bf16.mxu0 %v8786_v35  ;;  %9821 = vst [vmem:[#allocation54_spill] sm:$0xff] %v8802_v0 }
 0x70f   :  { %v1281_v1 = vmul.f32 %v7347_v7, %v7343_v39  ;;  %v6903_v39 = vld [vmem:[#allocation15 + $0xf8] ss:$12 sps:$4 sm:$0xff]  }
 0x710   :  { %v8808_v7 = vld [vmem:[#allocation17 + $0x78] ss:$12 sps:$4 sm:$0xff]  }
 0x711   :  { %1883 = vmatpush1.bf16.msra.mxu0 %v8789_v5  ;;  %v1329_v54 = vpack.c.bf16 %v1281_v1, %v1280_v40  ;;  %v8805_v1 = vld [vmem:[#allocation17 + $0x7c] ss:$12 sps:$4 sm:$0xff]   ;;  %9823 = vst [vmem:[#allocation56_spill] sm:$0xff] %v8808_v7 }
 0x712   :  { %1884 = vmatprep.subr.bf16.mxu0 %v8792_v37  ;;  %9822 = vst [vmem:[#allocation55_spill] sm:$0xff] %v8805_v1  ;;  %v6909_v40 = vld [vmem:[#allocation15 + $0x50] ss:$12 sps:$4 sm:$0xff]  }
 0x713   :  { %6529 = vmatmul.mubr.msk.bf16.vlgmr.msra.gmra.mrb[36].mxu1 %vm457_vm1, %v1329_v54  ;;  %v6908_v54 = vld [vmem:[#allocation15 + $0x110] ss:$12 sps:$4 sm:$0xff]  }
 0x714   :  { %6181 = vmatpush3.bf16.msra.mxu1 %v6894_v62  ;;  %1725 = vmatprep.mubr.bf16.mxu1 %v1377_v63  ;;  %v8811_v63 = vld [vmem:[#allocation17 + $0x94] ss:$12 sps:$4 sm:$0xff]  }
 0x715   :  { %1885 = vmatpush1.bf16.msra.mxu0 %v8795_v55  ;;  %6182 = vmatprep.subr.bf16.mxu1 %v6898_v47  ;;  %9824 = vst [vmem:[#allocation57_spill] sm:$0xff] %v8811_v63 }
 0x716   :  { %1886 = vmatprep.subr.bf16.mxu0 %v8798_v13  ;;  %v6923_v13 = vld [vmem:[#allocation15 + $0xb0] ss:$12 sps:$4 sm:$0xff]  }
 0x718   :  { %6183 = vmatpush3.bf16.msra.mxu1 %v6899_v14 }
 0x719   :  { %1887 = vmatpush1.bf16.msra.mxu0 %v8802_v0  ;;  %6184 = vmatprep.subr.bf16.mxu1 %v6903_v39  ;;  %v6920_v0 = vld [vmem:[#allocation15 + $0x158] ss:$12 sps:$4 sm:$0xff]  }
 0x71a   :  { %1888 = vmatprep.subr.bf16.mxu0 %v8805_v1  ;;  %v6918_v1 = vld [vmem:[#allocation15 + $0x140] ss:$12 sps:$4 sm:$0xff]  }
 0x71c   :  { %6185 = vmatpush3.bf16.msra.mxu1 %v6904_v6 }
 0x71d   :  { %1889 = vmatpush1.bf16.msra.mxu0 %v8808_v7  ;;  %6186 = vmatprep.subr.bf16.mxu1 %v6908_v54  ;;  %v6919_v7 = vld [vmem:[#allocation15 + $0x80] ss:$12 sps:$4 sm:$0xff]  }
 0x71e   :  { %1890 = vmatprep.subr.bf16.mxu0 %v8811_v63  ;;  %v6921_v63 = vld [vmem:[#allocation15 + $0x98] ss:$12 sps:$4 sm:$0xff]  }
 0x720   :  { %6187 = vmatpush3.bf16.msra.mxu1 %v6909_v40 }
 0x721   :  { %1891 = vmatpush1.bf16.msra.mxu0 %v8814_v56  ;;  %6188 = vmatprep.subr.bf16.mxu1 %v6913_v38  ;;  %v6922_v56 = vld [vmem:[#allocation15 + $0x170] ss:$12 sps:$4 sm:$0xff]  }
 0x722   :  { %1892 = vmatprep.subr.bf16.mxu0 %v8817_v8  ;;  %v8826_v8 = vld [vmem:[#allocation17 + $0x8] ss:$12 sps:$4 sm:$0xff]  }
 0x724   :  { %6189 = vmatpush3.bf16.msra.mxu1 %v6914_v9 }
 0x725   :  { %1893 = vmatpush1.bf16.msra.mxu0 %v8820_v59  ;;  %6190 = vmatprep.subr.bf16.mxu1 %v6918_v1  ;;  %v9828_v59 = vmov 0.0  }
 0x726   :  { %6211 = vmatprep.subr.bf16.mxu0 %v8765_v28  ;;  %v8831_v28 = vld [vmem:[#allocation17 + $0x20] ss:$12 sps:$4 sm:$0xff]  }
 0x728   :  { %6191 = vmatpush3.bf16.msra.mxu1 %v6919_v7  ;;  %1911 = vmatmul.mubr.bf16.vlgmr.msra.gmra.mrb[24].mxu0 %v8315_v4 }
 0x729   :  { %6192 = vmatprep.subr.bf16.mxu1 %v6920_v0  ;;  %6212 = vmatpush3.bf16.msra.mxu0 %v6894_v62  ;;  %v8845_v62 = vld [vmem:[#allocation17 + $0x68] ss:$12 sps:$4 sm:$0xff]  }
 0x72a   :  { %6213 = vmatprep.subr.bf16.mxu0 %v6898_v47  ;;  %v8841_v47 = vld [vmem:[#allocation17 + $0x50] ss:$12 sps:$4 sm:$0xff]  }
 0x72c   :  { %6193 = vmatpush3.bf16.msra.mxu1 %v6921_v63 }
 0x72d   :  { %6194 = vmatprep.subr.bf16.mxu1 %v6922_v56  ;;  %6214 = vmatpush3.bf16.msra.mxu0 %v6899_v14  ;;  %v8837_v14 = vld [vmem:[#allocation17 + $0x38] ss:$12 sps:$4 sm:$0xff]  }
 0x72e   :  { %6215 = vmatprep.subr.bf16.mxu0 %v6903_v39 }
 0x730   :  { %6195 = vmatpush3.bf16.msra.mxu1 %v6923_v13 }
 0x731   :  { %6532 = vmatprep.subr.bf16.mxu1 %v9828_v59  ;;  %6216 = vmatpush3.bf16.msra.mxu0 %v6904_v6 }
 0x732   :  { %6217 = vmatprep.subr.bf16.mxu0 %v6908_v54 }
 0x733   :  { %1726 = vmatmul.mubr.bf16.vlgmr.msra.gmra.mrb[40].mxu1 %v8619_v10  ;;  %v8854_v10 = vld [vmem:[#allocation17 + $0x98] ss:$12 sps:$4 sm:$0xff]  }
 0x734   :  { %6533 = vmatpush3.bf16.msra.mxu1 %v8826_v8  ;;  %6548 = vmatprep.mubr.msk.bf16.mxu1 %vm7949_vm2, %v9828_v59 }
 0x735   :  { %6534 = vmatprep.subr.bf16.mxu1 %v9828_v59  ;;  %6218 = vmatpush3.bf16.msra.mxu0 %v6909_v40 }
 0x736   :  { %6219 = vmatprep.subr.bf16.mxu0 %v6913_v38  ;;  %v8858_v38 = vld [vmem:[#allocation17 + $0xb0] ss:$12 sps:$4 sm:$0xff]  }
 0x738   :  { %6535 = vmatpush3.bf16.msra.mxu1 %v8831_v28 }
 0x739   :  { %6536 = vmatprep.subr.bf16.mxu1 %v9828_v59  ;;  %6220 = vmatpush3.bf16.msra.mxu0 %v6914_v9  ;;  %v8849_v9 = vld [vmem:[#allocation17 + $0x80] ss:$12 sps:$4 sm:$0xff]  }
 0x73a   :  { %6221 = vmatprep.subr.bf16.mxu0 %v6918_v1 }
 0x73c   :  { %6537 = vmatpush3.bf16.msra.mxu1 %v8837_v14 }
 0x73d   :  { %6538 = vmatprep.subr.bf16.mxu1 %v9828_v59  ;;  %6222 = vmatpush3.bf16.msra.mxu0 %v6919_v7 }
 0x73e   :  { %6223 = vmatprep.subr.bf16.mxu0 %v6920_v0 }
 0x740   :  { %6539 = vmatpush3.bf16.msra.mxu1 %v8841_v47 }
 0x741   :  { %6540 = vmatprep.subr.bf16.mxu1 %v9828_v59  ;;  %6224 = vmatpush3.bf16.msra.mxu0 %v6921_v63 }
 0x742   :  { %6225 = vmatprep.subr.bf16.mxu0 %v6922_v56 }
 0x744   :  { %6541 = vmatpush3.bf16.msra.mxu1 %v8845_v62 }
 0x745   :  { %6542 = vmatprep.subr.bf16.mxu1 %v9828_v59  ;;  %6226 = vmatpush3.bf16.msra.mxu0 %v6923_v13 }
 0x746   :  { %6552 = vmatprep.subr.bf16.mxu0 %v9828_v59 }
 0x748   :  { %6543 = vmatpush3.bf16.msra.mxu1 %v8849_v9 }
 0x749   :  { %6544 = vmatprep.subr.bf16.mxu1 %v9828_v59 }
 0x74c   :  { %6545 = vmatpush3.bf16.msra.mxu1 %v8854_v10 }
 0x74d   :  { %6546 = vmatprep.subr.bf16.mxu1 %v9828_v59 }
 0x750   :  { %6547 = vmatpush3.bf16.msra.mxu1 %v8858_v38 }
 0x751   :  { %2006 = vmatprep.subr.bf16.mxu1 %v8661_v36 }
 0x753   :  { %6549 = vmatmul.mubr.bf16.vlgmr.msra.gmra.mrb[44].mxu1 %v8315_v4 }
 0x754   :  { %2007 = vmatpush1.bf16.msra.mxu1 %v8664_v43 }
 0x755   :  { %2008 = vmatprep.subr.bf16.mxu1 %v8666_v46 }
 0x758   :  { %2009 = vmatpush1.bf16.msra.mxu1 %v8670_v48 }
 0x759   :  { %2010 = vmatprep.subr.bf16.mxu1 %v8673_v61  ;;  %v1379_v61 = vlaneseq }
 0x75c   :  { %2011 = vmatpush1.bf16.msra.mxu1 %v8676_v31 }
 0x75d   :  { %2012 = vmatprep.subr.bf16.mxu1 %v8679_v42  ;;  %v9831_v42 = vld [vmem:[#allocation53_spill] sm:$0xff] }
 0x760   :  { %2013 = vmatpush1.bf16.msra.mxu1 %v8682_v44 }
 0x761   :  { %2014 = vmatprep.subr.bf16.mxu1 %v8685_v49 }
 0x764   :  { %2015 = vmatpush1.bf16.msra.mxu1 %v8688_v2 }
 0x765   :  { %2016 = vmatprep.subr.bf16.mxu1 %v8691_v50 }
 0x768   :  { %2017 = vmatpush1.bf16.msra.mxu1 %v8694_v3  ;;  %v9832_v3 = vld [vmem:[#allocation54_spill] sm:$0xff] }
 0x769   :  { %2018 = vmatprep.subr.bf16.mxu1 %v8697_v51  ;;  %v9833_v51 = vld [vmem:[#allocation55_spill] sm:$0xff] }
 0x76c   :  { %2019 = vmatpush1.bf16.msra.mxu1 %v8700_v52  ;;  %v9835_v52 = vld [vmem:[#allocation56_spill] sm:$0xff] }
 0x76d   :  { %2020 = vmatprep.subr.bf16.mxu1 %v8703_v53 }
 0x770   :  { %2021 = vmatpush1.bf16.msra.mxu1 %v8706_v24  ;;  %v9837_v24 = vld [vmem:[#allocation57_spill] sm:$0xff] }
 0x771   :  { %2022 = vmatprep.subr.bf16.mxu1 %v8709_v11 }
 0x774   :  { %2023 = vmatpush1.bf16.msra.mxu1 %v8712_v15 }
 0x775   :  { %2024 = vmatprep.subr.bf16.mxu1 %v8715_v16 }
 0x778   :  { %2025 = vmatpush1.bf16.msra.mxu1 %v8718_v17 }
 0x779   :  { %2026 = vmatprep.subr.bf16.mxu1 %v8721_v18  ;;  %v9838_v18 = vld [vmem:[#allocation58_spill] sm:$0xff] }
 0x77c   :  { %2027 = vmatpush1.bf16.msra.mxu1 %v8724_v19 }
 0x77d   :  { %2028 = vmatprep.subr.bf16.mxu1 %v8727_v20 }
 0x780   :  { %2029 = vmatpush1.bf16.msra.mxu1 %v8730_v21 }
 0x781   :  { %2030 = vmatprep.subr.bf16.mxu1 %v8733_v22 }
 0x784   :  { %2031 = vmatpush1.bf16.msra.mxu1 %v8736_v23  ;;  %v9839_v23 = vld [vmem:[#allocation59_spill] sm:$0xff] }
 0x785   :  { %2032 = vmatprep.subr.bf16.mxu1 %v8739_v12 }
 0x788   :  { %2033 = vmatpush1.bf16.msra.mxu1 %v8742_v25 }
 0x789   :  { %2034 = vmatprep.subr.bf16.mxu1 %v8745_v26 }
 0x78c   :  { %2035 = vmatpush1.bf16.msra.mxu1 %v8753_v41 }
 0x78d   :  { %2036 = vmatprep.subr.bf16.mxu1 %v8756_v29  ;;  %v9840_v29 = vld [vmem:[#allocation60_spill] sm:$0xff] }
 0x790   :  { %2037 = vmatpush1.bf16.msra.mxu1 %v8758_v45 }
 0x791   :  { %2090 = vmatprep.subr.bf16.mxu1 %v8762_v33  ;;  %v9842_v33 = vld [vmem:[#allocation42_spill] sm:$0xff] }
 0x7e6   :  { %v1367_v4 = vpop.f32.mrb[36].mxu1 }
 0x7e7   :  { %v6530_v13 = vpop.f32.mrb[37].mxu1  ;;  %v1374_v36 = vsub.f32 %v8504_v57, %v1367_v4  ;;  %v8911_v57 = vshrl.u32 %v1379_v61, 7 }
 0x7e8   :  { %v1370_v56 = vpop.f32.mrb[38].mxu1 }
 0x7e9   :  { %v1375_v43 = vsub.f32 %v8506_v58, %v1370_v56  ;;  %v6531_v46 = vpop.f32.mrb[39].mxu1  ;;  %9829 = vst [vmem:[#allocation61_spill] sm:$0xff] %v8911_v57  ;;  %v8923_v58 = vld [vmem:[%s9684_s14] sm:$0x7]  ;;  %v8944_v53 = vsub.s32 1, %v8911_v57  ;;  %v8970_v54 = vsub.s32 2, %v8911_v57 }
 0x7eb   :  { %v2005_v48 = vpack.c.bf16 %v1375_v43, %v1374_v36  ;;  %9836 = vst [vmem:[#allocation54_spill] sm:$0xff] %v8944_v53  ;;  %v1386_v19 = vrot.slane %v8923_v58, %v8944_v53  ;;  %9845 = vst [vmem:[#allocation56_spill] sm:$0xff] %v8970_v54 }
 0x7ed   :  { %2038 = vmatprep.mubr.bf16.mxu1 %v2005_v48  ;;  %2081 = vmatprep.mubr.bf16.mxu0 %v2005_v48 }
 0x7ee   :  { %2039 = vmatmul.mubr.bf16.vlgmr.msra.gmra.mrb[48].mxu1 %v8651_v27  ;;  %2082 = vmatmul.mubr.bf16.vlgmr.msra.gmra.mrb[28].mxu0 %v8651_v27 }
 0x7ef   :  { %2091 = vmatpush1.bf16.msra.mxu1 %v8776_v60  ;;  %6553 = vmatpush3.bf16.msra.mxu0 %v8826_v8  ;;  %v8918_v8 = vsub.s32 0, %v8911_v57  ;;  %v453_v60 = vld [vmem:[%s9685_s15] sm:$0x7]  ;;  %v7547_v57 = vld [vmem:[#allocation15 + $0x8] ss:$12 sps:$4 sm:$0xff]  }
 0x7f0   :  { %2092 = vmatprep.subr.bf16.mxu1 %v8778_v30  ;;  %6554 = vmatprep.subr.bf16.mxu0 %v9828_v59  ;;  %v1742_v20 = vrot.slane %v453_v60, %v8944_v53  ;;  %v9843_v30 = vld [vmem:[#allocation37_spill] sm:$0xff]  ;;  %v8973_v40 = vrot.slane %v453_v60, %v8970_v54 }
 0x7f1   :  { %2122 = vmatprep.mubr.bf16.mxu1 %v9819_v32  ;;  %6568 = vmatprep.mubr.msk.bf16.mxu0 %vm7949_vm2, %v9828_v59  ;;  %9830 = vst [vmem:[#allocation62_spill] sm:$0xff] %v8918_v8  ;;  %v1382_v44 = vrot.slane %v8923_v58, %v8918_v8  ;;  %v1738_v49 = vrot.slane %v453_v60, %v8918_v8  ;;  %v9405_v8 = vld [vmem:[#allocation17 + $0x48] ss:$12 sps:$4 sm:$0xff]  }
 0x7f2   :  { %v8959_v45 = vadd.f32 %v1742_v20, %v1386_v19  ;;  %9846 = vst [vmem:[#allocation57_spill] sm:$0xff] %v8973_v40  ;;  %v7479_v20 = vld [vmem:[%s9803_s13 + $0x40] sm:$0xff]  }
 0x7f3   :  { %2093 = vmatpush1.bf16.msra.mxu1 %v8782_v34  ;;  %6555 = vmatpush3.bf16.msra.mxu0 %v8831_v28  ;;  %v9844_v34 = vld [vmem:[#allocation36_spill] sm:$0xff] }
 0x7f4   :  { %2094 = vmatprep.subr.bf16.mxu1 %v8786_v35  ;;  %6556 = vmatprep.subr.bf16.mxu0 %v9828_v59  ;;  %9841 = vst [vmem:[#allocation55_spill] sm:$0xff] %v8959_v45 }
 0x7f7   :  { %2095 = vmatpush1.bf16.msra.mxu1 %v8789_v5  ;;  %6557 = vmatpush3.bf16.msra.mxu0 %v8837_v14 }
 0x7f8   :  { %2096 = vmatprep.subr.bf16.mxu1 %v8792_v37  ;;  %6558 = vmatprep.subr.bf16.mxu0 %v9828_v59 }
 0x7fb   :  { %v1912_v27 = vpop.f32.mrb[24].mxu0  ;;  %2097 = vmatpush1.bf16.msra.mxu1 %v8795_v55  ;;  %6559 = vmatpush3.bf16.msra.mxu0 %v8841_v47  ;;  %v8939_v55 = vadd.f32 %v1738_v49, %v1382_v44  ;;  %v8977_v47 = vrot.slane %v8923_v58, %v8970_v54 }
 0x7fc   :  { %v1914_v31 = vpop.f32.mrb[25].mxu0  ;;  %2098 = vmatprep.subr.bf16.mxu1 %v9831_v42  ;;  %6560 = vmatprep.subr.bf16.mxu0 %v9828_v59 }
 0x7fd   :  { %v1916_v2 = vpop.f32.mrb[26].mxu0  ;;  %9834 = vst [vmem:[#allocation53_spill] sm:$0xff] %v8939_v55  ;;  %v6717_v11 = vadd.f32 %v8939_v55, %v1912_v27  ;;  %v6719_v35 = vadd.f32 %v8959_v45, %v1914_v31  ;;  %9847 = vst [vmem:[#allocation58_spill] sm:$0xff] %v8977_v47 }
 0x7fe   :  { %v1918_v50 = vpop.f32.mrb[27].mxu0  ;;  %v6721_v16 = vadd.f32 %v8939_v55, %v1916_v2  ;;  %v9848_v2 = vld [vmem:[#allocation51_spill] sm:$0xff] }
 0x7ff   :  { %2099 = vmatpush1.bf16.msra.mxu1 %v9832_v3  ;;  %6561 = vmatpush3.bf16.msra.mxu0 %v8845_v62  ;;  %v5772_v12 = vmul.f32 -1.442695, %v6717_v11  ;;  %v6723_v5 = vadd.f32 %v8959_v45, %v1918_v50  ;;  %v5774_v37 = vmul.f32 -1.442695, %v6719_v35  ;;  %v9065_v35 = vld [vmem:[%s9803_s13 + $0x58] sm:$0xff]  }
 0x800   :  { %2100 = vmatprep.subr.bf16.mxu1 %v9833_v51  ;;  %6562 = vmatprep.subr.bf16.mxu0 %v9828_v59  ;;  %v5773_v41 = vmul.f32 -1.442695, %v6721_v16 }
 0x801   :  { %7348 = vpow2.f32 %v5772_v12  ;;  %v5775_v0 = vmul.f32 -1.442695, %v6723_v5  ;;  %v9019_v12 = vld [vmem:[%s9803_s13] sm:$0xff]   ;;  %v9071_v5 = vld [vmem:[%s9803_s13 + $0x98] sm:$0xff]  }
 0x802   :  { %7350 = vpow2.f32 %v5773_v41  ;;  %v9854_v41 = vld [vmem:[#allocation40_spill] sm:$0xff] }
 0x803   :  { %2101 = vmatpush1.bf16.msra.mxu1 %v9835_v52  ;;  %6563 = vmatpush3.bf16.msra.mxu0 %v8849_v9  ;;  %7352 = vpow2.f32 %v5774_v37  ;;  %v9077_v37 = vld [vmem:[%s9803_s13 + $0x18] sm:$0xff]  }
 0x804   :  { %2102 = vmatprep.subr.bf16.mxu1 %v9837_v24  ;;  %6564 = vmatprep.subr.bf16.mxu0 %v9828_v59  ;;  %7354 = vpow2.f32 %v5775_v0  ;;  %v9849_v24 = vld [vmem:[#allocation52_spill] sm:$0xff]  ;;  %v9084_v0 = vld [vmem:[%s9803_s13 + $0x60] sm:$0xff]  }
 0x806   :  { %v6196_v15 = vpop.f32.mrb[40].mxu1 }
 0x807   :  { %v6197_v17 = vpop.f32.mrb[41].mxu1  ;;  %2103 = vmatpush1.bf16.msra.mxu1 %v9838_v18  ;;  %6565 = vmatpush3.bf16.msra.mxu0 %v8854_v10 }
 0x808   :  { %v6198_v21 = vadd.f32 %v6197_v17, %v6196_v15  ;;  %v6199_v22 = vpop.f32.mrb[42].mxu1  ;;  %2104 = vmatprep.subr.bf16.mxu1 %v9839_v23  ;;  %6566 = vmatprep.subr.bf16.mxu0 %v9828_v59  ;;  %v9853_v23 = vld [vmem:[#allocation38_spill] sm:$0xff] }
 0x809   :  { %v6200_v25 = vpop.f32.mrb[43].mxu1 }
 0x80a   :  { %v6201_v26 = vadd.f32 %v6200_v25, %v6199_v22  ;;  %v1728_v56 = vadd.f32 %v6198_v21, %v8977_v47  ;;  %v9009_v21 = vld [vmem:[%s9803_s13 + $0x80] sm:$0xff]   ;;  %v9852_v22 = vld [vmem:[#allocation39_spill] sm:$0xff] }
 0x80b   :  { %2105 = vmatpush1.bf16.msra.mxu1 %v9840_v29  ;;  %6567 = vmatpush3.bf16.msra.mxu0 %v8858_v38  ;;  %v7349_v39 = vpop.eup %7348  ;;  %v9026_v25 = vld [vmem:[%s9803_s13 + $0x48] sm:$0xff]  }
 0x80c   :  { %v7351_v1 = vpop.eup %7350  ;;  %v1970_v6 = vadd.f32 1.0, %v7349_v39  ;;  %v1731_v61 = vadd.f32 %v6201_v26, %v8977_v47  ;;  %v9032_v26 = vld [vmem:[%s9803_s13 + $0x88] sm:$0xff]   ;;  %v9090_v39 = vld [vmem:[%s9803_s13 + $0xa0] sm:$0xff]  }
 0x80d   :  { %v1971_v7 = vadd.f32 1.0, %v7351_v1  ;;  %v7353_v63 = vpop.eup %7352  ;;  %v9039_v29 = vld [vmem:[%s9803_s13 + $0x8] sm:$0xff]   ;;  %v9096_v1 = vld [vmem:[%s9803_s13 + $0x20] sm:$0xff]  }
 0x80e   :  { %2123 = vmatmul.mubr.bf16.vlgmr.msra.gmra.mrb[48].mxu1 %v9842_v33  ;;  %6569 = vmatmul.mubr.bf16.vlgmr.msra.gmra.mrb[32].mxu0 %v9842_v33  ;;  %7356 = vrcp.f32 %v1970_v6  ;;  %v7355_v28 = vpop.eup %7354  ;;  %v1984_v14 = vadd.f32 1.0, %v7353_v63  ;;  %v9046_v33 = vld [vmem:[%s9803_s13 + $0x50] sm:$0xff]   ;;  %v9103_v6 = vld [vmem:[%s9803_s13 + $0x68] sm:$0xff]  }
 0x80f   :  { %6580 = vmatprep.mubr.msk.bf16.mxu1 %vm457_vm1, %v9843_v30  ;;  %6574 = vmatprep.mubr.msk.bf16.mxu0 %vm457_vm1, %v9844_v34  ;;  %7358 = vrcp.f32 %v1971_v7  ;;  %v1985_v9 = vadd.f32 1.0, %v7355_v28  ;;  %v9052_v30 = vld [vmem:[%s9803_s13 + $0x90] sm:$0xff]   ;;  %v9109_v7 = vld [vmem:[%s9803_s13 + $0xa8] sm:$0xff]  }
 0x810   :  { %7360 = vrcp.f32 %v1984_v14  ;;  %v9058_v34 = vld [vmem:[%s9803_s13 + $0x10] sm:$0xff]   ;;  %v9115_v63 = vld [vmem:[%s9803_s13 + $0x28] sm:$0xff]  }
 0x811   :  { %7362 = vrcp.f32 %v1985_v9  ;;  %v9122_v28 = vld [vmem:[%s9803_s13 + $0x70] sm:$0xff]   ;;  %v9141_v9 = vld [vmem:[%s9803_s13 + $0x78] sm:$0xff]  }
 0x812   :  { %v9128_v14 = vld [vmem:[%s9803_s13 + $0xb0] sm:$0xff]  }
 0x818   :  { %v7357_v4 = vpop.eup %7356 }
 0x819   :  { %v7359_v48 = vpop.eup %7358 }
 0x81a   :  { %v7361_v31 = vpop.eup %7360 }
 0x81b   :  { %v7363_v42 = vpop.eup %7362  ;;  %v1996_v44 = vsub.f32 1.0, %v7361_v31  ;;  %v2000_v50 = vmul.f32 %v9848_v2, %v7361_v31 }
 0x81c   :  { %v1997_v3 = vsub.f32 1.0, %v7363_v42  ;;  %v2001_v11 = vmul.f32 %v9849_v24, %v7363_v42 }
 0x826   :  { %v1955_v62 = vpop.f32.mrb[44].mxu1 }
 0x827   :  { %v1956_v10 = vadd.f32 %v1955_v62, %v8973_v40  ;;  %v6550_v38 = vpop.f32.mrb[45].mxu1  ;;  %v9134_v62 = vld [vmem:[%s9803_s13 + $0x30] sm:$0xff]  }
 0x828   :  { %v1958_v13 = vpop.f32.mrb[46].mxu1  ;;  %v9153_v38 = vld [vmem:[%s9803_s13 + $0x38] sm:$0xff]  }
 0x829   :  { %v1990_v36 = vmul.f32 %v7357_v4, %v1956_v10  ;;  %v1959_v43 = vadd.f32 %v1958_v13, %v8973_v40  ;;  %v6551_v46 = vpop.f32.mrb[47].mxu1  ;;  %v9147_v10 = vld [vmem:[%s9803_s13 + $0xb8] sm:$0xff]  }
 0x82a   :  { %v9855_v4 = vld [vmem:[#allocation41_spill] sm:$0xff] }
 0x82b   :  { %v1992_v58 = vadd.f32 %v1990_v36, %v1728_v56  ;;  %v1991_v60 = vmul.f32 %v7359_v48, %v1959_v43 }
 0x82d   :  { %7364 = vtanh.f32 %v1992_v58  ;;  %v1993_v27 = vadd.f32 %v1991_v60, %v1731_v61 }
 0x82f   :  { %7366 = vtanh.f32 %v1993_v27 }
 0x837   :  { %v7365_v49 = vpop.eup %7364 }
 0x838   :  { %v1998_v51 = vmul.f32 %v7365_v49, %v1996_v44 }
 0x839   :  { %v7367_v52 = vpop.eup %7366 }
 0x83a   :  { %v8985_v15 = vadd.f32 %v2000_v50, %v1998_v51  ;;  %v1999_v16 = vmul.f32 %v7367_v52, %v1997_v3 }
 0x83c   :  { %9850 = vst [vmem:[#allocation59_spill] sm:$0xff] %v8985_v15  ;;  %v8987_v17 = vadd.f32 %v2001_v11, %v1999_v16 }
 0x83e   :  { %9851 = vst [vmem:[#allocation60_spill] sm:$0xff] %v8987_v17  ;;  %v8991_v18 = vpack.c.bf16 %v8987_v17, %v8985_v15 }
 0x840   :  { %6780 = vmatprep.subr.msk.bf16.mxu0 %vm464_vm0, %v8991_v18  ;;  %6781 = vmatprep.subr.msk.bf16.mxu1 %vm464_vm0, %v8991_v18  ;;  %v8999_v19 = vsel %vm464_vm0, %v8991_v18, 0 }
 0x841   :  { %6573 = vmatpush3.bf16.msra.mxu0 %v8999_v19  ;;  %6579 = vmatpush3.bf16.msra.mxu1 %v8999_v19 }
 0x842   :  { %6248 = vmatprep.subr.bf16.mxu0 %v7479_v20  ;;  %6584 = vmatprep.subr.bf16.mxu1 %v9009_v21 }
 0x844   :  { %6581 = vmatmul.mubr.msk.bf16.vlgmr.msra.gmra.mrb[52].mxu1 %vm457_vm1, %v9852_v22  ;;  %6575 = vmatmul.mubr.msk.bf16.vlgmr.msra.gmra.mrb[36].mxu0 %vm457_vm1, %v9853_v23 }
 0x845   :  { %6249 = vmatpush3.bf16.msra.mxu0 %v9019_v12  ;;  %6585 = vmatpush3.bf16.msra.mxu1 %v9009_v21 }
 0x846   :  { %6250 = vmatprep.subr.bf16.mxu0 %v9026_v25  ;;  %6586 = vmatprep.subr.bf16.mxu1 %v9032_v26 }
 0x847   :  { %6600 = vmatprep.mubr.bf16.mxu1 %v9854_v41 }
 0x849   :  { %6251 = vmatpush3.bf16.msra.mxu0 %v9039_v29  ;;  %6587 = vmatpush3.bf16.msra.mxu1 %v9032_v26 }
 0x84a   :  { %6252 = vmatprep.subr.bf16.mxu0 %v9046_v33  ;;  %6588 = vmatprep.subr.bf16.mxu1 %v9052_v30 }
 0x84d   :  { %6253 = vmatpush3.bf16.msra.mxu0 %v9058_v34  ;;  %6589 = vmatpush3.bf16.msra.mxu1 %v9052_v30 }
 0x84e   :  { %6254 = vmatprep.subr.bf16.mxu0 %v9065_v35  ;;  %6590 = vmatprep.subr.bf16.mxu1 %v9071_v5 }
 0x851   :  { %6255 = vmatpush3.bf16.msra.mxu0 %v9077_v37  ;;  %6591 = vmatpush3.bf16.msra.mxu1 %v9071_v5 }
 0x852   :  { %6256 = vmatprep.subr.bf16.mxu0 %v9084_v0  ;;  %6592 = vmatprep.subr.bf16.mxu1 %v9090_v39 }
 0x855   :  { %6257 = vmatpush3.bf16.msra.mxu0 %v9096_v1  ;;  %6593 = vmatpush3.bf16.msra.mxu1 %v9090_v39 }
 0x856   :  { %6258 = vmatprep.subr.bf16.mxu0 %v9103_v6  ;;  %6594 = vmatprep.subr.bf16.mxu1 %v9109_v7 }
 0x859   :  { %6259 = vmatpush3.bf16.msra.mxu0 %v9115_v63  ;;  %6595 = vmatpush3.bf16.msra.mxu1 %v9109_v7 }
 0x85a   :  { %6260 = vmatprep.subr.bf16.mxu0 %v9122_v28  ;;  %6596 = vmatprep.subr.bf16.mxu1 %v9128_v14 }
 0x85d   :  { %6261 = vmatpush3.bf16.msra.mxu0 %v9134_v62  ;;  %6597 = vmatpush3.bf16.msra.mxu1 %v9128_v14 }
 0x85e   :  { %6262 = vmatprep.subr.bf16.mxu0 %v9141_v9  ;;  %6598 = vmatprep.subr.bf16.mxu1 %v9147_v10 }
 0x861   :  { %6263 = vmatpush3.bf16.msra.mxu0 %v9153_v38  ;;  %6599 = vmatpush3.bf16.msra.mxu1 %v9147_v10 }
 0x862   :  { %6604 = vmatprep.subr.bf16.mxu1 %v9828_v59  ;;  %6295 = vmatprep.subr.bf16.mxu0 %v7479_v20 }
 0x864   :  { %6601 = vmatmul.mubr.bf16.vlgmr.msra.gmra.mrb[56].mxu1 %v9855_v4 }
 0x865   :  { %6608 = vmatprep.mubr.msk.bf16.mxu1 %vm7949_vm2, %v9828_v59 }
 0x8c1   :  { %v6227_v13 = vpop.f32.mrb[28].mxu0 }
 0x8c2   :  { %v6228_v56 = vpop.f32.mrb[29].mxu0 }
 0x8c3   :  { %v6229_v36 = vadd.f32 %v6228_v56, %v6227_v13  ;;  %v6230_v43 = vpop.f32.mrb[30].mxu0 }
 0x8c4   :  { %v6231_v46 = vpop.f32.mrb[31].mxu0 }
 0x8c5   :  { %v6232_v48 = vadd.f32 %v6231_v46, %v6230_v43 }
 0x8e1   :  { %v2124_v61 = vpop.f32.mrb[48].mxu1  ;;  %v2167_v58 = vpop.f32.mrb[32].mxu0 }
 0x8e2   :  { %v6725_v60 = vadd.f32 %v8939_v55, %v2124_v61  ;;  %v2126_v27 = vpop.f32.mrb[49].mxu1  ;;  %v6570_v31 = vpop.f32.mrb[33].mxu0  ;;  %v2168_v43 = vadd.f32 %v2167_v58, %v8973_v40 }
 0x8e3   :  { %v2128_v42 = vpop.f32.mrb[50].mxu1  ;;  %v2170_v44 = vpop.f32.mrb[34].mxu0  ;;  %v6727_v51 = vadd.f32 %v8959_v45, %v2126_v27  ;;  %v2084_v27 = vadd.f32 %v6229_v36, %v8977_v47 }
 0x8e4   :  { %v5776_v49 = vmul.f32 -1.442695, %v6725_v60  ;;  %v6729_v2 = vadd.f32 %v8939_v55, %v2128_v42  ;;  %v2130_v50 = vpop.f32.mrb[51].mxu1  ;;  %v6571_v3 = vpop.f32.mrb[35].mxu0  ;;  %v2171_v61 = vadd.f32 %v2170_v44, %v8973_v40  ;;  %v7559_v40 = vld [vmem:[#allocation15 + $0x50] ss:$12 sps:$4 sm:$0xff]  }
 0x8e5   :  { %v6731_v24 = vadd.f32 %v8959_v45, %v2130_v50  ;;  %v5778_v11 = vmul.f32 -1.442695, %v6727_v51  ;;  %v9427_v45 = vld [vmem:[#allocation17 + $0xac] ss:$12 sps:$4 sm:$0xff]   ;;  %v9430_v55 = vld [vmem:[#allocation17 + $0xa8] ss:$12 sps:$4 sm:$0xff]  }
 0x8e6   :  { %7368 = vpow2.f32 %v5776_v49  ;;  %v5777_v52 = vmul.f32 -1.442695, %v6729_v2  ;;  %v2087_v49 = vadd.f32 %v6232_v48, %v8977_v47  ;;  %v9424_v47 = vld [vmem:[#allocation17 + $0x90] ss:$12 sps:$4 sm:$0xff]   ;;  %9870 = vst [vmem:[#allocation38_spill] sm:$0xff] %v9427_v45  ;;  %9871 = vst [vmem:[#allocation40_spill] sm:$0xff] %v9430_v55 }
 0x8e7   :  { %v5779_v16 = vmul.f32 -1.442695, %v6731_v24  ;;  %9869 = vst [vmem:[#allocation39_spill] sm:$0xff] %v9424_v47 }
 0x8e8   :  { %7370 = vpow2.f32 %v5777_v52 }
 0x8e9   :  { %7372 = vpow2.f32 %v5778_v11  ;;  %v7503_v11 = vld [vmem:[#allocation6] sm:$0xff] }
 0x8ea   :  { %7374 = vpow2.f32 %v5779_v16 }
 0x8f0   :  { %v7369_v20 = vpop.eup %7368 }
 0x8f1   :  { %v2182_v22 = vadd.f32 1.0, %v7369_v20 }
 0x8f2   :  { %v7371_v23 = vpop.eup %7370 }
 0x8f3   :  { %7376 = vrcp.f32 %v2182_v22  ;;  %v2183_v41 = vadd.f32 1.0, %v7371_v23  ;;  %v7373_v4 = vpop.eup %7372  ;;  %v7504_v22 = vld [vmem:[#allocation6 + $0x8] sm:$0x3] }
 0x8f4   :  { %v7375_v13 = vpop.eup %7374  ;;  %v2196_v56 = vadd.f32 1.0, %v7373_v4 }
 0x8f5   :  { %7378 = vrcp.f32 %v2183_v41  ;;  %v2197_v46 = vadd.f32 1.0, %v7375_v13 }
 0x8f6   :  { %7380 = vrcp.f32 %v2196_v56 }
 0x8f7   :  { %7382 = vrcp.f32 %v2197_v46 }
 0x8fd   :  { %v7377_v60 = vpop.eup %7376 }
 0x8fe   :  { %v2202_v31 = vmul.f32 %v7377_v60, %v2168_v43 }
 0x8ff   :  { %v7379_v42 = vpop.eup %7378 }
 0x900   :  { %v2204_v2 = vadd.f32 %v2202_v31, %v2084_v27  ;;  %v2203_v50 = vmul.f32 %v7379_v42, %v2171_v61  ;;  %v7381_v51 = vpop.eup %7380 }
 0x901   :  { %v7383_v52 = vpop.eup %7382  ;;  %v2208_v58 = vsub.f32 1.0, %v7381_v51  ;;  %v2212_v44 = vmul.f32 %v7503_v11, %v7381_v51 }
 0x902   :  { %7384 = vtanh.f32 %v2204_v2  ;;  %v2205_v3 = vadd.f32 %v2203_v50, %v2087_v49  ;;  %v2209_v16 = vsub.f32 1.0, %v7383_v52  ;;  %v2213_v23 = vmul.f32 %v7504_v22, %v7383_v52 }
 0x904   :  { %7386 = vtanh.f32 %v2205_v3 }
 0x90c   :  { %v7385_v24 = vpop.eup %7384 }
 0x90d   :  { %v2210_v20 = vmul.f32 %v7385_v24, %v2208_v58 }
 0x90e   :  { %v7387_v36 = vpop.eup %7386 }
 0x90f   :  { %v9169_v41 = vadd.f32 %v2212_v44, %v2210_v20  ;;  %v2211_v48 = vmul.f32 %v7387_v36, %v2209_v16 }
 0x911   :  { %v9171_v4 = vadd.f32 %v2213_v23, %v2211_v48 }
 0x913   :  { %v9197_v48 = vpack.c.bf16 %v9171_v4, %v9169_v41 }
 0x915   :  { %9856 = vst [vmem:[#allocation42_spill] sm:$0xff] %v9197_v48 }
 0x917   :  { %v6582_v13 = vpop.f32.mrb[52].mxu1  ;;  %v6576_v56 = vpop.f32.mrb[36].mxu0 }
 0x918   :  { %v2302_v43 = vpop.f32.mrb[53].mxu1  ;;  %v2254_v46 = vpop.f32.mrb[37].mxu0  ;;  %v2319_v2 = vpack.c.bf16 %v6582_v13, %v6582_v13  ;;  %v2318_v50 = vpack.c.bf16 %v6576_v56, %v6576_v56  ;;  %v9857_v56 = vld [vmem:[#allocation45_spill] sm:$0xff] }
 0x919   :  { %v6583_v61 = vpop.f32.mrb[54].mxu1  ;;  %v6577_v60 = vpop.f32.mrb[38].mxu0 }
 0x91a   :  { %v2305_v27 = vpop.f32.mrb[55].mxu1  ;;  %v2257_v31 = vpop.f32.mrb[39].mxu0  ;;  %v9859_v61 = vld [vmem:[#allocation44_spill] sm:$0xff]  ;;  %v9860_v60 = vld [vmem:[#allocation46_spill] sm:$0xff] }
 0x91b   :  { %v2317_v42 = vpack.c.bf16 %v2305_v27, %v2302_v43  ;;  %v2316_v49 = vpack.c.bf16 %v2257_v31, %v2254_v46  ;;  %v2467_v43 = vsel %vm889_vm3, %v9197_v48, 0  ;;  %v9858_v46 = vld [vmem:[#allocation43_spill] sm:$0xff]  ;;  %v9862_v31 = vld [vmem:[#allocation48_spill] sm:$0xff] }
 0x91c   :  { %v9861_v27 = vld [vmem:[#allocation47_spill] sm:$0xff] }
 0x91d   :  { %2352 = vmatprep.mubr.bf16.mxu0 %v2317_v42 }
 0x91e   :  { %2353 = vmatmul.mubr.bf16.vlgmr.msra.gmra.mrb[40].mxu0 %v2316_v49 }
 0x91f   :  { %2360 = vmatprep.mubr.bf16.mxu0 %v2319_v2  ;;  %6296 = vmatpush3.bf16.msra.mxu0 %v9019_v12 }
 0x920   :  { %6297 = vmatprep.subr.bf16.mxu0 %v9026_v25 }
 0x923   :  { %6298 = vmatpush3.bf16.msra.mxu0 %v9039_v29 }
 0x924   :  { %6299 = vmatprep.subr.bf16.mxu0 %v9046_v33 }
 0x926   :  { %2361 = vmatmul.mubr.bf16.gmra.mrb[44].mxu0 %v2318_v50 }
 0x927   :  { %6300 = vmatpush3.bf16.msra.mxu0 %v9058_v34 }
 0x928   :  { %6301 = vmatprep.subr.bf16.mxu0 %v9065_v35 }
 0x92b   :  { %6302 = vmatpush3.bf16.msra.mxu0 %v9077_v37 }
 0x92c   :  { %6303 = vmatprep.subr.bf16.mxu0 %v9084_v0 }
 0x92f   :  { %6304 = vmatpush3.bf16.msra.mxu0 %v9096_v1 }
 0x930   :  { %6305 = vmatprep.subr.bf16.mxu0 %v9103_v6 }
 0x933   :  { %6306 = vmatpush3.bf16.msra.mxu0 %v9115_v63  ;;  %v9189_v63 = vld [vmem:[#allocation14] ss:$0 sm:$0xff] }
 0x934   :  { %6307 = vmatprep.subr.bf16.mxu0 %v9122_v28 }
 0x937   :  { %6308 = vmatpush3.bf16.msra.mxu0 %v9134_v62  ;;  %v6602_v12 = vpop.f32.mrb[56].mxu1 }
 0x938   :  { %6309 = vmatprep.subr.bf16.mxu0 %v9141_v9  ;;  %v2402_v25 = vpop.f32.mrb[57].mxu1 }
 0x939   :  { %v6603_v29 = vpop.f32.mrb[58].mxu1 }
 0x93a   :  { %v2405_v33 = vpop.f32.mrb[59].mxu1 }
 0x93b   :  { %6310 = vmatpush3.bf16.msra.mxu0 %v9153_v38 }
 0x93c   :  { %6652 = vmatprep.subr.bf16.mxu0 %v9828_v59 }
 0x9f1   :  { %v6264_v34 = vpop.f32.mrb[40].mxu0 }
 0x9f2   :  { %v6265_v35 = vpop.f32.mrb[41].mxu0 }
 0x9f3   :  { %v6266_v37 = vadd.f32 %v6265_v35, %v6264_v34  ;;  %v6267_v0 = vpop.f32.mrb[42].mxu0 }
 0x9f4   :  { %v6268_v1 = vpop.f32.mrb[43].mxu0 }
 0x9f5   :  { %v6269_v6 = vadd.f32 %v6268_v1, %v6267_v0  ;;  %v2355_v28 = vadd.f32 %v9189_v63, %v6266_v37  ;;  %v9246_v37 = vld [vmem:[#allocation15 + $0x4] ss:$12 sps:$4 sm:$0xff]  }
 0x9f7   :  { %v2403_v62 = vadd.f32 %v2402_v25, %v2355_v28  ;;  %v2358_v9 = vadd.f32 %v9189_v63, %v6269_v6 }
 0x9f9   :  { %v2406_v38 = vadd.f32 %v2405_v33, %v2358_v9  ;;  %v6270_v3 = vpop.f32.mrb[44].mxu0  ;;  %v2416_v52 = vmax.f32 %v2403_v62, 0.0 }
 0x9fa   :  { %v6271_v51 = vpop.f32.mrb[45].mxu0 }
 0x9fb   :  { %v2417_v58 = vmax.f32 %v2406_v38, 0.0  ;;  %v6272_v24 = vadd.f32 %v6271_v51, %v6270_v3  ;;  %v6273_v11 = vpop.f32.mrb[46].mxu0 }
 0x9fc   :  { %v6274_v44 = vpop.f32.mrb[47].mxu0 }
 0x9fd   :  { %v2419_v16 = vpack.c.bf16 %v2417_v58, %v2416_v52  ;;  %v2363_v20 = vadd.f32 %v9189_v63, %v6272_v24 }
 0x9ff   :  { %v2411_v36 = vadd.f32 %v6602_v12, %v2363_v20  ;;  %6605 = vmatpush3.bf16.msra.mxu1 %v2419_v16 }
 0xa00   :  { %6606 = vmatprep.subr.bf16.mxu1 %v9828_v59 }
 0xa01   :  { %v2418_v22 = vmax.f32 %v2411_v36, 0.0 }
 0xa03   :  { %v2420_v23 = vpack.c.bf16 %v2418_v22, %v2418_v22 }
 0xa05   :  { %v2422_v13 = vsel %vm834_vm5, %v2420_v23, 0 }
 0xa06   :  { %6607 = vmatpush3.bf16.msra.mxu1 %v2422_v13 }
 0xa07   :  { %6782 = vmatprep.subr.msk.bf16.mxu1 %vm889_vm3, %v9197_v48 }
 0xa09   :  { %6609 = vmatmul.mubr.msk.bf16.vlgmr.msra.gmra.mrb[60].mxu1 %vm830_vm6, %v9857_v56 }
 0xa0a   :  { %6613 = vmatpush3.bf16.msra.mxu1 %v2467_v43  ;;  %6614 = vmatprep.mubr.msk.bf16.mxu1 %vm882_vm4, %v9858_v46 }
 0xa0b   :  { %6783 = vmatprep.subr.msk.bf16.mxu1 %vm889_vm3, %v9197_v48 }
 0xa11   :  { %6615 = vmatmul.mubr.msk.bf16.vlgmr.msra.gmra.mrb[64].mxu1 %vm882_vm4, %v9859_v61 }
 0xa12   :  { %6619 = vmatpush3.bf16.msra.mxu1 %v2467_v43  ;;  %6620 = vmatprep.mubr.msk.bf16.mxu1 %vm882_vm4, %v9860_v60 }
 0xa13   :  { %6624 = vmatprep.subr.bf16.mxu1 %v9009_v21 }
 0xa19   :  { %6621 = vmatmul.mubr.msk.bf16.vlgmr.msra.gmra.mrb[68].mxu1 %vm882_vm4, %v9861_v27 }
 0xa1a   :  { %6625 = vmatpush3.bf16.msra.mxu1 %v9009_v21  ;;  %6640 = vmatprep.mubr.bf16.mxu1 %v9862_v31  ;;  %v9863_v21 = vld [vmem:[#allocation49_spill] sm:$0xff] }
 0xa1b   :  { %6626 = vmatprep.subr.bf16.mxu1 %v9032_v26 }
 0xa1e   :  { %6627 = vmatpush3.bf16.msra.mxu1 %v9032_v26 }
 0xa1f   :  { %6628 = vmatprep.subr.bf16.mxu1 %v9052_v30 }
 0xa22   :  { %6629 = vmatpush3.bf16.msra.mxu1 %v9052_v30 }
 0xa23   :  { %6630 = vmatprep.subr.bf16.mxu1 %v9071_v5 }
 0xa26   :  { %6631 = vmatpush3.bf16.msra.mxu1 %v9071_v5 }
 0xa27   :  { %6632 = vmatprep.subr.bf16.mxu1 %v9090_v39 }
 0xa2a   :  { %6633 = vmatpush3.bf16.msra.mxu1 %v9090_v39 }
 0xa2b   :  { %6634 = vmatprep.subr.bf16.mxu1 %v9109_v7 }
 0xa2e   :  { %6635 = vmatpush3.bf16.msra.mxu1 %v9109_v7 }
 0xa2f   :  { %6636 = vmatprep.subr.bf16.mxu1 %v9128_v14 }
 0xa32   :  { %6637 = vmatpush3.bf16.msra.mxu1 %v9128_v14 }
 0xa33   :  { %6638 = vmatprep.subr.bf16.mxu1 %v9147_v10 }
 0xa36   :  { %6639 = vmatpush3.bf16.msra.mxu1 %v9147_v10 }
 0xa37   :  { %6644 = vmatprep.subr.bf16.mxu1 %v9828_v59 }
 0xa39   :  { %6641 = vmatmul.mubr.bf16.vlgmr.msra.gmra.mrb[72].mxu1 %v9863_v21 }
 0xa3a   :  { %6648 = vmatprep.mubr.msk.bf16.mxu1 %vm7949_vm2, %v9828_v59 }
 0xadc   :  { %v2458_v26 = vpop.f32.mrb[60].mxu1 }
 0xadd   :  { %v6610_v30 = vpop.f32.mrb[61].mxu1 }
 0xade   :  { %v2461_v5 = vpop.f32.mrb[62].mxu1 }
 0xadf   :  { %v9237_v39 = vpack.c.bf16 %v2461_v5, %v2458_v26  ;;  %v6611_v7 = vpop.f32.mrb[63].mxu1 }
 0xae4   :  { %v6616_v42 = vpop.f32.mrb[64].mxu1 }
 0xae5   :  { %v2503_v49 = vpop.f32.mrb[65].mxu1  ;;  %v2567_v35 = vpack.c.bf16 %v6616_v42, %v6616_v42 }
 0xae6   :  { %v6617_v14 = vpop.f32.mrb[66].mxu1 }
 0xae7   :  { %v2506_v2 = vpop.f32.mrb[67].mxu1 }
 0xae8   :  { %v2565_v50 = vpack.c.bf16 %v2506_v2, %v2503_v49  ;;  %v9267_v49 = vld [vmem:[#allocation15 + $0xc8] ss:$12 sps:$4 sm:$0xff]  }
 0xaec   :  { %v6622_v12 = vpop.f32.mrb[68].mxu1 }
 0xaed   :  { %v2551_v10 = vpop.f32.mrb[69].mxu1  ;;  %v2568_v34 = vpack.c.bf16 %v6622_v12, %v6622_v12 }
 0xaee   :  { %v6623_v25 = vpop.f32.mrb[70].mxu1 }
 0xaef   :  { %v2554_v29 = vpop.f32.mrb[71].mxu1 }
 0xaf0   :  { %v2566_v33 = vpack.c.bf16 %v2554_v29, %v2551_v10 }
 0xaf2   :  { %2601 = vmatprep.mubr.bf16.mxu0 %v2566_v33 }
 0xaf3   :  { %2602 = vmatmul.mubr.bf16.vlgmr.msra.gmra.mrb[48].mxu0 %v2565_v50 }
 0xaf4   :  { %6653 = vmatpush3.bf16.xpose.msra.mxu0 %v9197_v48  ;;  %2609 = vmatprep.mubr.bf16.mxu0 %v2568_v34 }
 0xaf5   :  { %6664 = vmatprep.subr.bf16.mxu0 %v9828_v59 }
 0xafb   :  { %2610 = vmatmul.mubr.bf16.gmra.mrb[52].mxu0 %v2567_v35 }
 0xafc   :  { %6654 = vmatprep.mubr.msk.bf16.mxu0 %vm7949_vm2, %v9828_v59 }
 0xb03   :  { %6655 = vmatmul.mubr.bf16.vlgmr.msra.gmra.mrb[56].mxu0 %v8991_v18 }
 0xb04   :  { %6665 = vmatpush3.bf16.msra.mxu0 %v2467_v43  ;;  %6666 = vmatprep.mubr.msk.bf16.mxu0 %vm7949_vm2, %v9828_v59 }
 0xb05   :  { %2936 = vmatprep.subr.bf16.mxu0 %v9246_v37 }
 0xb0c   :  { %v6642_v0 = vpop.f32.mrb[72].mxu1 }
 0xb0d   :  { %v2651_v1 = vpop.f32.mrb[73].mxu1 }
 0xb0e   :  { %v6643_v6 = vpop.f32.mrb[74].mxu1 }
 0xb0f   :  { %v2654_v28 = vpop.f32.mrb[75].mxu1 }
 0xbc6   :  { %v6311_v62 = vpop.f32.mrb[48].mxu0 }
 0xbc7   :  { %v6312_v9 = vpop.f32.mrb[49].mxu0 }
 0xbc8   :  { %v6313_v38 = vadd.f32 %v6312_v9, %v6311_v62  ;;  %v6314_v3 = vpop.f32.mrb[50].mxu0 }
 0xbc9   :  { %v6315_v51 = vpop.f32.mrb[51].mxu0 }
 0xbca   :  { %v6316_v52 = vadd.f32 %v6315_v51, %v6314_v3  ;;  %v2604_v58 = vadd.f32 %v9189_v63, %v6313_v38 }
 0xbcc   :  { %v2652_v24 = vadd.f32 %v2651_v1, %v2604_v58  ;;  %v2607_v11 = vadd.f32 %v9189_v63, %v6316_v52 }
 0xbce   :  { %v2655_v44 = vadd.f32 %v2654_v28, %v2607_v11  ;;  %v6317_v16 = vpop.f32.mrb[52].mxu0  ;;  %v2665_v36 = vmax.f32 %v2652_v24, 0.0 }
 0xbcf   :  { %v6318_v20 = vpop.f32.mrb[53].mxu0 }
 0xbd0   :  { %v2666_v22 = vmax.f32 %v2655_v44, 0.0  ;;  %v6319_v23 = vadd.f32 %v6318_v20, %v6317_v16  ;;  %v6320_v13 = vpop.f32.mrb[54].mxu0 }
 0xbd1   :  { %v6321_v56 = vpop.f32.mrb[55].mxu0  ;;  %v9289_v13 = vld [vmem:[#allocation15 + $0x18] ss:$12 sps:$4 sm:$0xff]  }
 0xbd2   :  { %v2668_v43 = vpack.c.bf16 %v2666_v22, %v2665_v36  ;;  %v2612_v46 = vadd.f32 %v9189_v63, %v6319_v23  ;;  %v9864_v63 = vld [vmem:[#allocation50_spill] sm:$0xff]  ;;  %v9283_v22 = vld [vmem:[#allocation15] ss:$12 sps:$4 sm:$0xff]   ;;  %v9286_v23 = vld [vmem:[#allocation15 + $0x1c] ss:$12 sps:$4 sm:$0xff]  }
 0xbd3   :  { %v9292_v56 = vld [vmem:[#allocation15 + $0x34] ss:$12 sps:$4 sm:$0xff]  }
 0xbd4   :  { %v2660_v61 = vadd.f32 %v6642_v0, %v2612_v46  ;;  %6645 = vmatpush3.bf16.msra.mxu1 %v2668_v43  ;;  %v9295_v43 = vld [vmem:[#allocation15 + $0x30] ss:$12 sps:$4 sm:$0xff]   ;;  %v9298_v46 = vld [vmem:[#allocation15 + $0x4c] ss:$12 sps:$4 sm:$0xff]  }
 0xbd5   :  { %6646 = vmatprep.subr.bf16.mxu1 %v9828_v59 }
 0xbd6   :  { %v2667_v60 = vmax.f32 %v2660_v61, 0.0  ;;  %v2748_v27 = vpop.f32.mrb[56].mxu0  ;;  %v9301_v61 = vld [vmem:[#allocation15 + $0x48] ss:$12 sps:$4 sm:$0xff]  }
 0xbd7   :  { %v6656_v31 = vpop.f32.mrb[57].mxu0  ;;  %v2796_v21 = vsel %vm882_vm4, %v2748_v27, -inf }
 0xbd8   :  { %2797 = vmax.xlane.f32.xlu0 %v2796_v21  ;;  %v2751_v26 = vpop.f32.mrb[58].mxu0  ;;  %v2669_v30 = vpack.c.bf16 %v2667_v60, %v2667_v60  ;;  %v9304_v60 = vld [vmem:[#allocation15 + $0x64] ss:$12 sps:$4 sm:$0xff]   ;;  %v9310_v31 = vld [vmem:[#allocation15 + $0x7c] ss:$12 sps:$4 sm:$0xff]  }
 0xbd9   :  { %v6657_v5 = vpop.f32.mrb[59].mxu0  ;;  %v2799_v7 = vsel %vm1239_vm7, %v2751_v26, -inf  ;;  %v9313_v21 = vld [vmem:[#allocation15 + $0x78] ss:$12 sps:$4 sm:$0xff]  }
 0xbda   :  { %2800 = vmax.xlane.f32.xlu1 %v2799_v7  ;;  %v2671_v42 = vsel %vm1109_vm8, %v2669_v30, 0  ;;  %v9319_v30 = vld [vmem:[#allocation15 + $0x90] ss:$12 sps:$4 sm:$0xff]   ;;  %v9322_v5 = vld [vmem:[#allocation15 + $0xac] ss:$12 sps:$4 sm:$0xff]  }
 0xbdb   :  { %6647 = vmatpush3.bf16.msra.mxu1 %v2671_v42  ;;  %v9325_v7 = vld [vmem:[#allocation15 + $0xa8] ss:$12 sps:$4 sm:$0xff]   ;;  %v9328_v42 = vld [vmem:[#allocation15 + $0xc4] ss:$12 sps:$4 sm:$0xff]  }
 0xbdc   :  { %6658 = vmatprep.subr.bf16.mxu1 %v9828_v59 }
 0xbde   :  { %6649 = vmatmul.mubr.msk.bf16.vlgmr.msra.gmra.mrb[76].mxu1 %vm1105_vm9, %v9864_v63  ;;  %v9331_v63 = vld [vmem:[#allocation15 + $0xc0] ss:$12 sps:$4 sm:$0xff]  }
 0xbdf   :  { %6660 = vmatprep.mubr.msk.bf16.mxu1 %vm7949_vm2, %v9828_v59 }
 0xbe4   :  { %6659 = vmatpush3.bf16.xpose.msra.mxu1 %v8991_v18 }
 0xbe5   :  { %6670 = vmatprep.subr.bf16.mxu1 %v9828_v59 }
 0xbeb   :  { %6661 = vmatmul.mubr.bf16.vlgmr.msra.gmra.mrb[80].mxu1 %v9197_v48  ;;  %v7561_v48 = vld [vmem:[#allocation15 + $0x128] ss:$12 sps:$4 sm:$0xff]  }
 0xbec   :  { %6671 = vmatpush3.bf16.msra.mxu1 %v8999_v19  ;;  %6672 = vmatprep.mubr.msk.bf16.mxu1 %vm7949_vm2, %v9828_v59 }
 0xbed   :  { %6344 = vmatprep.subr.bf16.mxu1 %v9267_v49 }
 0xc65   :  { %v2798_v14 = vpop.xlane.xlu0 %2797 }
 0xc66   :  { %v2802_v2 = vsub.f32 %v2748_v27, %v2798_v14  ;;  %v9307_v27 = vld [vmem:[#allocation15 + $0x60] ss:$12 sps:$4 sm:$0xff]   ;;  %v9334_v14 = vld [vmem:[#allocation15 + $0xdc] ss:$12 sps:$4 sm:$0xff]  }
 0xc67   :  { %v2801_v50 = vpop.xlane.xlu1 %2800 }
 0xc68   :  { %v2804_v12 = vmul.f32 1.442695, %v2802_v2  ;;  %v2803_v10 = vsub.f32 %v2751_v26, %v2801_v50  ;;  %v9316_v26 = vld [vmem:[#allocation15 + $0x94] ss:$12 sps:$4 sm:$0xff]   ;;  %v9337_v2 = vld [vmem:[#allocation15 + $0xd8] ss:$12 sps:$4 sm:$0xff]  }
 0xc69   :  { %v9340_v50 = vld [vmem:[#allocation15 + $0xf4] ss:$12 sps:$4 sm:$0xff]  }
 0xc6a   :  { %7388 = vpow2.f32 %v2804_v12  ;;  %v2806_v25 = vmul.f32 1.442695, %v2803_v10  ;;  %v9343_v12 = vld [vmem:[#allocation15 + $0xf0] ss:$12 sps:$4 sm:$0xff]   ;;  %v9346_v10 = vld [vmem:[#allocation15 + $0x10c] ss:$12 sps:$4 sm:$0xff]  }
 0xc6c   :  { %7390 = vpow2.f32 %v2806_v25  ;;  %v9349_v25 = vld [vmem:[#allocation15 + $0x108] ss:$12 sps:$4 sm:$0xff]  }
 0xc74   :  { %v7389_v29 = vpop.eup %7388 }
 0xc75   :  { %v2808_v33 = vsel %vm882_vm4, %v7389_v29, 0.0 }
 0xc76   :  { %v7391_v34 = vpop.eup %7390  ;;  %2809 = vadd.xlane.f32.xlu0 %v2808_v33  ;;  %v9355_v33 = vld [vmem:[#allocation15 + $0x120] ss:$12 sps:$4 sm:$0xff]  }
 0xc77   :  { %v2811_v19 = vsel %vm1239_vm7, %v7391_v34, 0.0 }
 0xc78   :  { %2812 = vadd.xlane.f32.xlu1 %v2811_v19  ;;  %v9361_v19 = vld [vmem:[#allocation15 + $0x138] ss:$12 sps:$4 sm:$0xff]  }
 0xcb1   :  { %v2707_v35 = vpop.f32.mrb[76].mxu1 }
 0xcb2   :  { %v6650_v0 = vpop.f32.mrb[77].mxu1 }
 0xcb3   :  { %v2710_v1 = vpop.f32.mrb[78].mxu1 }
 0xcb4   :  { %v9272_v6 = vpack.c.bf16 %v2710_v1, %v2707_v35  ;;  %v6651_v28 = vpop.f32.mrb[79].mxu1  ;;  %v9364_v35 = vld [vmem:[#allocation15 + $0x154] ss:$12 sps:$4 sm:$0xff]  }
 0xcb5   :  { %v9368_v28 = vld [vmem:[#allocation15 + $0x150] ss:$12 sps:$4 sm:$0xff]  }
 0xcbe   :  { %v9274_v62 = vpop.f32.mrb[80].mxu1 }
 0xcbf   :  { %v6662_v9 = vpop.f32.mrb[81].mxu1  ;;  %v2818_v38 = vsel %vm457_vm1, %v9274_v62, -inf }
 0xcc0   :  { %2819 = vmax.xlane.f32.xlu0 %v2818_v38  ;;  %v9278_v3 = vpop.f32.mrb[82].mxu1  ;;  %v9371_v38 = vld [vmem:[#allocation15 + $0x16c] ss:$12 sps:$4 sm:$0xff]  }
 0xcc1   :  { %v6663_v51 = vpop.f32.mrb[83].mxu1  ;;  %v2821_v52 = vsel %vm1262_vm10, %v9278_v3, -inf }
 0xcc2   :  { %2822 = vmax.xlane.f32.xlu1 %v2821_v52 }
 0xd03   :  { %v2810_v58 = vpop.xlane.xlu0 %2809 }
 0xd04   :  { %7392 = vrcp.f32 %v2810_v58 }
 0xd05   :  { %v2813_v24 = vpop.xlane.xlu1 %2812 }
 0xd06   :  { %7394 = vrcp.f32 %v2813_v24  ;;  %v9375_v24 = vld [vmem:[#allocation15 + $0x168] ss:$12 sps:$4 sm:$0xff]  }
 0xd0e   :  { %v7393_v11 = vpop.eup %7392 }
 0xd0f   :  { %v2816_v16 = vmul.f32 %v7393_v11, %v7389_v29  ;;  %v9352_v29 = vld [vmem:[#allocation15 + $0x124] ss:$12 sps:$4 sm:$0xff]  }
 0xd10   :  { %v7395_v44 = vpop.eup %7394  ;;  %v9378_v11 = vld [vmem:[#allocation17 + $0x4] ss:$12 sps:$4 sm:$0xff]  }
 0xd11   :  { %v2817_v20 = vmul.f32 %v7395_v44, %v7391_v34  ;;  %v9358_v34 = vld [vmem:[#allocation15 + $0x13c] ss:$12 sps:$4 sm:$0xff]  }
 0xd13   :  { %v2840_v36 = vpack.c.bf16 %v2817_v20, %v2816_v16 }
 0xd15   :  { %6667 = vmatmul.mubr.msk.bf16.vlgmr.msra.gmra.mrb[60].mxu0 %vm882_vm4, %v2840_v36 }
 0xd16   :  { %2937 = vmatpush1.bf16.msra.mxu0 %v9283_v22 }
 0xd17   :  { %2938 = vmatprep.subr.bf16.mxu0 %v9286_v23 }
 0xd1a   :  { %2939 = vmatpush1.bf16.msra.mxu0 %v9289_v13 }
 0xd1b   :  { %2940 = vmatprep.subr.bf16.mxu0 %v9292_v56 }
 0xd1e   :  { %2941 = vmatpush1.bf16.msra.mxu0 %v9295_v43 }
 0xd1f   :  { %2942 = vmatprep.subr.bf16.mxu0 %v9298_v46 }
 0xd22   :  { %2943 = vmatpush1.bf16.msra.mxu0 %v9301_v61 }
 0xd23   :  { %2944 = vmatprep.subr.bf16.mxu0 %v9304_v60 }
 0xd26   :  { %2945 = vmatpush1.bf16.msra.mxu0 %v9307_v27 }
 0xd27   :  { %2946 = vmatprep.subr.bf16.mxu0 %v9310_v31 }
 0xd2a   :  { %2947 = vmatpush1.bf16.msra.mxu0 %v9313_v21 }
 0xd2b   :  { %2948 = vmatprep.subr.bf16.mxu0 %v9316_v26 }
 0xd2e   :  { %2949 = vmatpush1.bf16.msra.mxu0 %v9319_v30 }
 0xd2f   :  { %2950 = vmatprep.subr.bf16.mxu0 %v9322_v5 }
 0xd32   :  { %2951 = vmatpush1.bf16.msra.mxu0 %v9325_v7 }
 0xd33   :  { %2952 = vmatprep.subr.bf16.mxu0 %v9328_v42 }
 0xd36   :  { %2953 = vmatpush1.bf16.msra.mxu0 %v9331_v63 }
 0xd37   :  { %2954 = vmatprep.subr.bf16.mxu0 %v9334_v14 }
 0xd3a   :  { %2955 = vmatpush1.bf16.msra.mxu0 %v9337_v2 }
 0xd3b   :  { %2956 = vmatprep.subr.bf16.mxu0 %v9340_v50 }
 0xd3e   :  { %2957 = vmatpush1.bf16.msra.mxu0 %v9343_v12 }
 0xd3f   :  { %2958 = vmatprep.subr.bf16.mxu0 %v9346_v10 }
 0xd42   :  { %2959 = vmatpush1.bf16.msra.mxu0 %v9349_v25 }
 0xd43   :  { %2960 = vmatprep.subr.bf16.mxu0 %v9352_v29 }
 0xd46   :  { %2961 = vmatpush1.bf16.msra.mxu0 %v9355_v33 }
 0xd47   :  { %2962 = vmatprep.subr.bf16.mxu0 %v9358_v34 }
 0xd4a   :  { %2963 = vmatpush1.bf16.msra.mxu0 %v9361_v19 }
 0xd4b   :  { %2964 = vmatprep.subr.bf16.mxu0 %v9364_v35 }
 0xd4d   :  { %v2820_v0 = vpop.xlane.xlu0 %2819 }
 0xd4e   :  { %v2824_v1 = vsub.f32 %v9274_v62, %v2820_v0  ;;  %2965 = vmatpush1.bf16.msra.mxu0 %v9368_v28 }
 0xd4f   :  { %v2823_v9 = vpop.xlane.xlu1 %2822  ;;  %2966 = vmatprep.subr.bf16.mxu0 %v9371_v38 }
 0xd50   :  { %v2826_v51 = vmul.f32 1.442695, %v2824_v1  ;;  %v2825_v52 = vsub.f32 %v9278_v3, %v2823_v9 }
 0xd52   :  { %7396 = vpow2.f32 %v2826_v51  ;;  %v2828_v58 = vmul.f32 1.442695, %v2825_v52  ;;  %2967 = vmatpush1.bf16.msra.mxu0 %v9375_v24 }
 0xd53   :  { %3020 = vmatprep.subr.bf16.mxu0 %v9378_v11 }
 0xd54   :  { %7398 = vpow2.f32 %v2828_v58 }
 0xd5c   :  { %v7397_v62 = vpop.eup %7396 }
 0xd5d   :  { %v2830_v44 = vsel %vm457_vm1, %v7397_v62, 0.0 }
 0xd5e   :  { %v7399_v16 = vpop.eup %7398  ;;  %2831 = vadd.xlane.f32.xlu0 %v2830_v44  ;;  %v9386_v44 = vld [vmem:[#allocation17] ss:$12 sps:$4 sm:$0xff]  }
 0xd5f   :  { %v2833_v20 = vsel %vm1262_vm10, %v7399_v16, 0.0 }
 0xd60   :  { %2834 = vadd.xlane.f32.xlu1 %v2833_v20  ;;  %v9390_v20 = vld [vmem:[#allocation17 + $0x1c] ss:$12 sps:$4 sm:$0xff]  }
 0xde8   :  { %v2878_v3 = vpop.f32.mrb[60].mxu0 }
 0xde9   :  { %v6668_v36 = vpop.f32.mrb[61].mxu0  ;;  %v2885_v1 = vsub.f32 %v8985_v15, %v2878_v3  ;;  %v9393_v3 = vld [vmem:[#allocation17 + $0x18] ss:$12 sps:$4 sm:$0xff]   ;;  %v7557_v15 = vld [vmem:[#allocation15 + $0x110] ss:$12 sps:$4 sm:$0xff]  }
 0xdea   :  { %v2881_v0 = vpop.f32.mrb[62].mxu0 }
 0xdeb   :  { %v2886_v9 = vsub.f32 %v8987_v17, %v2881_v0  ;;  %v6669_v51 = vpop.f32.mrb[63].mxu0  ;;  %v2832_v52 = vpop.xlane.xlu0 %2831  ;;  %v9396_v0 = vld [vmem:[#allocation17 + $0x34] ss:$12 sps:$4 sm:$0xff]  }
 0xdec   :  { %7400 = vrcp.f32 %v2832_v52  ;;  %v9399_v52 = vld [vmem:[#allocation17 + $0x30] ss:$12 sps:$4 sm:$0xff]   ;;  %v9421_v17 = vld [vmem:[#allocation17 + $0x94] ss:$12 sps:$4 sm:$0xff]  }
 0xded   :  { %v2935_v54 = vpack.c.bf16 %v2886_v9, %v2885_v1  ;;  %v2835_v58 = vpop.xlane.xlu1 %2834  ;;  %9868 = vst [vmem:[#allocation52_spill] sm:$0xff] %v9421_v17 }
 0xdee   :  { %7402 = vrcp.f32 %v2835_v58  ;;  %v9402_v58 = vld [vmem:[#allocation17 + $0x4c] ss:$12 sps:$4 sm:$0xff]  }
 0xdef   :  { %2968 = vmatprep.mubr.bf16.mxu0 %v2935_v54 }
 0xdf0   :  { %2969 = vmatmul.mubr.bf16.vlgmr.msra.gmra.mrb[64].mxu0 %v9237_v39 }
 0xdf1   :  { %3021 = vmatpush1.bf16.msra.mxu0 %v9386_v44  ;;  %3052 = vmatprep.mubr.bf16.mxu0 %v9819_v32 }
 0xdf2   :  { %3022 = vmatprep.subr.bf16.mxu0 %v9390_v20 }
 0xdf5   :  { %3023 = vmatpush1.bf16.msra.mxu0 %v9393_v3 }
 0xdf6   :  { %v7401_v36 = vpop.eup %7400  ;;  %3024 = vmatprep.subr.bf16.mxu0 %v9396_v0 }
 0xdf7   :  { %v2838_v9 = vmul.f32 %v7401_v36, %v7397_v62  ;;  %v9409_v62 = vld [vmem:[#allocation17 + $0x64] ss:$12 sps:$4 sm:$0xff]   ;;  %v9412_v36 = vld [vmem:[#allocation17 + $0x60] ss:$12 sps:$4 sm:$0xff]  }
 0xdf8   :  { %v7403_v1 = vpop.eup %7402  ;;  %9865 = vst [vmem:[#allocation37_spill] sm:$0xff] %v9412_v36 }
 0xdf9   :  { %v2839_v51 = vmul.f32 %v7403_v1, %v7399_v16  ;;  %3025 = vmatpush1.bf16.msra.mxu0 %v9399_v52  ;;  %v7549_v16 = vld [vmem:[#allocation15 + $0xe0] ss:$12 sps:$4 sm:$0xff]  }
 0xdfa   :  { %3026 = vmatprep.subr.bf16.mxu0 %v9402_v58  ;;  %v7551_v1 = vld [vmem:[#allocation15 + $0x20] ss:$12 sps:$4 sm:$0xff]  }
 0xdfb   :  { %v2887_v53 = vpack.c.bf16 %v2839_v51, %v2838_v9  ;;  %v9415_v9 = vld [vmem:[#allocation17 + $0x7c] ss:$12 sps:$4 sm:$0xff]   ;;  %v9418_v51 = vld [vmem:[#allocation17 + $0x78] ss:$12 sps:$4 sm:$0xff]  }
 0xdfc   :  { %9866 = vst [vmem:[#allocation36_spill] sm:$0xff] %v9415_v9  ;;  %9867 = vst [vmem:[#allocation51_spill] sm:$0xff] %v9418_v51 }
 0xdfd   :  { %3027 = vmatpush1.bf16.msra.mxu0 %v9405_v8  ;;  %6673 = vmatmul.mubr.msk.bf16.vlgmr.msra.gmra.mrb[84].mxu1 %vm457_vm1, %v2887_v53  ;;  %v7553_v53 = vld [vmem:[#allocation15 + $0xf8] ss:$12 sps:$4 sm:$0xff]  }
 0xdfe   :  { %6345 = vmatpush3.bf16.msra.mxu1 %v7547_v57  ;;  %3011 = vmatprep.mubr.bf16.mxu1 %v2935_v54  ;;  %v7555_v54 = vld [vmem:[#allocation15 + $0x38] ss:$12 sps:$4 sm:$0xff]  }
 0xdff   :  { %3028 = vmatprep.subr.bf16.mxu0 %v9409_v62  ;;  %6346 = vmatprep.subr.bf16.mxu1 %v7549_v16 }
 0xe01   :  { %3029 = vmatpush1.bf16.msra.mxu0 %v9412_v36  ;;  %v7568_v36 = vld [vmem:[#allocation15 + $0x170] ss:$12 sps:$4 sm:$0xff]  }
 0xe02   :  { %6347 = vmatpush3.bf16.msra.mxu1 %v7551_v1  ;;  %3030 = vmatprep.subr.bf16.mxu0 %v9415_v9  ;;  %v7566_v9 = vld [vmem:[#allocation15 + $0x158] ss:$12 sps:$4 sm:$0xff]  }
 0xe03   :  { %6348 = vmatprep.subr.bf16.mxu1 %v7553_v53 }
 0xe05   :  { %3031 = vmatpush1.bf16.msra.mxu0 %v9418_v51  ;;  %v7563_v51 = vld [vmem:[#allocation15 + $0x68] ss:$12 sps:$4 sm:$0xff]  }
 0xe06   :  { %6349 = vmatpush3.bf16.msra.mxu1 %v7555_v54  ;;  %3032 = vmatprep.subr.bf16.mxu0 %v9421_v17  ;;  %v7564_v17 = vld [vmem:[#allocation15 + $0x140] ss:$12 sps:$4 sm:$0xff]  }
 0xe07   :  { %6350 = vmatprep.subr.bf16.mxu1 %v7557_v15 }
 0xe09   :  { %3033 = vmatpush1.bf16.msra.mxu0 %v9424_v47  ;;  %v7565_v47 = vld [vmem:[#allocation15 + $0x80] ss:$12 sps:$4 sm:$0xff]  }
 0xe0a   :  { %6351 = vmatpush3.bf16.msra.mxu1 %v7559_v40  ;;  %3034 = vmatprep.subr.bf16.mxu0 %v9427_v45  ;;  %v7567_v45 = vld [vmem:[#allocation15 + $0x98] ss:$12 sps:$4 sm:$0xff]  }
 0xe0b   :  { %6352 = vmatprep.subr.bf16.mxu1 %v7561_v48 }
 0xe0d   :  { %3035 = vmatpush1.bf16.msra.mxu0 %v9430_v55  ;;  %v7569_v55 = vld [vmem:[#allocation15 + $0xb0] ss:$12 sps:$4 sm:$0xff]  }
 0xe0e   :  { %6353 = vmatpush3.bf16.msra.mxu1 %v7563_v51  ;;  %6375 = vmatprep.subr.bf16.mxu0 %v9267_v49  ;;  %v9443_v49 = vld [vmem:[#allocation17 + $0x20] ss:$12 sps:$4 sm:$0xff]  }
 0xe0f   :  { %6354 = vmatprep.subr.bf16.mxu1 %v7564_v17 }
 0xe10   :  { %3053 = vmatmul.mubr.bf16.vlgmr.msra.gmra.mrb[64].mxu0 %v8991_v18 }
 0xe11   :  { %6376 = vmatpush3.bf16.msra.mxu0 %v7547_v57  ;;  %v9437_v57 = vld [vmem:[#allocation17 + $0x8] ss:$12 sps:$4 sm:$0xff]  }
 0xe12   :  { %6355 = vmatpush3.bf16.msra.mxu1 %v7565_v47  ;;  %6377 = vmatprep.subr.bf16.mxu0 %v7549_v16 }
 0xe13   :  { %6356 = vmatprep.subr.bf16.mxu1 %v7566_v9 }
 0xe15   :  { %6378 = vmatpush3.bf16.msra.mxu0 %v7551_v1  ;;  %v9883_v1 = vld [vmem:[#allocation58_spill] sm:$0xff] }
 0xe16   :  { %6357 = vmatpush3.bf16.msra.mxu1 %v7567_v45  ;;  %6379 = vmatprep.subr.bf16.mxu0 %v7553_v53 }
 0xe17   :  { %6358 = vmatprep.subr.bf16.mxu1 %v7568_v36 }
 0xe19   :  { %6380 = vmatpush3.bf16.msra.mxu0 %v7555_v54 }
 0xe1a   :  { %6359 = vmatpush3.bf16.msra.mxu1 %v7569_v55  ;;  %6381 = vmatprep.subr.bf16.mxu0 %v7557_v15  ;;  %v9451_v15 = vld [vmem:[#allocation17 + $0x50] ss:$12 sps:$4 sm:$0xff]  }
 0xe1b   :  { %6676 = vmatprep.subr.bf16.mxu1 %v9828_v59 }
 0xe1d   :  { %3012 = vmatmul.mubr.bf16.vlgmr.msra.gmra.mrb[88].mxu1 %v9237_v39  ;;  %6382 = vmatpush3.bf16.msra.mxu0 %v7559_v40  ;;  %v9447_v40 = vld [vmem:[#allocation17 + $0x38] ss:$12 sps:$4 sm:$0xff]  }
 0xe1e   :  { %6677 = vmatpush3.bf16.msra.mxu1 %v9437_v57  ;;  %6692 = vmatprep.mubr.msk.bf16.mxu1 %vm7949_vm2, %v9828_v59 }
 0xe1f   :  { %6678 = vmatprep.subr.bf16.mxu1 %v9828_v59  ;;  %6383 = vmatprep.subr.bf16.mxu0 %v7561_v48 }
 0xe21   :  { %6384 = vmatpush3.bf16.msra.mxu0 %v7563_v51 }
 0xe22   :  { %6679 = vmatpush3.bf16.msra.mxu1 %v9443_v49  ;;  %6385 = vmatprep.subr.bf16.mxu0 %v7564_v17  ;;  %v9455_v17 = vld [vmem:[#allocation17 + $0x68] ss:$12 sps:$4 sm:$0xff]  }
 0xe23   :  { %6680 = vmatprep.subr.bf16.mxu1 %v9828_v59 }
 0xe25   :  { %6386 = vmatpush3.bf16.msra.mxu0 %v7565_v47  ;;  %v9460_v47 = vld [vmem:[#allocation17 + $0x80] ss:$12 sps:$4 sm:$0xff]  }
 0xe26   :  { %6681 = vmatpush3.bf16.msra.mxu1 %v9447_v40  ;;  %6387 = vmatprep.subr.bf16.mxu0 %v7566_v9 }
 0xe27   :  { %6682 = vmatprep.subr.bf16.mxu1 %v9828_v59 }
 0xe29   :  { %6388 = vmatpush3.bf16.msra.mxu0 %v7567_v45  ;;  %v9464_v45 = vld [vmem:[#allocation17 + $0x98] ss:$12 sps:$4 sm:$0xff]  }
 0xe2a   :  { %6683 = vmatpush3.bf16.msra.mxu1 %v9451_v15  ;;  %6389 = vmatprep.subr.bf16.mxu0 %v7568_v36 }
 0xe2b   :  { %6684 = vmatprep.subr.bf16.mxu1 %v9828_v59 }
 0xe2d   :  { %6390 = vmatpush3.bf16.msra.mxu0 %v7569_v55  ;;  %v9468_v55 = vld [vmem:[#allocation17 + $0xb0] ss:$12 sps:$4 sm:$0xff]  }
 0xe2e   :  { %6685 = vmatpush3.bf16.msra.mxu1 %v9455_v17  ;;  %6696 = vmatprep.subr.bf16.mxu0 %v9828_v59 }
 0xe2f   :  { %6686 = vmatprep.subr.bf16.mxu1 %v9828_v59 }
 0xe32   :  { %6687 = vmatpush3.bf16.msra.mxu1 %v9460_v47 }
 0xe33   :  { %6688 = vmatprep.subr.bf16.mxu1 %v9828_v59 }
 0xe36   :  { %6689 = vmatpush3.bf16.msra.mxu1 %v9464_v45 }
 0xe37   :  { %6690 = vmatprep.subr.bf16.mxu1 %v9828_v59 }
 0xe3a   :  { %6691 = vmatpush3.bf16.msra.mxu1 %v9468_v55 }
 0xe3b   :  { %3148 = vmatprep.subr.bf16.mxu1 %v9246_v37 }
 0xe3d   :  { %6693 = vmatmul.mubr.bf16.vlgmr.msra.gmra.mrb[92].mxu1 %v8991_v18 }
 0xe3e   :  { %3149 = vmatpush1.bf16.msra.mxu1 %v9283_v22 }
 0xe3f   :  { %3150 = vmatprep.subr.bf16.mxu1 %v9286_v23 }
 0xe42   :  { %3151 = vmatpush1.bf16.msra.mxu1 %v9289_v13 }
 0xe43   :  { %3152 = vmatprep.subr.bf16.mxu1 %v9292_v56 }
 0xe46   :  { %3153 = vmatpush1.bf16.msra.mxu1 %v9295_v43 }
 0xe47   :  { %3154 = vmatprep.subr.bf16.mxu1 %v9298_v46  ;;  %v9872_v46 = vld [vmem:[#allocation37_spill] sm:$0xff] }
 0xe4a   :  { %3155 = vmatpush1.bf16.msra.mxu1 %v9301_v61  ;;  %v9873_v61 = vld [vmem:[#allocation36_spill] sm:$0xff] }
 0xe4b   :  { %3156 = vmatprep.subr.bf16.mxu1 %v9304_v60  ;;  %v9874_v60 = vld [vmem:[#allocation51_spill] sm:$0xff] }
 0xe4e   :  { %3157 = vmatpush1.bf16.msra.mxu1 %v9307_v27  ;;  %v9876_v27 = vld [vmem:[#allocation53_spill] sm:$0xff] }
 0xe4f   :  { %3158 = vmatprep.subr.bf16.mxu1 %v9310_v31 }
 0xe52   :  { %3159 = vmatpush1.bf16.msra.mxu1 %v9313_v21 }
 0xe53   :  { %3160 = vmatprep.subr.bf16.mxu1 %v9316_v26 }
 0xe56   :  { %3161 = vmatpush1.bf16.msra.mxu1 %v9319_v30 }
 0xe57   :  { %3162 = vmatprep.subr.bf16.mxu1 %v9322_v5  ;;  %v9877_v5 = vld [vmem:[#allocation39_spill] sm:$0xff] }
 0xe5a   :  { %3163 = vmatpush1.bf16.msra.mxu1 %v9325_v7 }
 0xe5b   :  { %3164 = vmatprep.subr.bf16.mxu1 %v9328_v42 }
 0xe5e   :  { %3165 = vmatpush1.bf16.msra.mxu1 %v9331_v63  ;;  %v9878_v63 = vld [vmem:[#allocation38_spill] sm:$0xff] }
 0xe5f   :  { %3166 = vmatprep.subr.bf16.mxu1 %v9334_v14 }
 0xe62   :  { %3167 = vmatpush1.bf16.msra.mxu1 %v9337_v2 }
 0xe63   :  { %3168 = vmatprep.subr.bf16.mxu1 %v9340_v50 }
 0xe66   :  { %3169 = vmatpush1.bf16.msra.mxu1 %v9343_v12 }
 0xe67   :  { %3170 = vmatprep.subr.bf16.mxu1 %v9346_v10  ;;  %v9879_v10 = vld [vmem:[#allocation40_spill] sm:$0xff] }
 0xe6a   :  { %3171 = vmatpush1.bf16.msra.mxu1 %v9349_v25  ;;  %v9880_v25 = vld [vmem:[#allocation42_spill] sm:$0xff] }
 0xe6b   :  { %3172 = vmatprep.subr.bf16.mxu1 %v9352_v29  ;;  %v9881_v29 = vld [vmem:[#allocation55_spill] sm:$0xff] }
 0xe6e   :  { %3173 = vmatpush1.bf16.msra.mxu1 %v9355_v33 }
 0xe6f   :  { %3174 = vmatprep.subr.bf16.mxu1 %v9358_v34 }
 0xe72   :  { %3175 = vmatpush1.bf16.msra.mxu1 %v9361_v19 }
 0xe73   :  { %3176 = vmatprep.subr.bf16.mxu1 %v9364_v35 }
 0xe76   :  { %3177 = vmatpush1.bf16.msra.mxu1 %v9368_v28 }
 0xe77   :  { %3178 = vmatprep.subr.bf16.mxu1 %v9371_v38 }
 0xe7a   :  { %3179 = vmatpush1.bf16.msra.mxu1 %v9375_v24 }
 0xe7b   :  { %3232 = vmatprep.subr.bf16.mxu1 %v9378_v11 }
 0xed0   :  { %v2925_v18 = vpop.f32.mrb[84].mxu1 }
 0xed1   :  { %v6674_v48 = vpop.f32.mrb[85].mxu1  ;;  %v2932_v37 = vsub.f32 %v9169_v41, %v2925_v18 }
 0xed2   :  { %v2928_v39 = vpop.f32.mrb[86].mxu1 }
 0xed3   :  { %v2933_v22 = vsub.f32 %v9171_v4, %v2928_v39  ;;  %v6675_v23 = vpop.f32.mrb[87].mxu1  ;;  %v9884_v39 = vld [vmem:[#allocation59_spill] sm:$0xff] }
 0xed5   :  { %v3147_v13 = vpack.c.bf16 %v2933_v22, %v2932_v37 }
 0xed7   :  { %3180 = vmatprep.mubr.bf16.mxu1 %v3147_v13  ;;  %3223 = vmatprep.mubr.bf16.mxu0 %v3147_v13 }
 0xed8   :  { %3181 = vmatmul.mubr.bf16.vlgmr.msra.gmra.mrb[96].mxu1 %v9272_v6  ;;  %3224 = vmatmul.mubr.bf16.vlgmr.msra.gmra.mrb[68].mxu0 %v9272_v6 }
 0xed9   :  { %3233 = vmatpush1.bf16.msra.mxu1 %v9386_v44  ;;  %6697 = vmatpush3.bf16.msra.mxu0 %v9437_v57 }
 0xeda   :  { %3234 = vmatprep.subr.bf16.mxu1 %v9390_v20  ;;  %6698 = vmatprep.subr.bf16.mxu0 %v9828_v59 }
 0xedb   :  { %3264 = vmatprep.mubr.bf16.mxu1 %v9819_v32  ;;  %6712 = vmatprep.mubr.msk.bf16.mxu0 %vm7949_vm2, %v9828_v59 }
 0xedd   :  { %3235 = vmatpush1.bf16.msra.mxu1 %v9393_v3  ;;  %6699 = vmatpush3.bf16.msra.mxu0 %v9443_v49 }
 0xede   :  { %3236 = vmatprep.subr.bf16.mxu1 %v9396_v0  ;;  %6700 = vmatprep.subr.bf16.mxu0 %v9828_v59 }
 0xee1   :  { %3237 = vmatpush1.bf16.msra.mxu1 %v9399_v52  ;;  %6701 = vmatpush3.bf16.msra.mxu0 %v9447_v40  ;;  %v9882_v52 = vld [vmem:[#allocation57_spill] sm:$0xff] }
 0xee2   :  { %3238 = vmatprep.subr.bf16.mxu1 %v9402_v58  ;;  %6702 = vmatprep.subr.bf16.mxu0 %v9828_v59 }
 0xee3   :  { %v3054_v32 = vpop.f32.mrb[64].mxu0 }
 0xee4   :  { %v3056_v6 = vpop.f32.mrb[65].mxu0  ;;  %v6733_v31 = vadd.f32 %v9876_v27, %v3054_v32 }
 0xee5   :  { %v3058_v56 = vpop.f32.mrb[66].mxu0  ;;  %3239 = vmatpush1.bf16.msra.mxu1 %v9405_v8  ;;  %6703 = vmatpush3.bf16.msra.mxu0 %v9451_v15  ;;  %v9875_v8 = vld [vmem:[#allocation52_spill] sm:$0xff]  ;;  %v6735_v33 = vadd.f32 %v9881_v29, %v3056_v6 }
 0xee6   :  { %v3060_v43 = vpop.f32.mrb[67].mxu0  ;;  %3240 = vmatprep.subr.bf16.mxu1 %v9409_v62  ;;  %6704 = vmatprep.subr.bf16.mxu0 %v9828_v59  ;;  %v6737_v26 = vadd.f32 %v9876_v27, %v3058_v56  ;;  %v5792_v14 = vmul.f32 -1.442695, %v6733_v31  ;;  %v9885_v6 = vld [vmem:[#allocation60_spill] sm:$0xff] }
 0xee7   :  { %v6739_v34 = vadd.f32 %v9881_v29, %v3060_v43  ;;  %v5794_v19 = vmul.f32 -1.442695, %v6735_v33 }
 0xee8   :  { %v5793_v12 = vmul.f32 -1.442695, %v6737_v26  ;;  %7404 = vpow2.f32 %v5792_v14 }
 0xee9   :  { %3241 = vmatpush1.bf16.msra.mxu1 %v9872_v46  ;;  %6705 = vmatpush3.bf16.msra.mxu0 %v9455_v17 }
 0xeea   :  { %3242 = vmatprep.subr.bf16.mxu1 %v9873_v61  ;;  %6706 = vmatprep.subr.bf16.mxu0 %v9828_v59  ;;  %7406 = vpow2.f32 %v5793_v12 }
 0xeeb   :  { %7408 = vpow2.f32 %v5794_v19 }
 0xeed   :  { %3243 = vmatpush1.bf16.msra.mxu1 %v9874_v60  ;;  %6707 = vmatpush3.bf16.msra.mxu0 %v9460_v47 }
 0xeee   :  { %3244 = vmatprep.subr.bf16.mxu1 %v9875_v8  ;;  %6708 = vmatprep.subr.bf16.mxu0 %v9828_v59 }
 0xef0   :  { %v6360_v21 = vpop.f32.mrb[88].mxu1 }
 0xef1   :  { %v6361_v30 = vpop.f32.mrb[89].mxu1  ;;  %3245 = vmatpush1.bf16.msra.mxu1 %v9877_v5  ;;  %6709 = vmatpush3.bf16.msra.mxu0 %v9464_v45 }
 0xef2   :  { %v6362_v7 = vadd.f32 %v6361_v30, %v6360_v21  ;;  %v6363_v42 = vpop.f32.mrb[90].mxu1  ;;  %3246 = vmatprep.subr.bf16.mxu1 %v9878_v63  ;;  %6710 = vmatprep.subr.bf16.mxu0 %v9828_v59  ;;  %v5795_v59 = vmul.f32 -1.442695, %v6739_v34  ;;  %v7405_v35 = vpop.eup %7404 }
 0xef3   :  { %v6364_v2 = vpop.f32.mrb[91].mxu1  ;;  %v3112_v38 = vadd.f32 1.0, %v7405_v35 }
 0xef4   :  { %v6365_v50 = vadd.f32 %v6364_v2, %v6363_v42  ;;  %v7407_v28 = vpop.eup %7406  ;;  %7410 = vpow2.f32 %v5795_v59  ;;  %v3014_v9 = vadd.f32 %v6362_v7, %v9883_v1 }
 0xef5   :  { %3247 = vmatpush1.bf16.msra.mxu1 %v9879_v10  ;;  %6711 = vmatpush3.bf16.msra.mxu0 %v9468_v55  ;;  %v3113_v24 = vadd.f32 1.0, %v7407_v28  ;;  %7412 = vrcp.f32 %v3112_v38  ;;  %v7409_v11 = vpop.eup %7408 }
 0xef6   :  { %v3126_v20 = vadd.f32 1.0, %v7409_v11  ;;  %v3017_v49 = vadd.f32 %v6365_v50, %v9883_v1 }
 0xef7   :  { %7414 = vrcp.f32 %v3113_v24 }
 0xef8   :  { %3265 = vmatmul.mubr.bf16.vlgmr.msra.gmra.mrb[96].mxu1 %v9880_v25  ;;  %6713 = vmatmul.mubr.bf16.vlgmr.msra.gmra.mrb[72].mxu0 %v9880_v25  ;;  %7416 = vrcp.f32 %v3126_v20 }
 0xefe   :  { %v7411_v44 = vpop.eup %7410 }
 0xeff   :  { %v3127_v0 = vadd.f32 1.0, %v7411_v44  ;;  %v7413_v16 = vpop.eup %7412 }
 0xf01   :  { %v7415_v57 = vpop.eup %7414  ;;  %7418 = vrcp.f32 %v3127_v0 }
 0xf02   :  { %v7417_v47 = vpop.eup %7416 }
 0xf03   :  { %v3138_v55 = vsub.f32 1.0, %v7417_v47  ;;  %v3142_v37 = vmul.f32 %v7417_v47, %v9884_v39 }
 0xf0b   :  { %v7419_v45 = vpop.eup %7418 }
 0xf0c   :  { %v3139_v22 = vsub.f32 1.0, %v7419_v45  ;;  %v3143_v56 = vmul.f32 %v7419_v45, %v9885_v6  ;;  %v6934_v6 = vld [vmem:[#allocation18 + $0xc] ss:$16 sps:$4 sm:$0xff]  }
 0xf0d   :  { %4025 = vmatprep.subr.bf16.mxu1 %v6934_v6 }
 0xf10   :  { %v3097_v3 = vpop.f32.mrb[92].mxu1 }
 0xf11   :  { %v3098_v58 = vadd.f32 %v3097_v3, %v9882_v52  ;;  %v6694_v62 = vpop.f32.mrb[93].mxu1 }
 0xf12   :  { %v3100_v36 = vpop.f32.mrb[94].mxu1 }
 0xf13   :  { %v3132_v53 = vmul.f32 %v7413_v16, %v3098_v58  ;;  %v3101_v51 = vadd.f32 %v3100_v36, %v9882_v52  ;;  %v6695_v54 = vpop.f32.mrb[95].mxu1 }
 0xf15   :  { %v3134_v40 = vadd.f32 %v3132_v53, %v3014_v9  ;;  %v3133_v15 = vmul.f32 %v7415_v57, %v3101_v51 }
 0xf17   :  { %7420 = vtanh.f32 %v3134_v40  ;;  %v3135_v17 = vadd.f32 %v3133_v15, %v3017_v49 }
 0xf19   :  { %7422 = vtanh.f32 %v3135_v17 }
 0xf21   :  { %v7421_v18 = vpop.eup %7420 }
 0xf22   :  { %v3140_v48 = vmul.f32 %v7421_v18, %v3138_v55  ;;  %v5800_v18 = vld [vmem:[%s9686_s16] ss:$0 sm:$0xff] }
 0xf23   :  { %v7423_v23 = vpop.eup %7422 }
 0xf24   :  { %v9553_v13 = vadd.f32 %v3142_v37, %v3140_v48  ;;  %v3141_v32 = vmul.f32 %v7423_v23, %v3139_v22 }
 0xf26   :  { %v9556_v43 = vadd.f32 %v3143_v56, %v3141_v32  ;;  %v3366_v22 = vmul.f32 %v5800_v18, %v9553_v13  ;;  %v6932_v32 = vld [vmem:[#allocation18 + $0x8] ss:$16 sps:$4 sm:$0xff]   ;;  %v6935_v56 = vld [vmem:[#allocation18] ss:$16 sps:$4 sm:$0xff]  }
 0xf27   :  { %4026 = vmatpush1.bf16.msra.mxu1 %v6932_v32 }
 0xf28   :  { %v3367_v23 = vmul.f32 %v5800_v18, %v9556_v43 }
 0xfab   :  { %v6391_v46 = vpop.f32.mrb[68].mxu0 }
 0xfac   :  { %v6392_v61 = vpop.f32.mrb[69].mxu0 }
 0xfad   :  { %v6393_v60 = vadd.f32 %v6392_v61, %v6391_v46  ;;  %v6394_v8 = vpop.f32.mrb[70].mxu0  ;;  %v6937_v46 = vld [vmem:[#allocation18 + $0x4] ss:$16 sps:$4 sm:$0xff]   ;;  %v6940_v61 = vld [vmem:[#allocation18 + $0x2c] ss:$16 sps:$4 sm:$0xff]  }
 0xfae   :  { %v6395_v31 = vpop.f32.mrb[71].mxu0  ;;  %3984 = vmatprep.subr.bf16.mxu0 %v6937_v46  ;;  %4027 = vmatprep.subr.bf16.mxu1 %v6940_v61 }
 0xfaf   :  { %v6396_v21 = vadd.f32 %v6395_v31, %v6394_v8  ;;  %v6938_v8 = vld [vmem:[#allocation18 + $0x28] ss:$16 sps:$4 sm:$0xff]   ;;  %3985 = vmatpush1.bf16.msra.mxu0 %v6935_v56  ;;  %v6941_v31 = vld [vmem:[#allocation18 + $0x20] ss:$16 sps:$4 sm:$0xff]  }
 0xfb0   :  { %4028 = vmatpush1.bf16.msra.mxu1 %v6938_v8 }
 0xfb1   :  { %v3229_v36 = vadd.f32 %v6396_v21, %v9883_v1  ;;  %v6946_v21 = vld [vmem:[#allocation18 + $0x4c] ss:$16 sps:$4 sm:$0xff]  }
 0xfb2   :  { %4029 = vmatprep.subr.bf16.mxu1 %v6946_v21 }
 0xfcb   :  { %v3266_v26 = vpop.f32.mrb[96].mxu1  ;;  %v3309_v30 = vpop.f32.mrb[72].mxu0 }
 0xfcc   :  { %v6741_v5 = vadd.f32 %v9876_v27, %v3266_v26  ;;  %v3268_v7 = vpop.f32.mrb[97].mxu1  ;;  %v6714_v42 = vpop.f32.mrb[73].mxu0  ;;  %v3310_v20 = vadd.f32 %v3309_v30, %v9882_v52  ;;  %v6949_v26 = vld [vmem:[#allocation18 + $0x44] ss:$16 sps:$4 sm:$0xff]   ;;  %v6944_v30 = vld [vmem:[#allocation18 + $0x48] ss:$16 sps:$4 sm:$0xff]  }
 0xfcd   :  { %v3270_v63 = vpop.f32.mrb[98].mxu1  ;;  %v3312_v14 = vpop.f32.mrb[74].mxu0  ;;  %v6743_v25 = vadd.f32 %v9881_v29, %v3268_v7  ;;  %v6952_v7 = vld [vmem:[#allocation18 + $0x6c] ss:$16 sps:$4 sm:$0xff]   ;;  %v6955_v42 = vld [vmem:[#allocation18 + $0x64] ss:$16 sps:$4 sm:$0xff]   ;;  %4030 = vmatpush1.bf16.msra.mxu1 %v6944_v30 }
 0xfce   :  { %v5796_v2 = vmul.f32 -1.442695, %v6741_v5  ;;  %v6745_v50 = vadd.f32 %v9876_v27, %v3270_v63  ;;  %v3272_v12 = vpop.f32.mrb[99].mxu1  ;;  %v6715_v10 = vpop.f32.mrb[75].mxu0  ;;  %v3313_v62 = vadd.f32 %v3312_v14, %v9882_v52  ;;  %v6947_v5 = vld [vmem:[#allocation18 + $0x40] ss:$16 sps:$4 sm:$0xff]   ;;  %4031 = vmatprep.subr.bf16.mxu1 %v6952_v7 }
 0xfcf   :  { %v6747_v34 = vadd.f32 %v9881_v29, %v3272_v12  ;;  %v5798_v19 = vmul.f32 -1.442695, %v6743_v25  ;;  %v3226_v29 = vadd.f32 %v6393_v60, %v9883_v1  ;;  %v6943_v60 = vld [vmem:[#allocation18 + $0x24] ss:$16 sps:$4 sm:$0xff]   ;;  %v6950_v63 = vld [vmem:[#allocation18 + $0x68] ss:$16 sps:$4 sm:$0xff]  }
 0xfd0   :  { %7424 = vpow2.f32 %v5796_v2  ;;  %v5797_v33 = vmul.f32 -1.442695, %v6745_v50  ;;  %3986 = vmatprep.subr.bf16.mxu0 %v6943_v60  ;;  %v6953_v14 = vld [vmem:[#allocation18 + $0x60] ss:$16 sps:$4 sm:$0xff]   ;;  %v6958_v2 = vld [vmem:[#allocation18 + $0x8c] ss:$16 sps:$4 sm:$0xff]  }
 0xfd1   :  { %v5799_v59 = vmul.f32 -1.442695, %v6747_v34  ;;  %3987 = vmatpush1.bf16.msra.mxu0 %v6941_v31  ;;  %v6961_v50 = vld [vmem:[#allocation18 + $0x84] ss:$16 sps:$4 sm:$0xff]   ;;  %4032 = vmatpush1.bf16.msra.mxu1 %v6950_v63  ;;  %v6956_v12 = vld [vmem:[#allocation18 + $0x88] ss:$16 sps:$4 sm:$0xff]  }
 0xfd2   :  { %7426 = vpow2.f32 %v5797_v33  ;;  %3988 = vmatprep.subr.bf16.mxu0 %v6949_v26  ;;  %4033 = vmatprep.subr.bf16.mxu1 %v6958_v2  ;;  %v6959_v10 = vld [vmem:[#allocation18 + $0x80] ss:$16 sps:$4 sm:$0xff]   ;;  %v6964_v25 = vld [vmem:[#allocation18 + $0xac] ss:$16 sps:$4 sm:$0xff]   ;;  %v6967_v33 = vld [vmem:[#allocation18 + $0xa4] ss:$16 sps:$4 sm:$0xff]  }
 0xfd3   :  { %7428 = vpow2.f32 %v5798_v19  ;;  %v6962_v34 = vld [vmem:[#allocation18 + $0xa8] ss:$16 sps:$4 sm:$0xff]   ;;  %v6965_v19 = vld [vmem:[#allocation18 + $0xa0] ss:$16 sps:$4 sm:$0xff]  }
 0xfd4   :  { %7430 = vpow2.f32 %v5799_v59  ;;  %v6970_v59 = vld [vmem:[#allocation18 + $0xcc] ss:$16 sps:$4 sm:$0xff]  }
 0xfd5   :  { %3989 = vmatpush1.bf16.msra.mxu0 %v6947_v5  ;;  %4034 = vmatpush1.bf16.msra.mxu1 %v6956_v12 }
 0xfd6   :  { %3990 = vmatprep.subr.bf16.mxu0 %v6955_v42  ;;  %4035 = vmatprep.subr.bf16.mxu1 %v6964_v25 }
 0xfd9   :  { %3991 = vmatpush1.bf16.msra.mxu0 %v6953_v14  ;;  %4036 = vmatpush1.bf16.msra.mxu1 %v6962_v34 }
 0xfda   :  { %v7425_v35 = vpop.eup %7424  ;;  %3992 = vmatprep.subr.bf16.mxu0 %v6961_v50  ;;  %4037 = vmatprep.subr.bf16.mxu1 %v6970_v59 }
 0xfdb   :  { %v3324_v28 = vadd.f32 1.0, %v7425_v35  ;;  %v6973_v35 = vld [vmem:[#allocation18 + $0xc4] ss:$16 sps:$4 sm:$0xff]  }
 0xfdc   :  { %v7427_v38 = vpop.eup %7426 }
 0xfdd   :  { %7432 = vrcp.f32 %v3324_v28  ;;  %v3325_v24 = vadd.f32 1.0, %v7427_v38  ;;  %v7429_v27 = vpop.eup %7428  ;;  %3993 = vmatpush1.bf16.msra.mxu0 %v6959_v10  ;;  %v5801_v28 = vld [vmem:[#allocation2] ss:$0 sm:$0xff]  ;;  %v6968_v38 = vld [vmem:[#allocation18 + $0xc8] ss:$16 sps:$4 sm:$0xff]  }
 0xfde   :  { %v7431_v11 = vpop.eup %7430  ;;  %v3338_v44 = vadd.f32 1.0, %v7429_v27  ;;  %3994 = vmatprep.subr.bf16.mxu0 %v6967_v33  ;;  %v6976_v27 = vld [vmem:[#allocation18 + $0xec] ss:$16 sps:$4 sm:$0xff]   ;;  %4038 = vmatpush1.bf16.msra.mxu1 %v6968_v38 }
 0xfdf   :  { %7434 = vrcp.f32 %v3325_v24  ;;  %v3339_v3 = vadd.f32 1.0, %v7431_v11  ;;  %v6971_v24 = vld [vmem:[#allocation18 + $0xc0] ss:$16 sps:$4 sm:$0xff]   ;;  %4039 = vmatprep.subr.bf16.mxu1 %v6976_v27 }
 0xfe0   :  { %7436 = vrcp.f32 %v3338_v44  ;;  %v6979_v44 = vld [vmem:[#allocation18 + $0xe4] ss:$16 sps:$4 sm:$0xff]  }
 0xfe1   :  { %7438 = vrcp.f32 %v3339_v3  ;;  %3995 = vmatpush1.bf16.msra.mxu0 %v6965_v19  ;;  %v6974_v3 = vld [vmem:[#allocation18 + $0xe8] ss:$16 sps:$4 sm:$0xff]  }
 0xfe2   :  { %3996 = vmatprep.subr.bf16.mxu0 %v6973_v35  ;;  %4040 = vmatpush1.bf16.msra.mxu1 %v6974_v3 }
 0xfe5   :  { %3997 = vmatpush1.bf16.msra.mxu0 %v6971_v24 }
 0xfe6   :  { %3998 = vmatprep.subr.bf16.mxu0 %v6979_v44 }
 0xfe7   :  { %v7433_v0 = vpop.eup %7432 }
 0xfe8   :  { %v3344_v58 = vmul.f32 %v7433_v0, %v3310_v20 }
 0xfe9   :  { %v7435_v16 = vpop.eup %7434 }
 0xfea   :  { %v3346_v9 = vadd.f32 %v3344_v58, %v3226_v29  ;;  %v3345_v53 = vmul.f32 %v7435_v16, %v3313_v62  ;;  %v7437_v54 = vpop.eup %7436  ;;  %v6977_v58 = vld [vmem:[#allocation18 + $0xe0] ss:$16 sps:$4 sm:$0xff]   ;;  %v6982_v62 = vld [vmem:[#allocation18 + $0x10c] ss:$16 sps:$4 sm:$0xff]  }
 0xfeb   :  { %v7439_v57 = vpop.eup %7438  ;;  %v3350_v49 = vsub.f32 1.0, %v7437_v54  ;;  %v3354_v17 = vmul.f32 %v7437_v54, %v9169_v41  ;;  %v6980_v54 = vld [vmem:[#allocation18 + $0x108] ss:$16 sps:$4 sm:$0xff]   ;;  %3999 = vmatpush1.bf16.msra.mxu0 %v6977_v58  ;;  %4041 = vmatprep.subr.bf16.mxu1 %v6982_v62 }
 0xfec   :  { %7440 = vtanh.f32 %v3346_v9  ;;  %v3347_v51 = vadd.f32 %v3345_v53, %v3229_v36  ;;  %v3351_v47 = vsub.f32 1.0, %v7439_v57  ;;  %v3355_v1 = vmul.f32 %v7439_v57, %v9171_v4  ;;  %v6985_v9 = vld [vmem:[#allocation18 + $0x104] ss:$16 sps:$4 sm:$0xff]   ;;  %4042 = vmatpush1.bf16.msra.mxu1 %v6980_v54 }
 0xfed   :  { %v3370_v4 = vsel %vm834_vm5, %v3367_v23, 0.0  ;;  %4000 = vmatprep.subr.bf16.mxu0 %v6985_v9 }
 0xfee   :  { %7442 = vtanh.f32 %v3347_v51 }
 0xff6   :  { %v7441_v40 = vpop.eup %7440 }
 0xff7   :  { %v3352_v15 = vmul.f32 %v7441_v40, %v3350_v49  ;;  %v6983_v40 = vld [vmem:[#allocation18 + $0x100] ss:$16 sps:$4 sm:$0xff]  }
 0xff8   :  { %v7443_v45 = vpop.eup %7442  ;;  %4001 = vmatpush1.bf16.msra.mxu0 %v6983_v40 }
 0xff9   :  { %v9567_v55 = vadd.f32 %v3354_v17, %v3352_v15  ;;  %v3353_v52 = vmul.f32 %v7443_v45, %v3351_v47 }
 0xffb   :  { %v3442_v48 = vmul.f32 %v5800_v18, %v9567_v55  ;;  %v9574_v39 = vadd.f32 %v3355_v1, %v3353_v52 }
 0xffd   :  { %3444 = vadd.xlane.f32.xlu0 %v3442_v48  ;;  %v3443_v37 = vmul.f32 %v5800_v18, %v9574_v39 }
 0xfff   :  { %v3446_v41 = vsel %vm1109_vm8, %v3443_v37, 0.0 }
0x1000   :  { %3447 = vadd.xlane.f32.xlu1 %v3446_v41 }
0x1001   :  { %3368 = vadd.xlane.f32.xlu0 %v3366_v22 }
0x1004   :  { %3371 = vadd.xlane.f32.xlu1 %v3370_v4 }
0x108a   :  { %v3445_v11 = vpop.xlane.xlu0 %3444 }
0x108b   :  { %v3449_v20 = vadd.f32 %v5801_v28, %v3445_v11 }
0x108d   :  { %v5804_v0 = vmul.f32 -1.442695, %v3449_v20  ;;  %v3448_v29 = vpop.xlane.xlu1 %3447 }
0x108e   :  { %v3450_v16 = vadd.f32 %v5801_v28, %v3448_v29  ;;  %v3369_v36 = vpop.xlane.xlu0 %3368 }
0x108f   :  { %7444 = vpow2.f32 %v5804_v0  ;;  %v3379_v53 = vadd.f32 %v5801_v28, %v3369_v36 }
0x1090   :  { %v5805_v51 = vmul.f32 -1.442695, %v3450_v16 }
0x1091   :  { %v5802_v57 = vmul.f32 -1.442695, %v3379_v53  ;;  %v3372_v49 = vpop.xlane.xlu1 %3371 }
0x1092   :  { %7446 = vpow2.f32 %v5805_v51  ;;  %v3380_v15 = vadd.f32 %v5801_v28, %v3372_v49 }
0x1093   :  { %7448 = vpow2.f32 %v5802_v57 }
0x1094   :  { %v5803_v17 = vmul.f32 -1.442695, %v3380_v15 }
0x1096   :  { %7450 = vpow2.f32 %v5803_v17 }
0x1099   :  { %v7445_v47 = vpop.eup %7444 }
0x109a   :  { %v3457_v45 = vadd.f32 1.0, %v7445_v47 }
0x109c   :  { %v7447_v52 = vpop.eup %7446  ;;  %7452 = vrcp.f32 %v3457_v45 }
0x109d   :  { %v7449_v1 = vpop.eup %7448  ;;  %v3458_v18 = vadd.f32 1.0, %v7447_v52  ;;  %v6988_v52 = vld [vmem:[#allocation18 + $0x12c] ss:$16 sps:$4 sm:$0xff]  }
0x109e   :  { %v3387_v48 = vadd.f32 1.0, %v7449_v1  ;;  %v6986_v1 = vld [vmem:[#allocation18 + $0x128] ss:$16 sps:$4 sm:$0xff]   ;;  %4043 = vmatprep.subr.bf16.mxu1 %v6988_v52  ;;  %v7129_v52 = vld [vmem:[#allocation20 + $0x14] ss:$8 sps:$4 sm:$0xff]  }
0x109f   :  { %7454 = vrcp.f32 %v3458_v18  ;;  %v6991_v18 = vld [vmem:[#allocation18 + $0x124] ss:$16 sps:$4 sm:$0xff]   ;;  %4044 = vmatpush1.bf16.msra.mxu1 %v6986_v1 }
0x10a0   :  { %v7451_v37 = vpop.eup %7450  ;;  %7456 = vrcp.f32 %v3387_v48  ;;  %4002 = vmatprep.subr.bf16.mxu0 %v6991_v18  ;;  %v7036_v1 = vld [vmem:[#allocation21 + $0x44] ss:$16 sps:$4 sm:$0xff]   ;;  %v7127_v18 = vld [vmem:[#allocation20 + $0x10] ss:$8 sps:$4 sm:$0xff]  }
0x10a1   :  { %v3388_v41 = vadd.f32 1.0, %v7451_v37  ;;  %v6989_v37 = vld [vmem:[#allocation18 + $0x120] ss:$16 sps:$4 sm:$0xff]  }
0x10a2   :  { %4003 = vmatpush1.bf16.msra.mxu0 %v6989_v37  ;;  %v7034_v37 = vld [vmem:[#allocation21 + $0x40] ss:$16 sps:$4 sm:$0xff]  }
0x10a3   :  { %7458 = vrcp.f32 %v3388_v41 }
0x10a6   :  { %v7453_v22 = vpop.eup %7452 }
0x10a7   :  { %v3463_v4 = vsel %vm3393_vm11, %v7453_v22, -inf }
0x10a9   :  { %v7455_v23 = vpop.eup %7454 }
0x10aa   :  { %v3465_v32 = vsel %vm3464_vm12, %v7455_v23, -inf  ;;  %v7457_v6 = vpop.eup %7456 }
0x10ab   :  { %v3466_v56 = vmax.f32 %v3463_v4, %v3465_v32  ;;  %v3394_v60 = vsel %vm3393_vm11, %v7457_v6, -inf  ;;  %v6997_v4 = vld [vmem:[#allocation18 + $0x144] ss:$16 sps:$4 sm:$0xff]   ;;  %v6995_v32 = vld [vmem:[#allocation18 + $0x140] ss:$16 sps:$4 sm:$0xff]  }
0x10ac   :  { %4004 = vmatprep.subr.bf16.mxu0 %v6997_v4  ;;  %v7037_v4 = vld [vmem:[#allocation21 + $0x60] ss:$16 sps:$4 sm:$0xff]  }
0x10ad   :  { %v7459_v46 = vpop.eup %7458  ;;  %v3467_v61 = vrot.slane %v3466_v56, 4  ;;  %4005 = vmatpush1.bf16.msra.mxu0 %v6995_v32  ;;  %v7042_v32 = vld [vmem:[#allocation21 + $0x84] ss:$16 sps:$4 sm:$0xff]  }
0x10ae   :  { %v3396_v8 = vsel %vm3395_vm13, %v7459_v46, -inf }
0x10af   :  { %v3468_v31 = vmax.f32 %v3466_v56, %v3467_v61  ;;  %v3397_v21 = vmax.f32 %v3394_v60, %v3396_v8  ;;  %v7000_v56 = vld [vmem:[#allocation18 + $0x16c] ss:$16 sps:$4 sm:$0xff]   ;;  %v7003_v61 = vld [vmem:[#allocation18 + $0x164] ss:$16 sps:$4 sm:$0xff]   ;;  %v7001_v60 = vld [vmem:[#allocation18 + $0x160] ss:$16 sps:$4 sm:$0xff]  }
0x10b0   :  { %4006 = vmatprep.subr.bf16.mxu0 %v7003_v61  ;;  %v7045_v61 = vld [vmem:[#allocation21 + $0xa4] ss:$16 sps:$4 sm:$0xff]  }
0x10b1   :  { %v3469_v26 = vrot.slane %v3468_v31, 2  ;;  %v3398_v30 = vrot.slane %v3397_v21, 4  ;;  %4007 = vmatpush1.bf16.msra.mxu0 %v7001_v60  ;;  %v7136_v60 = vld [vmem:[#allocation20 + $0x40] ss:$8 sps:$4 sm:$0xff]  }
0x10b3   :  { %v3470_v5 = vmax.f32 %v3468_v31, %v3469_v26  ;;  %v3399_v7 = vmax.f32 %v3397_v21, %v3398_v30  ;;  %v7006_v31 = vld [vmem:[#allocation18 + $0x18c] ss:$16 sps:$4 sm:$0xff]   ;;  %v7004_v21 = vld [vmem:[#allocation18 + $0x188] ss:$16 sps:$4 sm:$0xff]   ;;  %v7009_v26 = vld [vmem:[#allocation18 + $0x184] ss:$16 sps:$4 sm:$0xff]  }
0x10b4   :  { %v7007_v30 = vld [vmem:[#allocation18 + $0x180] ss:$16 sps:$4 sm:$0xff]   ;;  %4008 = vmatprep.subr.bf16.mxu0 %v7009_v26 }
0x10b5   :  { %v3471_v42 = vrot.slane %v3470_v5, 1  ;;  %v3400_v63 = vrot.slane %v3399_v7, 2  ;;  %4009 = vmatpush1.bf16.msra.mxu0 %v7007_v30  ;;  %v7139_v26 = vld [vmem:[#allocation20 + $0x50] ss:$8 sps:$4 sm:$0xff]   ;;  %v7144_v30 = vld [vmem:[#allocation20 + $0x64] ss:$8 sps:$4 sm:$0xff]  }
0x10b7   :  { %v3472_v14 = vmax.f32 %v3470_v5, %v3471_v42  ;;  %v3401_v2 = vmax.f32 %v3399_v7, %v3400_v63  ;;  %v7012_v5 = vld [vmem:[#allocation18 + $0x1ac] ss:$16 sps:$4 sm:$0xff]   ;;  %v7010_v7 = vld [vmem:[#allocation18 + $0x1a8] ss:$16 sps:$4 sm:$0xff]   ;;  %v7015_v42 = vld [vmem:[#allocation18 + $0x1a4] ss:$16 sps:$4 sm:$0xff]  }
0x10b8   :  { %v7013_v63 = vld [vmem:[#allocation18 + $0x1a0] ss:$16 sps:$4 sm:$0xff]   ;;  %4010 = vmatprep.subr.bf16.mxu0 %v7015_v42 }
0x10b9   :  { %v3473_v50 = vsub.f32 %v7453_v22, %v3472_v14  ;;  %v3474_v12 = vsub.f32 %v7455_v23, %v3472_v14  ;;  %v3402_v10 = vrot.slane %v3401_v2, 1  ;;  %v6994_v22 = vld [vmem:[#allocation18 + $0x14c] ss:$16 sps:$4 sm:$0xff]   ;;  %v6992_v23 = vld [vmem:[#allocation18 + $0x148] ss:$16 sps:$4 sm:$0xff]   ;;  %4011 = vmatpush1.bf16.msra.mxu0 %v7013_v63 }
0x10ba   :  { %4045 = vmatprep.subr.bf16.mxu1 %v6994_v22  ;;  %v7018_v14 = vld [vmem:[#allocation18 + $0x1cc] ss:$16 sps:$4 sm:$0xff]   ;;  %v7130_v22 = vld [vmem:[#allocation20 + $0x20] ss:$8 sps:$4 sm:$0xff]  }
0x10bb   :  { %v3475_v25 = vmul.f32 1.442695, %v3473_v50  ;;  %v3403_v33 = vmax.f32 %v3401_v2, %v3402_v10  ;;  %v3477_v34 = vmul.f32 1.442695, %v3474_v12  ;;  %4046 = vmatpush1.bf16.msra.mxu1 %v6992_v23  ;;  %v7016_v2 = vld [vmem:[#allocation18 + $0x1c8] ss:$16 sps:$4 sm:$0xff]  }
0x10bc   :  { %4047 = vmatprep.subr.bf16.mxu1 %v7000_v56  ;;  %v7021_v50 = vld [vmem:[#allocation18 + $0x1c4] ss:$16 sps:$4 sm:$0xff]   ;;  %v7019_v12 = vld [vmem:[#allocation18 + $0x1c0] ss:$16 sps:$4 sm:$0xff]   ;;  %v7024_v10 = vld [vmem:[#allocation18 + $0x1ec] ss:$16 sps:$4 sm:$0xff]  }
0x10bd   :  { %7460 = vpow2.f32 %v3475_v25  ;;  %v3404_v19 = vsub.f32 %v7457_v6, %v3403_v33  ;;  %v3405_v59 = vsub.f32 %v7459_v46, %v3403_v33  ;;  %v6998_v46 = vld [vmem:[#allocation18 + $0x168] ss:$16 sps:$4 sm:$0xff]   ;;  %4012 = vmatprep.subr.bf16.mxu0 %v7021_v50  ;;  %v7025_v33 = vld [vmem:[#allocation18 + $0x1e0] ss:$16 sps:$4 sm:$0xff]   ;;  %v7135_v23 = vld [vmem:[#allocation20 + $0x34] ss:$8 sps:$4 sm:$0xff]  }
0x10be   :  { %7462 = vpow2.f32 %v3477_v34  ;;  %4013 = vmatpush1.bf16.msra.mxu0 %v7019_v12  ;;  %v7022_v25 = vld [vmem:[#allocation18 + $0x1e8] ss:$16 sps:$4 sm:$0xff]   ;;  %v7027_v34 = vld [vmem:[#allocation18 + $0x1e4] ss:$16 sps:$4 sm:$0xff]  }
0x10bf   :  { %v3406_v35 = vmul.f32 1.442695, %v3404_v19  ;;  %v3408_v28 = vmul.f32 1.442695, %v3405_v59  ;;  %4048 = vmatpush1.bf16.msra.mxu1 %v6998_v46  ;;  %4014 = vmatprep.subr.bf16.mxu0 %v7027_v34  ;;  %v7030_v19 = vld [vmem:[#allocation21 + $0x4] ss:$16 sps:$4 sm:$0xff]  }
0x10c0   :  { %4049 = vmatprep.subr.bf16.mxu1 %v7006_v31  ;;  %v7138_v56 = vld [vmem:[#allocation20 + $0x44] ss:$8 sps:$4 sm:$0xff]   ;;  %v7040_v46 = vld [vmem:[#allocation21 + $0x80] ss:$16 sps:$4 sm:$0xff]   ;;  %v7147_v63 = vld [vmem:[#allocation20 + $0x74] ss:$8 sps:$4 sm:$0xff]  }
0x10c1   :  { %7464 = vpow2.f32 %v3406_v35  ;;  %v7043_v31 = vld [vmem:[#allocation21 + $0xa0] ss:$16 sps:$4 sm:$0xff]   ;;  %v7150_v12 = vld [vmem:[#allocation20 + $0x84] ss:$8 sps:$4 sm:$0xff]   ;;  %v7153_v34 = vld [vmem:[#allocation20 + $0x94] ss:$8 sps:$4 sm:$0xff]  }
0x10c2   :  { %7466 = vpow2.f32 %v3408_v28  ;;  %4015 = vmatpush1.bf16.msra.mxu0 %v7025_v33  ;;  %v7142_v42 = vld [vmem:[#allocation20 + $0x60] ss:$8 sps:$4 sm:$0xff]   ;;  %v7145_v50 = vld [vmem:[#allocation20 + $0x70] ss:$8 sps:$4 sm:$0xff]  }
0x10c3   :  { %4050 = vmatpush1.bf16.msra.mxu1 %v7004_v21  ;;  %v7048_v21 = vld [vmem:[#allocation21 + $0xc4] ss:$16 sps:$4 sm:$0xff]   ;;  %v7148_v33 = vld [vmem:[#allocation20 + $0x80] ss:$8 sps:$4 sm:$0xff]  }
0x10c4   :  { %4051 = vmatprep.subr.bf16.mxu1 %v7012_v5  ;;  %v7046_v5 = vld [vmem:[#allocation21 + $0xc0] ss:$16 sps:$4 sm:$0xff]  }
0x10c7   :  { %v7461_v38 = vpop.eup %7460  ;;  %4052 = vmatpush1.bf16.msra.mxu1 %v7010_v7  ;;  %v7051_v7 = vld [vmem:[#allocation21 + $0xe4] ss:$16 sps:$4 sm:$0xff]  }
0x10c8   :  { %v7463_v24 = vpop.eup %7462  ;;  %v3479_v27 = vsel %vm3393_vm11, %v7461_v38, 0.0  ;;  %4053 = vmatprep.subr.bf16.mxu1 %v7018_v14  ;;  %v7049_v14 = vld [vmem:[#allocation21 + $0xe0] ss:$16 sps:$4 sm:$0xff]  }
0x10c9   :  { %v3480_v11 = vsel %vm3464_vm12, %v7463_v24, 0.0 }
0x10ca   :  { %v3481_v44 = vadd.f32 %v3480_v11, %v3479_v27 }
0x10cb   :  { %v7465_v20 = vpop.eup %7464  ;;  %4054 = vmatpush1.bf16.msra.mxu1 %v7016_v2  ;;  %v7054_v2 = vld [vmem:[#allocation21 + $0x104] ss:$16 sps:$4 sm:$0xff]  }
0x10cc   :  { %v7467_v3 = vpop.eup %7466  ;;  %v3482_v0 = vrot.slane %v3481_v44, 4  ;;  %v3410_v29 = vsel %vm3393_vm11, %v7465_v20, 0.0  ;;  %4055 = vmatprep.subr.bf16.mxu1 %v7024_v10  ;;  %v7052_v10 = vld [vmem:[#allocation21 + $0x100] ss:$16 sps:$4 sm:$0xff]  }
0x10cd   :  { %v3411_v58 = vsel %vm3395_vm13, %v7467_v3, 0.0 }
0x10ce   :  { %v3483_v62 = vadd.f32 %v3482_v0, %v3481_v44  ;;  %v3412_v16 = vadd.f32 %v3411_v58, %v3410_v29 }
0x10cf   :  { %4056 = vmatpush1.bf16.msra.mxu1 %v7022_v25  ;;  %v7057_v25 = vld [vmem:[#allocation21 + $0x124] ss:$16 sps:$4 sm:$0xff]  }
0x10d0   :  { %v3484_v36 = vrot.slane %v3483_v62, 2  ;;  %v3413_v9 = vrot.slane %v3412_v16, 4  ;;  %4960 = vmatprep.subr.bf16.mxu1 %v7030_v19  ;;  %v7055_v19 = vld [vmem:[#allocation21 + $0x120] ss:$16 sps:$4 sm:$0xff]  }
0x10d2   :  { %v3485_v53 = vadd.f32 %v3484_v36, %v3483_v62  ;;  %v3414_v51 = vadd.f32 %v3413_v9, %v3412_v16 }
0x10d4   :  { %v3486_v54 = vrot.slane %v3485_v53, 1  ;;  %v3415_v57 = vrot.slane %v3414_v51, 2 }
0x10d6   :  { %v3487_v49 = vadd.f32 %v3486_v54, %v3485_v53  ;;  %v3416_v40 = vadd.f32 %v3415_v57, %v3414_v51 }
0x10d8   :  { %7468 = vrcp.f32 %v3487_v49  ;;  %v3417_v15 = vrot.slane %v3416_v40, 1 }
0x10da   :  { %v3418_v17 = vadd.f32 %v3417_v15, %v3416_v40  ;;  %v7033_v15 = vld [vmem:[#allocation21 + $0x24] ss:$16 sps:$4 sm:$0xff]  }
0x10dc   :  { %7470 = vrcp.f32 %v3418_v17  ;;  %v7124_v17 = vld [vmem:[#allocation20] ss:$8 sps:$4 sm:$0xff]  }
0x10e2   :  { %v7469_v47 = vpop.eup %7468 }
0x10e3   :  { %v3490_v45 = vmul.f32 %v7469_v47, %v7463_v24  ;;  %v3489_v6 = vmul.f32 %v7469_v47, %v7461_v38  ;;  %v7126_v47 = vld [vmem:[#allocation20 + $0x4] ss:$8 sps:$4 sm:$0xff]  }
0x10e4   :  { %4405 = vmatprep.subr.bf16.mxu0 %v7126_v47  ;;  %v7087_v47 = vld [vmem:[#allocation21 + $0x6c] ss:$16 sps:$4 sm:$0xff]  }
0x10e5   :  { %3498 = vperm.xlu0 %6810, %v3490_v45   ;;  %v7031_v45 = vld [vmem:[#allocation21 + $0x20] ss:$16 sps:$4 sm:$0xff]  }
0x10e6   :  { %v7471_v48 = vpop.eup %7470 }
0x10e7   :  { %v3421_v41 = vmul.f32 %v7471_v48, %v7467_v3  ;;  %v3420_v8 = vmul.f32 %v7471_v48, %v7465_v20  ;;  %v7132_v48 = vld [vmem:[#allocation20 + $0x24] ss:$8 sps:$4 sm:$0xff]  }
0x10e9   :  { %3429 = vperm.xlu1 %6811, %v3421_v41   ;;  %v7039_v41 = vld [vmem:[#allocation21 + $0x64] ss:$16 sps:$4 sm:$0xff]  }
0x10ed   :  { %3493 = vperm.xlu1 %6811, %v3489_v6   ;;  %v7133_v6 = vld [vmem:[#allocation20 + $0x30] ss:$8 sps:$4 sm:$0xff]  }
0x10f1   :  { %3424 = vperm.xlu1 %6811, %v3420_v8   ;;  %v7141_v8 = vld [vmem:[#allocation20 + $0x54] ss:$8 sps:$4 sm:$0xff]  }
0x1164   :  { %v3499_v59 = vpop.permute.xlu0 %3498 }
0x1165   :  { %v3502_v28 = vmul.f32 %v3499_v59, %v9574_v39  ;;  %v7060_v59 = vld [vmem:[#allocation21 + $0x144] ss:$16 sps:$4 sm:$0xff]  }
0x1167   :  { %v3503_v27 = vsel %vm1109_vm8, %v3502_v28, 0.0  ;;  %v7156_v28 = vld [vmem:[#allocation20 + $0xa4] ss:$8 sps:$4 sm:$0xff]  }
0x1168   :  { %v3430_v35 = vpop.permute.xlu1 %3429 }
0x1169   :  { %v3433_v11 = vmul.f32 %v3430_v35, %v9556_v43  ;;  %v7028_v43 = vld [vmem:[#allocation21] ss:$16 sps:$4 sm:$0xff]  }
0x116a   :  { %v7151_v35 = vld [vmem:[#allocation20 + $0x90] ss:$8 sps:$4 sm:$0xff]  }
0x116b   :  { %v3434_v29 = vsel %vm834_vm5, %v3433_v11, 0.0  ;;  %v7159_v11 = vld [vmem:[#allocation20 + $0xb4] ss:$8 sps:$4 sm:$0xff]  }
0x116c   :  { %v3494_v38 = vpop.permute.xlu1 %3493 }
0x116d   :  { %v3501_v24 = vmul.f32 %v3494_v38, %v9567_v55  ;;  %v7058_v38 = vld [vmem:[#allocation21 + $0x140] ss:$16 sps:$4 sm:$0xff]  }
0x116f   :  { %v3504_v44 = vadd.f32 %v3503_v27, %v3501_v24  ;;  %v7063_v24 = vld [vmem:[#allocation21 + $0x164] ss:$16 sps:$4 sm:$0xff]   ;;  %v7154_v27 = vld [vmem:[#allocation20 + $0xa0] ss:$8 sps:$4 sm:$0xff]  }
0x1170   :  { %v3425_v20 = vpop.permute.xlu1 %3424 }
0x1171   :  { %v3505_v3 = vrot.slane %v3504_v44, 4  ;;  %v3432_v0 = vmul.f32 %v3425_v20, %v9553_v13  ;;  %v7066_v20 = vld [vmem:[#allocation21 + $0x184] ss:$16 sps:$4 sm:$0xff]  }
0x1173   :  { %v3506_v58 = vadd.f32 %v3505_v3, %v3504_v44  ;;  %v3435_v62 = vadd.f32 %v3434_v29, %v3432_v0  ;;  %v7061_v44 = vld [vmem:[#allocation21 + $0x160] ss:$16 sps:$4 sm:$0xff]   ;;  %v7162_v0 = vld [vmem:[#allocation20 + $0xc4] ss:$8 sps:$4 sm:$0xff]  }
0x1174   :  { %v7157_v3 = vld [vmem:[#allocation20 + $0xb0] ss:$8 sps:$4 sm:$0xff]  }
0x1175   :  { %v3507_v16 = vrot.slane %v3506_v58, 2  ;;  %v3436_v36 = vrot.slane %v3435_v62, 4  ;;  %v7064_v29 = vld [vmem:[#allocation21 + $0x180] ss:$16 sps:$4 sm:$0xff]  }
0x1177   :  { %v3508_v9 = vadd.f32 %v3507_v16, %v3506_v58  ;;  %v3437_v39 = vadd.f32 %v3436_v36, %v3435_v62  ;;  %v7069_v58 = vld [vmem:[#allocation21 + $0x1a4] ss:$16 sps:$4 sm:$0xff]   ;;  %v7160_v62 = vld [vmem:[#allocation20 + $0xc0] ss:$8 sps:$4 sm:$0xff]  }
0x1178   :  { %v7165_v16 = vld [vmem:[#allocation20 + $0xd4] ss:$8 sps:$4 sm:$0xff]   ;;  %v7067_v36 = vld [vmem:[#allocation21 + $0x1a0] ss:$16 sps:$4 sm:$0xff]  }
0x1179   :  { %v3509_v53 = vrot.slane %v3508_v9, 1  ;;  %v3438_v51 = vrot.slane %v3437_v39, 2 }
0x117b   :  { %v3439_v55 = vadd.f32 %v3438_v51, %v3437_v39  ;;  %v3510_v54 = vadd.f32 %v3509_v53, %v3508_v9  ;;  %v7072_v9 = vld [vmem:[#allocation21 + $0x1c4] ss:$16 sps:$4 sm:$0xff]   ;;  %v7163_v39 = vld [vmem:[#allocation20 + $0xd0] ss:$8 sps:$4 sm:$0xff]  }
0x117c   :  { %v7070_v53 = vld [vmem:[#allocation21 + $0x1c0] ss:$16 sps:$4 sm:$0xff]   ;;  %v7075_v51 = vld [vmem:[#allocation21 + $0x1e4] ss:$16 sps:$4 sm:$0xff]  }
0x117d   :  { %v3440_v57 = vrot.slane %v3439_v55, 1  ;;  %v9595_v49 = vpack.c.bf16 %v3510_v54, %v3510_v54  ;;  %v7078_v54 = vld [vmem:[#allocation21 + $0xc] ss:$16 sps:$4 sm:$0xff]  }
0x117f   :  { %4016 = vmatprep.mubr.bf16.mxu0 %v9595_v49  ;;  %4057 = vmatprep.mubr.bf16.mxu1 %v9595_v49  ;;  %v3441_v13 = vadd.f32 %v3440_v57, %v3439_v55  ;;  %v7073_v55 = vld [vmem:[#allocation21 + $0x1e0] ss:$16 sps:$4 sm:$0xff]   ;;  %v7076_v57 = vld [vmem:[#allocation21 + $0x8] ss:$16 sps:$4 sm:$0xff]  }
0x1181   :  { %v9599_v40 = vpack.c.bf16 %v3441_v13, %v3441_v13  ;;  %v7081_v13 = vld [vmem:[#allocation21 + $0x2c] ss:$16 sps:$4 sm:$0xff]  }
0x1183   :  { %4017 = vmatmul.mubr.bf16.vlgmr.msra.gmra.mrb[76].mxu0 %v9599_v40  ;;  %4058 = vmatmul.mubr.bf16.vlgmr.msra.gmra.mrb[100].mxu1 %v9599_v40 }
0x1184   :  { %4961 = vmatpush1.bf16.msra.mxu1 %v7028_v43  ;;  %4992 = vmatprep.mubr.bf16.mxu1 %v9599_v40  ;;  %v7079_v43 = vld [vmem:[#allocation21 + $0x28] ss:$16 sps:$4 sm:$0xff]  }
0x1185   :  { %4962 = vmatprep.subr.bf16.mxu1 %v7033_v15  ;;  %4406 = vmatpush1.bf16.msra.mxu0 %v7124_v17  ;;  %v7084_v15 = vld [vmem:[#allocation21 + $0x4c] ss:$16 sps:$4 sm:$0xff]   ;;  %v7082_v17 = vld [vmem:[#allocation21 + $0x48] ss:$16 sps:$4 sm:$0xff]  }
0x1186   :  { %4407 = vmatprep.subr.bf16.mxu0 %v7129_v52  ;;  %v7090_v52 = vld [vmem:[#allocation21 + $0x8c] ss:$16 sps:$4 sm:$0xff]  }
0x1188   :  { %4963 = vmatpush1.bf16.msra.mxu1 %v7031_v45  ;;  %v7085_v45 = vld [vmem:[#allocation21 + $0x68] ss:$16 sps:$4 sm:$0xff]  }
0x1189   :  { %4964 = vmatprep.subr.bf16.mxu1 %v7036_v1  ;;  %4408 = vmatpush1.bf16.msra.mxu0 %v7127_v18  ;;  %v7088_v1 = vld [vmem:[#allocation21 + $0x88] ss:$16 sps:$4 sm:$0xff]   ;;  %v7093_v18 = vld [vmem:[#allocation21 + $0xac] ss:$16 sps:$4 sm:$0xff]  }
0x118a   :  { %4409 = vmatprep.subr.bf16.mxu0 %v7132_v48  ;;  %v7091_v48 = vld [vmem:[#allocation21 + $0xa8] ss:$16 sps:$4 sm:$0xff]  }
0x118c   :  { %4965 = vmatpush1.bf16.msra.mxu1 %v7034_v37  ;;  %v7096_v37 = vld [vmem:[#allocation21 + $0xcc] ss:$16 sps:$4 sm:$0xff]  }
0x118d   :  { %4966 = vmatprep.subr.bf16.mxu1 %v7039_v41  ;;  %4410 = vmatpush1.bf16.msra.mxu0 %v7130_v22  ;;  %v7166_v41 = vld [vmem:[#allocation20 + $0xe0] ss:$8 sps:$4 sm:$0xff]  }
0x118e   :  { %4411 = vmatprep.subr.bf16.mxu0 %v7135_v23  ;;  %v7094_v22 = vld [vmem:[#allocation21 + $0xc8] ss:$16 sps:$4 sm:$0xff]   ;;  %v7099_v23 = vld [vmem:[#allocation21 + $0xec] ss:$16 sps:$4 sm:$0xff]  }
0x1190   :  { %4967 = vmatpush1.bf16.msra.mxu1 %v7037_v4  ;;  %v7171_v4 = vld [vmem:[#allocation20 + $0xf4] ss:$8 sps:$4 sm:$0xff]  }
0x1191   :  { %4968 = vmatprep.subr.bf16.mxu1 %v7042_v32  ;;  %4412 = vmatpush1.bf16.msra.mxu0 %v7133_v6  ;;  %v7169_v32 = vld [vmem:[#allocation20 + $0xf0] ss:$8 sps:$4 sm:$0xff]  }
0x1192   :  { %4413 = vmatprep.subr.bf16.mxu0 %v7138_v56  ;;  %v7097_v6 = vld [vmem:[#allocation21 + $0xe8] ss:$16 sps:$4 sm:$0xff]   ;;  %v7102_v56 = vld [vmem:[#allocation21 + $0x10c] ss:$16 sps:$4 sm:$0xff]  }
0x1194   :  { %4969 = vmatpush1.bf16.msra.mxu1 %v7040_v46  ;;  %v7174_v46 = vld [vmem:[#allocation20 + $0x104] ss:$8 sps:$4 sm:$0xff]  }
0x1195   :  { %4970 = vmatprep.subr.bf16.mxu1 %v7045_v61  ;;  %4414 = vmatpush1.bf16.msra.mxu0 %v7136_v60  ;;  %v7100_v61 = vld [vmem:[#allocation21 + $0x108] ss:$16 sps:$4 sm:$0xff]   ;;  %v7105_v60 = vld [vmem:[#allocation21 + $0x12c] ss:$16 sps:$4 sm:$0xff]  }
0x1196   :  { %4415 = vmatprep.subr.bf16.mxu0 %v7141_v8  ;;  %v7103_v8 = vld [vmem:[#allocation21 + $0x128] ss:$16 sps:$4 sm:$0xff]  }
0x1198   :  { %4971 = vmatpush1.bf16.msra.mxu1 %v7043_v31  ;;  %v7108_v31 = vld [vmem:[#allocation21 + $0x14c] ss:$16 sps:$4 sm:$0xff]  }
0x1199   :  { %4972 = vmatprep.subr.bf16.mxu1 %v7048_v21  ;;  %4416 = vmatpush1.bf16.msra.mxu0 %v7139_v26  ;;  %v7106_v21 = vld [vmem:[#allocation21 + $0x148] ss:$16 sps:$4 sm:$0xff]   ;;  %v7111_v26 = vld [vmem:[#allocation21 + $0x16c] ss:$16 sps:$4 sm:$0xff]  }
0x119a   :  { %4417 = vmatprep.subr.bf16.mxu0 %v7144_v30  ;;  %v7109_v30 = vld [vmem:[#allocation21 + $0x168] ss:$16 sps:$4 sm:$0xff]  }
0x119c   :  { %4973 = vmatpush1.bf16.msra.mxu1 %v7046_v5  ;;  %v7114_v5 = vld [vmem:[#allocation21 + $0x18c] ss:$16 sps:$4 sm:$0xff]  }
0x119d   :  { %4974 = vmatprep.subr.bf16.mxu1 %v7051_v7  ;;  %4418 = vmatpush1.bf16.msra.mxu0 %v7142_v42  ;;  %v7112_v7 = vld [vmem:[#allocation21 + $0x188] ss:$16 sps:$4 sm:$0xff]   ;;  %v7117_v42 = vld [vmem:[#allocation21 + $0x1ac] ss:$16 sps:$4 sm:$0xff]  }
0x119e   :  { %4419 = vmatprep.subr.bf16.mxu0 %v7147_v63  ;;  %v7115_v63 = vld [vmem:[#allocation21 + $0x1a8] ss:$16 sps:$4 sm:$0xff]  }
0x11a0   :  { %4975 = vmatpush1.bf16.msra.mxu1 %v7049_v14  ;;  %v7120_v14 = vld [vmem:[#allocation21 + $0x1cc] ss:$16 sps:$4 sm:$0xff]  }
0x11a1   :  { %4976 = vmatprep.subr.bf16.mxu1 %v7054_v2  ;;  %4420 = vmatpush1.bf16.msra.mxu0 %v7145_v50  ;;  %v7118_v2 = vld [vmem:[#allocation21 + $0x1c8] ss:$16 sps:$4 sm:$0xff]   ;;  %v7123_v50 = vld [vmem:[#allocation21 + $0x1ec] ss:$16 sps:$4 sm:$0xff]  }
0x11a2   :  { %4421 = vmatprep.subr.bf16.mxu0 %v7150_v12  ;;  %v7121_v12 = vld [vmem:[#allocation21 + $0x1e8] ss:$16 sps:$4 sm:$0xff]  }
0x11a4   :  { %4977 = vmatpush1.bf16.msra.mxu1 %v7052_v10  ;;  %v9610_v10 = vld [vmem:[%s9689_s19] sm:$0xf] }
0x11a5   :  { %4978 = vmatprep.subr.bf16.mxu1 %v7057_v25  ;;  %4422 = vmatpush1.bf16.msra.mxu0 %v7148_v33  ;;  %v9886_v25 = vld [vmem:[#allocation61_spill] sm:$0xff] }
0x11a6   :  { %4423 = vmatprep.subr.bf16.mxu0 %v7153_v34  ;;  %v3978_v33 = vsub.s32 3, %v9886_v25  ;;  %v9887_v34 = vld [vmem:[#allocation62_spill] sm:$0xff]  ;;  %v7268_v25 = vld [vmem:[#allocation23 + $0x100] ss:$8 sps:$4 sm:$0xff]  }
0x11a8   :  { %4979 = vmatpush1.bf16.msra.mxu1 %v7055_v19  ;;  %v3967_v19 = vrot.slane %v9610_v10, %v9887_v34 }
0x11a9   :  { %4980 = vmatprep.subr.bf16.mxu1 %v7060_v59  ;;  %4424 = vmatpush1.bf16.msra.mxu0 %v7151_v35  ;;  %v9888_v59 = vld [vmem:[#allocation54_spill] sm:$0xff] }
0x11aa   :  { %4425 = vmatprep.subr.bf16.mxu0 %v7156_v28  ;;  %v3971_v35 = vrot.slane %v9610_v10, %v9888_v59  ;;  %v3979_v28 = vrot.slane %v9610_v10, %v3978_v33 }
0x11ac   :  { %4981 = vmatpush1.bf16.msra.mxu1 %v7058_v38 }
0x11ad   :  { %4982 = vmatprep.subr.bf16.mxu1 %v7063_v24  ;;  %4426 = vmatpush1.bf16.msra.mxu0 %v7154_v27 }
0x11ae   :  { %4427 = vmatprep.subr.bf16.mxu0 %v7159_v11 }
0x11b0   :  { %4983 = vmatpush1.bf16.msra.mxu1 %v7061_v44 }
0x11b1   :  { %4984 = vmatprep.subr.bf16.mxu1 %v7066_v20  ;;  %4428 = vmatpush1.bf16.msra.mxu0 %v7157_v3 }
0x11b2   :  { %4429 = vmatprep.subr.bf16.mxu0 %v7162_v0 }
0x11b4   :  { %4985 = vmatpush1.bf16.msra.mxu1 %v7064_v29 }
0x11b5   :  { %4986 = vmatprep.subr.bf16.mxu1 %v7069_v58  ;;  %4430 = vmatpush1.bf16.msra.mxu0 %v7160_v62 }
0x11b6   :  { %4431 = vmatprep.subr.bf16.mxu0 %v7165_v16 }
0x11b8   :  { %4987 = vmatpush1.bf16.msra.mxu1 %v7067_v36 }
0x11b9   :  { %4988 = vmatprep.subr.bf16.mxu1 %v7072_v9  ;;  %4432 = vmatpush1.bf16.msra.mxu0 %v7163_v39  ;;  %v7172_v39 = vld [vmem:[#allocation20 + $0x100] ss:$8 sps:$4 sm:$0xff]  }
0x11bc   :  { %4989 = vmatpush1.bf16.msra.mxu1 %v7070_v53 }
0x11bd   :  { %4990 = vmatprep.subr.bf16.mxu1 %v7075_v51  ;;  %v7177_v51 = vld [vmem:[#allocation20 + $0x114] ss:$8 sps:$4 sm:$0xff]  }
0x11c0   :  { %4991 = vmatpush1.bf16.msra.mxu1 %v7073_v55 }
0x11c1   :  { %5001 = vmatprep.subr.bf16.mxu1 %v7078_v54  ;;  %v7175_v54 = vld [vmem:[#allocation20 + $0x110] ss:$8 sps:$4 sm:$0xff]  }
0x11c3   :  { %4993 = vmatmul.mubr.bf16.vlgmr.msra.gmra.mrb[104].mxu1 %v9595_v49 }
0x11c4   :  { %5002 = vmatpush1.bf16.msra.mxu1 %v7076_v57  ;;  %5033 = vmatprep.mubr.bf16.mxu1 %v9599_v40  ;;  %v7168_v40 = vld [vmem:[#allocation20 + $0xe4] ss:$8 sps:$4 sm:$0xff]  }
0x11c5   :  { %5003 = vmatprep.subr.bf16.mxu1 %v7081_v13  ;;  %4433 = vmatprep.subr.bf16.mxu0 %v7168_v40  ;;  %v7180_v57 = vld [vmem:[#allocation20 + $0x124] ss:$8 sps:$4 sm:$0xff]   ;;  %v7178_v13 = vld [vmem:[#allocation20 + $0x120] ss:$8 sps:$4 sm:$0xff]  }
0x11c6   :  { %4434 = vmatpush1.bf16.msra.mxu0 %v7166_v41  ;;  %v7198_v40 = vld [vmem:[#allocation20 + $0x184] ss:$8 sps:$4 sm:$0xff]   ;;  %v7196_v41 = vld [vmem:[#allocation20 + $0x180] ss:$8 sps:$4 sm:$0xff]  }
0x11c7   :  { %4435 = vmatprep.subr.bf16.mxu0 %v7171_v4  ;;  %v7204_v4 = vld [vmem:[#allocation20 + $0x1a4] ss:$8 sps:$4 sm:$0xff]  }
0x11c8   :  { %5004 = vmatpush1.bf16.msra.mxu1 %v7079_v43  ;;  %v7183_v43 = vld [vmem:[#allocation20 + $0x134] ss:$8 sps:$4 sm:$0xff]  }
0x11c9   :  { %5005 = vmatprep.subr.bf16.mxu1 %v7084_v15  ;;  %v7181_v15 = vld [vmem:[#allocation20 + $0x130] ss:$8 sps:$4 sm:$0xff]  }
0x11ca   :  { %4436 = vmatpush1.bf16.msra.mxu0 %v7169_v32  ;;  %v7202_v32 = vld [vmem:[#allocation20 + $0x1a0] ss:$8 sps:$4 sm:$0xff]  }
0x11cb   :  { %4446 = vmatprep.subr.bf16.mxu0 %v7174_v46  ;;  %v7210_v46 = vld [vmem:[#allocation20 + $0x1c4] ss:$8 sps:$4 sm:$0xff]  }
0x11cc   :  { %5006 = vmatpush1.bf16.msra.mxu1 %v7082_v17  ;;  %v7186_v17 = vld [vmem:[#allocation20 + $0x144] ss:$8 sps:$4 sm:$0xff]  }
0x11cd   :  { %5007 = vmatprep.subr.bf16.mxu1 %v7087_v47  ;;  %v7184_v47 = vld [vmem:[#allocation20 + $0x140] ss:$8 sps:$4 sm:$0xff]  }
0x11d0   :  { %5008 = vmatpush1.bf16.msra.mxu1 %v7085_v45  ;;  %v7189_v45 = vld [vmem:[#allocation20 + $0x154] ss:$8 sps:$4 sm:$0xff]  }
0x11d1   :  { %5009 = vmatprep.subr.bf16.mxu1 %v7090_v52  ;;  %v7187_v52 = vld [vmem:[#allocation20 + $0x150] ss:$8 sps:$4 sm:$0xff]  }
0x11d4   :  { %5010 = vmatpush1.bf16.msra.mxu1 %v7088_v1  ;;  %v7192_v1 = vld [vmem:[#allocation20 + $0x164] ss:$8 sps:$4 sm:$0xff]  }
0x11d5   :  { %5011 = vmatprep.subr.bf16.mxu1 %v7093_v18  ;;  %v7190_v18 = vld [vmem:[#allocation20 + $0x160] ss:$8 sps:$4 sm:$0xff]  }
0x11d8   :  { %5012 = vmatpush1.bf16.msra.mxu1 %v7091_v48  ;;  %v7195_v48 = vld [vmem:[#allocation20 + $0x174] ss:$8 sps:$4 sm:$0xff]  }
0x11d9   :  { %5013 = vmatprep.subr.bf16.mxu1 %v7096_v37  ;;  %v7193_v37 = vld [vmem:[#allocation20 + $0x170] ss:$8 sps:$4 sm:$0xff]  }
0x11dc   :  { %5014 = vmatpush1.bf16.msra.mxu1 %v7094_v22  ;;  %v7201_v22 = vld [vmem:[#allocation20 + $0x194] ss:$8 sps:$4 sm:$0xff]  }
0x11dd   :  { %5015 = vmatprep.subr.bf16.mxu1 %v7099_v23  ;;  %v7199_v23 = vld [vmem:[#allocation20 + $0x190] ss:$8 sps:$4 sm:$0xff]  }
0x11e0   :  { %5016 = vmatpush1.bf16.msra.mxu1 %v7097_v6  ;;  %v7207_v6 = vld [vmem:[#allocation20 + $0x1b4] ss:$8 sps:$4 sm:$0xff]  }
0x11e1   :  { %5017 = vmatprep.subr.bf16.mxu1 %v7102_v56  ;;  %v7205_v56 = vld [vmem:[#allocation20 + $0x1b0] ss:$8 sps:$4 sm:$0xff]  }
0x11e4   :  { %5018 = vmatpush1.bf16.msra.mxu1 %v7100_v61  ;;  %v7208_v61 = vld [vmem:[#allocation20 + $0x1c0] ss:$8 sps:$4 sm:$0xff]  }
0x11e5   :  { %5019 = vmatprep.subr.bf16.mxu1 %v7105_v60  ;;  %v7213_v60 = vld [vmem:[#allocation20 + $0x1d4] ss:$8 sps:$4 sm:$0xff]  }
0x11e8   :  { %5020 = vmatpush1.bf16.msra.mxu1 %v7103_v8  ;;  %v7211_v8 = vld [vmem:[#allocation20 + $0x1d0] ss:$8 sps:$4 sm:$0xff]  }
0x11e9   :  { %5021 = vmatprep.subr.bf16.mxu1 %v7108_v31  ;;  %v9889_v31 = vld [vmem:[#allocation56_spill] sm:$0xff] }
0x11ec   :  { %5022 = vmatpush1.bf16.msra.mxu1 %v7106_v21  ;;  %v3975_v21 = vrot.slane %v9610_v10, %v9889_v31  ;;  %v7217_v10 = vld [vmem:[#allocation20 + $0x1f0] ss:$8 sps:$4 sm:$0xff]  }
0x11ed   :  { %5023 = vmatprep.subr.bf16.mxu1 %v7111_v26  ;;  %v9627_v26 = vld [vmem:[%s9693_s23] sm:$0xf] }
0x11f0   :  { %5024 = vmatpush1.bf16.msra.mxu1 %v7109_v30  ;;  %v7216_v30 = vld [vmem:[#allocation20 + $0x1e4] ss:$8 sps:$4 sm:$0xff]  }
0x11f1   :  { %5025 = vmatprep.subr.bf16.mxu1 %v7114_v5  ;;  %v7214_v5 = vld [vmem:[#allocation20 + $0x1e0] ss:$8 sps:$4 sm:$0xff]  }
0x11f4   :  { %5026 = vmatpush1.bf16.msra.mxu1 %v7112_v7  ;;  %v4947_v7 = vrot.slane %v9627_v26, %v9888_v59 }
0x11f5   :  { %5027 = vmatprep.subr.bf16.mxu1 %v7117_v42 }
0x11f8   :  { %5028 = vmatpush1.bf16.msra.mxu1 %v7115_v63  ;;  %v7219_v63 = vld [vmem:[#allocation20 + $0x1f4] ss:$8 sps:$4 sm:$0xff]  }
0x11f9   :  { %5029 = vmatprep.subr.bf16.mxu1 %v7120_v14 }
0x11fc   :  { %5030 = vmatpush1.bf16.msra.mxu1 %v7118_v2 }
0x11fd   :  { %5031 = vmatprep.subr.bf16.mxu1 %v7123_v50 }
0x1200   :  { %5032 = vmatpush1.bf16.msra.mxu1 %v7121_v12 }
0x1203   :  { %5034 = vmatmul.mubr.bf16.vlgmr.msra.gmra.mrb[108].mxu1 %v9595_v49 }
0x1256   :  { %v4018_v38 = vpop.f32.mrb[76].mxu0  ;;  %v9620_v24 = vpop.f32.mrb[100].mxu1 }
0x1257   :  { %v4019_v49 = vadd.f32 %v4018_v38, %v3967_v19  ;;  %v4020_v27 = vpop.f32.mrb[77].mxu0  ;;  %v4061_v11 = vpop.f32.mrb[101].mxu1  ;;  %v4060_v42 = vadd.f32 %v9620_v24, %v3975_v21 }
0x1258   :  { %v4021_v44 = vadd.f32 %v4020_v27, %v3971_v35  ;;  %v4062_v20 = vadd.f32 %v4061_v11, %v3979_v28  ;;  %v4022_v3 = vpop.f32.mrb[78].mxu0  ;;  %v4063_v0 = vpop.f32.mrb[102].mxu1  ;;  %v7222_v28 = vld [vmem:[#allocation23 + $0x4] ss:$8 sps:$4 sm:$0xff]   ;;  %v7225_v11 = vld [vmem:[#allocation23 + $0x14] ss:$8 sps:$4 sm:$0xff]  }
0x1259   :  { %v4066_v29 = vmax.f32 %v4019_v49, 0.0  ;;  %v4023_v58 = vpop.f32.mrb[79].mxu0  ;;  %v4064_v62 = vpop.f32.mrb[103].mxu1  ;;  %v4068_v19 = vmax.f32 %v4060_v42, 0.0  ;;  %v7220_v49 = vld [vmem:[#allocation23] ss:$8 sps:$4 sm:$0xff]  }
0x125a   :  { %v4067_v16 = vmax.f32 %v4021_v44, 0.0  ;;  %v4069_v36 = vmax.f32 %v4062_v20, 0.0  ;;  %v7223_v44 = vld [vmem:[#allocation23 + $0x10] ss:$8 sps:$4 sm:$0xff]   ;;  %v7228_v20 = vld [vmem:[#allocation23 + $0x24] ss:$8 sps:$4 sm:$0xff]  }
0x125b   :  { %v4070_v53 = vpack.c.bf16 %v4066_v29, %v4066_v29  ;;  %v4072_v27 = vpack.c.bf16 %v4068_v19, %v4068_v19  ;;  %v7226_v3 = vld [vmem:[#allocation23 + $0x20] ss:$8 sps:$4 sm:$0xff]   ;;  %v7231_v0 = vld [vmem:[#allocation23 + $0x34] ss:$8 sps:$4 sm:$0xff]   ;;  %v7229_v29 = vld [vmem:[#allocation23 + $0x30] ss:$8 sps:$4 sm:$0xff]  }
0x125c   :  { %v4071_v9 = vpack.c.bf16 %v4067_v16, %v4067_v16  ;;  %v4073_v55 = vpack.c.bf16 %v4069_v36, %v4069_v36  ;;  %v7234_v58 = vld [vmem:[#allocation23 + $0x44] ss:$8 sps:$4 sm:$0xff]   ;;  %v7232_v62 = vld [vmem:[#allocation23 + $0x40] ss:$8 sps:$4 sm:$0xff]   ;;  %v7237_v16 = vld [vmem:[#allocation23 + $0x54] ss:$8 sps:$4 sm:$0xff]  }
0x125d   :  { %v7235_v36 = vld [vmem:[#allocation23 + $0x50] ss:$8 sps:$4 sm:$0xff]   ;;  %v7276_v42 = vld [vmem:[#allocation23 + $0x124] ss:$8 sps:$4 sm:$0xff]  }
0x125e   :  { %4437 = vmatprep.mubr.bf16.mxu0 %v4071_v9  ;;  %v7240_v9 = vld [vmem:[#allocation23 + $0x64] ss:$8 sps:$4 sm:$0xff]   ;;  %v7283_v19 = vld [vmem:[#allocation23 + $0x150] ss:$8 sps:$4 sm:$0xff]  }
0x125f   :  { %4438 = vmatmul.mubr.bf16.vlgmr.msra.gmra.mrb[80].mxu0 %v4070_v53  ;;  %v7243_v53 = vld [vmem:[#allocation23 + $0x74] ss:$8 sps:$4 sm:$0xff]  }
0x1260   :  { %4447 = vmatpush1.bf16.msra.mxu0 %v7172_v39  ;;  %4478 = vmatprep.mubr.bf16.mxu0 %v4073_v55  ;;  %v7238_v39 = vld [vmem:[#allocation23 + $0x60] ss:$8 sps:$4 sm:$0xff]   ;;  %v7246_v55 = vld [vmem:[#allocation23 + $0x84] ss:$8 sps:$4 sm:$0xff]  }
0x1261   :  { %4448 = vmatprep.subr.bf16.mxu0 %v7177_v51  ;;  %v7241_v51 = vld [vmem:[#allocation23 + $0x70] ss:$8 sps:$4 sm:$0xff]  }
0x1264   :  { %4449 = vmatpush1.bf16.msra.mxu0 %v7175_v54  ;;  %v7244_v54 = vld [vmem:[#allocation23 + $0x80] ss:$8 sps:$4 sm:$0xff]  }
0x1265   :  { %4450 = vmatprep.subr.bf16.mxu0 %v7180_v57  ;;  %v7249_v57 = vld [vmem:[#allocation23 + $0x94] ss:$8 sps:$4 sm:$0xff]  }
0x1268   :  { %4451 = vmatpush1.bf16.msra.mxu0 %v7178_v13  ;;  %v7247_v13 = vld [vmem:[#allocation23 + $0x90] ss:$8 sps:$4 sm:$0xff]  }
0x1269   :  { %4452 = vmatprep.subr.bf16.mxu0 %v7183_v43  ;;  %v7252_v43 = vld [vmem:[#allocation23 + $0xa4] ss:$8 sps:$4 sm:$0xff]  }
0x126c   :  { %4453 = vmatpush1.bf16.msra.mxu0 %v7181_v15  ;;  %v7250_v15 = vld [vmem:[#allocation23 + $0xa0] ss:$8 sps:$4 sm:$0xff]  }
0x126d   :  { %4454 = vmatprep.subr.bf16.mxu0 %v7186_v17  ;;  %v7255_v17 = vld [vmem:[#allocation23 + $0xb4] ss:$8 sps:$4 sm:$0xff]  }
0x1270   :  { %4455 = vmatpush1.bf16.msra.mxu0 %v7184_v47  ;;  %v7253_v47 = vld [vmem:[#allocation23 + $0xb0] ss:$8 sps:$4 sm:$0xff]  }
0x1271   :  { %4456 = vmatprep.subr.bf16.mxu0 %v7189_v45  ;;  %v7258_v45 = vld [vmem:[#allocation23 + $0xc4] ss:$8 sps:$4 sm:$0xff]  }
0x1274   :  { %4457 = vmatpush1.bf16.msra.mxu0 %v7187_v52  ;;  %v7256_v52 = vld [vmem:[#allocation23 + $0xc0] ss:$8 sps:$4 sm:$0xff]  }
0x1275   :  { %4458 = vmatprep.subr.bf16.mxu0 %v7192_v1  ;;  %v7261_v1 = vld [vmem:[#allocation23 + $0xd4] ss:$8 sps:$4 sm:$0xff]  }
0x1278   :  { %4459 = vmatpush1.bf16.msra.mxu0 %v7190_v18  ;;  %v7259_v18 = vld [vmem:[#allocation23 + $0xd0] ss:$8 sps:$4 sm:$0xff]  }
0x1279   :  { %4460 = vmatprep.subr.bf16.mxu0 %v7195_v48  ;;  %v4943_v48 = vrot.slane %v9627_v26, %v9887_v34 }
0x127c   :  { %4461 = vmatpush1.bf16.msra.mxu0 %v7193_v37  ;;  %v7264_v37 = vld [vmem:[#allocation23 + $0xe4] ss:$8 sps:$4 sm:$0xff]  }
0x127d   :  { %4462 = vmatprep.subr.bf16.mxu0 %v7198_v40  ;;  %v4955_v40 = vrot.slane %v9627_v26, %v3978_v33 }
0x1280   :  { %4463 = vmatpush1.bf16.msra.mxu0 %v7196_v41  ;;  %v7262_v41 = vld [vmem:[#allocation23 + $0xe0] ss:$8 sps:$4 sm:$0xff]  }
0x1281   :  { %4464 = vmatprep.subr.bf16.mxu0 %v7201_v22 }
0x1284   :  { %4465 = vmatpush1.bf16.msra.mxu0 %v7199_v23  ;;  %v7267_v23 = vld [vmem:[#allocation23 + $0xf4] ss:$8 sps:$4 sm:$0xff]  }
0x1285   :  { %4466 = vmatprep.subr.bf16.mxu0 %v7204_v4 }
0x1288   :  { %4467 = vmatpush1.bf16.msra.mxu0 %v7202_v32 }
0x1289   :  { %4468 = vmatprep.subr.bf16.mxu0 %v7207_v6 }
0x128c   :  { %4469 = vmatpush1.bf16.msra.mxu0 %v7205_v56 }
0x128d   :  { %4470 = vmatprep.subr.bf16.mxu0 %v7210_v46  ;;  %v7265_v46 = vld [vmem:[#allocation23 + $0xf0] ss:$8 sps:$4 sm:$0xff]  }
0x1290   :  { %4471 = vmatpush1.bf16.msra.mxu0 %v7208_v61 }
0x1291   :  { %4472 = vmatprep.subr.bf16.mxu0 %v7213_v60 }
0x1294   :  { %4473 = vmatpush1.bf16.msra.mxu0 %v7211_v8  ;;  %v7270_v8 = vld [vmem:[#allocation23 + $0x104] ss:$8 sps:$4 sm:$0xff]  }
0x1295   :  { %4474 = vmatprep.subr.bf16.mxu0 %v7216_v30  ;;  %v7273_v30 = vld [vmem:[#allocation23 + $0x114] ss:$8 sps:$4 sm:$0xff]  }
0x1296   :  { %v9632_v14 = vpop.f32.mrb[104].mxu1 }
0x1297   :  { %v4996_v2 = vpop.f32.mrb[105].mxu1  ;;  %v4995_v22 = vadd.f32 %v9632_v14, %v4943_v48  ;;  %v7279_v14 = vld [vmem:[#allocation23 + $0x134] ss:$8 sps:$4 sm:$0xff]  }
0x1298   :  { %v4997_v50 = vadd.f32 %v4996_v2, %v4947_v7  ;;  %4475 = vmatpush1.bf16.msra.mxu0 %v7214_v5  ;;  %v4998_v12 = vpop.f32.mrb[106].mxu1  ;;  %v7271_v7 = vld [vmem:[#allocation23 + $0x110] ss:$8 sps:$4 sm:$0xff]  }
0x1299   :  { %v4999_v35 = vpop.f32.mrb[107].mxu1  ;;  %4476 = vmatprep.subr.bf16.mxu0 %v7219_v63  ;;  %v5042_v61 = vmax.f32 %v4995_v22, 0.0  ;;  %v7274_v63 = vld [vmem:[#allocation23 + $0x120] ss:$8 sps:$4 sm:$0xff]   ;;  %v7277_v2 = vld [vmem:[#allocation23 + $0x130] ss:$8 sps:$4 sm:$0xff]  }
0x129a   :  { %v5043_v38 = vmax.f32 %v4997_v50, 0.0  ;;  %v7282_v50 = vld [vmem:[#allocation23 + $0x144] ss:$8 sps:$4 sm:$0xff]   ;;  %v7280_v12 = vld [vmem:[#allocation23 + $0x140] ss:$8 sps:$4 sm:$0xff]  }
0x129b   :  { %v5046_v33 = vpack.c.bf16 %v5042_v61, %v5042_v61  ;;  %v7288_v35 = vld [vmem:[#allocation23 + $0x164] ss:$8 sps:$4 sm:$0xff]  }
0x129c   :  { %4477 = vmatpush1.bf16.msra.mxu0 %v7217_v10  ;;  %v5047_v24 = vpack.c.bf16 %v5043_v38, %v5043_v38  ;;  %v7285_v10 = vld [vmem:[#allocation23 + $0x154] ss:$8 sps:$4 sm:$0xff]   ;;  %v7327_v22 = vld [vmem:[#allocation24 + $0x28] sm:$0xff]  }
0x129d   :  { %5381 = vmatprep.subr.bf16.mxu0 %v7222_v28  ;;  %v7286_v28 = vld [vmem:[#allocation23 + $0x160] ss:$8 sps:$4 sm:$0xff]   ;;  %v7291_v38 = vld [vmem:[#allocation23 + $0x174] ss:$8 sps:$4 sm:$0xff]   ;;  %v4618_v61 = vld [vmem:[%s9695_s25] sm:$0x3] }
0x129f   :  { %4479 = vmatmul.mubr.bf16.vlgmr.msra.gmra.mrb[80].mxu0 %v4072_v27  ;;  %v7317_v27 = vld [vmem:[#allocation24] sm:$0xff]  }
0x12a0   :  { %5382 = vmatpush1.bf16.msra.mxu0 %v7220_v49  ;;  %5413 = vmatprep.mubr.bf16.mxu0 %v5047_v24  ;;  %v7316_v49 = vld [vmem:[#allocation24 + $0x40] sm:$0xff]   ;;  %v7289_v24 = vld [vmem:[#allocation23 + $0x170] ss:$8 sps:$4 sm:$0xff]  }
0x12a1   :  { %5383 = vmatprep.subr.bf16.mxu0 %v7225_v11  ;;  %v7318_v11 = vld [vmem:[#allocation24 + $0x48] sm:$0xff]   ;;  %6406 = vmatprep.subr.bf16.mxu1 %v7316_v49 }
0x12a2   :  { %6407 = vmatpush3.bf16.msra.mxu1 %v7317_v27 }
0x12a3   :  { %6408 = vmatprep.subr.bf16.mxu1 %v7318_v11  ;;  %v5503_v11 = vld [vmem:[%s9890_s26] sm:$0x1] }
0x12a4   :  { %5384 = vmatpush1.bf16.msra.mxu0 %v7223_v44  ;;  %v7294_v44 = vld [vmem:[#allocation23 + $0x184] ss:$8 sps:$4 sm:$0xff]  }
0x12a5   :  { %5385 = vmatprep.subr.bf16.mxu0 %v7228_v20  ;;  %v7319_v20 = vld [vmem:[#allocation24 + $0x8] sm:$0xff]  }
0x12a6   :  { %6409 = vmatpush3.bf16.msra.mxu1 %v7319_v20 }
0x12a8   :  { %5386 = vmatpush1.bf16.msra.mxu0 %v7226_v3  ;;  %v7320_v3 = vld [vmem:[#allocation24 + $0x50] sm:$0xff]  }
0x12a9   :  { %5387 = vmatprep.subr.bf16.mxu0 %v7231_v0  ;;  %v7292_v0 = vld [vmem:[#allocation23 + $0x180] ss:$8 sps:$4 sm:$0xff]   ;;  %6410 = vmatprep.subr.bf16.mxu1 %v7320_v3 }
0x12ac   :  { %5388 = vmatpush1.bf16.msra.mxu0 %v7229_v29  ;;  %v7297_v29 = vld [vmem:[#allocation23 + $0x194] ss:$8 sps:$4 sm:$0xff]  }
0x12ad   :  { %5389 = vmatprep.subr.bf16.mxu0 %v7234_v58  ;;  %v7321_v58 = vld [vmem:[#allocation24 + $0x10] sm:$0xff]  }
0x12ae   :  { %6411 = vmatpush3.bf16.msra.mxu1 %v7321_v58 }
0x12b0   :  { %5390 = vmatpush1.bf16.msra.mxu0 %v7232_v62  ;;  %v7322_v62 = vld [vmem:[#allocation24 + $0x58] sm:$0xff]  }
0x12b1   :  { %5391 = vmatprep.subr.bf16.mxu0 %v7237_v16  ;;  %v7295_v16 = vld [vmem:[#allocation23 + $0x190] ss:$8 sps:$4 sm:$0xff]   ;;  %6412 = vmatprep.subr.bf16.mxu1 %v7322_v62 }
0x12b4   :  { %5392 = vmatpush1.bf16.msra.mxu0 %v7235_v36  ;;  %v7300_v36 = vld [vmem:[#allocation23 + $0x1a4] ss:$8 sps:$4 sm:$0xff]  }
0x12b5   :  { %5393 = vmatprep.subr.bf16.mxu0 %v7240_v9  ;;  %v7323_v9 = vld [vmem:[#allocation24 + $0x18] sm:$0xff]  }
0x12b6   :  { %6413 = vmatpush3.bf16.msra.mxu1 %v7323_v9 }
0x12b8   :  { %5394 = vmatpush1.bf16.msra.mxu0 %v7238_v39  ;;  %v7324_v39 = vld [vmem:[#allocation24 + $0x60] sm:$0xff]  }
0x12b9   :  { %5395 = vmatprep.subr.bf16.mxu0 %v7243_v53  ;;  %v7298_v53 = vld [vmem:[#allocation23 + $0x1a0] ss:$8 sps:$4 sm:$0xff]   ;;  %6414 = vmatprep.subr.bf16.mxu1 %v7324_v39 }
0x12bc   :  { %5396 = vmatpush1.bf16.msra.mxu0 %v7241_v51  ;;  %v7303_v51 = vld [vmem:[#allocation23 + $0x1b4] ss:$8 sps:$4 sm:$0xff]  }
0x12bd   :  { %5397 = vmatprep.subr.bf16.mxu0 %v7246_v55  ;;  %v7325_v55 = vld [vmem:[#allocation24 + $0x20] sm:$0xff]  }
0x12be   :  { %6415 = vmatpush3.bf16.msra.mxu1 %v7325_v55 }
0x12c0   :  { %5398 = vmatpush1.bf16.msra.mxu0 %v7244_v54  ;;  %v7301_v54 = vld [vmem:[#allocation23 + $0x1b0] ss:$8 sps:$4 sm:$0xff]  }
0x12c1   :  { %5399 = vmatprep.subr.bf16.mxu0 %v7249_v57  ;;  %v7306_v57 = vld [vmem:[#allocation23 + $0x1c4] ss:$8 sps:$4 sm:$0xff]  }
0x12c4   :  { %5400 = vmatpush1.bf16.msra.mxu0 %v7247_v13  ;;  %v7304_v13 = vld [vmem:[#allocation23 + $0x1c0] ss:$8 sps:$4 sm:$0xff]  }
0x12c5   :  { %5401 = vmatprep.subr.bf16.mxu0 %v7252_v43  ;;  %v7309_v43 = vld [vmem:[#allocation23 + $0x1d4] ss:$8 sps:$4 sm:$0xff]  }
0x12c8   :  { %5402 = vmatpush1.bf16.msra.mxu0 %v7250_v15  ;;  %v7307_v15 = vld [vmem:[#allocation23 + $0x1d0] ss:$8 sps:$4 sm:$0xff]  }
0x12c9   :  { %5403 = vmatprep.subr.bf16.mxu0 %v7255_v17  ;;  %v4951_v17 = vrot.slane %v9627_v26, %v9889_v31 }
0x12cc   :  { %5404 = vmatpush1.bf16.msra.mxu0 %v7253_v47  ;;  %v7312_v47 = vld [vmem:[#allocation23 + $0x1e4] ss:$8 sps:$4 sm:$0xff]  }
0x12cd   :  { %5405 = vmatprep.subr.bf16.mxu0 %v7258_v45  ;;  %v7310_v45 = vld [vmem:[#allocation23 + $0x1e0] ss:$8 sps:$4 sm:$0xff]  }
0x12d0   :  { %5406 = vmatpush1.bf16.msra.mxu0 %v7256_v52 }
0x12d1   :  { %5407 = vmatprep.subr.bf16.mxu0 %v7261_v1  ;;  %v7315_v1 = vld [vmem:[#allocation23 + $0x1f4] ss:$8 sps:$4 sm:$0xff]  }
0x12d4   :  { %5408 = vmatpush1.bf16.msra.mxu0 %v7259_v18  ;;  %v7313_v18 = vld [vmem:[#allocation23 + $0x1f0] ss:$8 sps:$4 sm:$0xff]  }
0x12d5   :  { %5409 = vmatprep.subr.bf16.mxu0 %v7264_v37 }
0x12d6   :  { %v9640_v4 = vpop.f32.mrb[108].mxu1 }
0x12d7   :  { %v5037_v32 = vpop.f32.mrb[109].mxu1  ;;  %v5036_v52 = vadd.f32 %v9640_v4, %v4951_v17  ;;  %v7330_v4 = vld [vmem:[#allocation24 + $0x78] sm:$0xff]  }
0x12d8   :  { %v5038_v6 = vadd.f32 %v5037_v32, %v4955_v40  ;;  %v5039_v56 = vpop.f32.mrb[110].mxu1  ;;  %5410 = vmatpush1.bf16.msra.mxu0 %v7262_v41  ;;  %v7326_v40 = vld [vmem:[#allocation24 + $0x68] sm:$0xff]   ;;  %v7328_v32 = vld [vmem:[#allocation24 + $0x70] sm:$0xff]  }
0x12d9   :  { %v5040_v60 = vpop.f32.mrb[111].mxu1  ;;  %5411 = vmatprep.subr.bf16.mxu0 %v7267_v23  ;;  %v5044_v48 = vmax.f32 %v5036_v52, 0.0  ;;  %6416 = vmatprep.subr.bf16.mxu1 %v7326_v40  ;;  %v7331_v56 = vld [vmem:[#allocation24 + $0x38] sm:$0xff]  }
0x12da   :  { %v5045_v21 = vmax.f32 %v5038_v6, 0.0  ;;  %6417 = vmatpush3.bf16.msra.mxu1 %v7327_v22  ;;  %v7329_v6 = vld [vmem:[#allocation24 + $0x30] sm:$0xff]  }
0x12db   :  { %v5048_v37 = vpack.c.bf16 %v5044_v48, %v5044_v48  ;;  %6418 = vmatprep.subr.bf16.mxu1 %v7328_v32 }
0x12dc   :  { %5412 = vmatpush1.bf16.msra.mxu0 %v7265_v46  ;;  %v5049_v5 = vpack.c.bf16 %v5045_v21, %v5045_v21  ;;  %v3640_v46 = vld [vmem:[%s9691_s21] sm:$0x3]  ;;  %v5374_v21 = vrot.slane %v4618_v61, %v9887_v34 }
0x12dd   :  { %5422 = vmatprep.subr.bf16.mxu0 %v7270_v8  ;;  %v4398_v60 = vrot.slane %v3640_v46, %v9887_v34  ;;  %v4402_v8 = vrot.slane %v3640_v46, %v9888_v59 }
0x12de   :  { %6419 = vmatpush3.bf16.msra.mxu1 %v7329_v6 }
0x12df   :  { %5414 = vmatmul.mubr.bf16.vlgmr.msra.gmra.mrb[84].mxu0 %v5046_v33  ;;  %6420 = vmatprep.subr.bf16.mxu1 %v7330_v4 }
0x12e0   :  { %5423 = vmatpush1.bf16.msra.mxu0 %v7268_v25  ;;  %5454 = vmatprep.mubr.bf16.mxu0 %v5049_v5  ;;  %v5378_v25 = vrot.slane %v4618_v61, %v9888_v59 }
0x12e1   :  { %5424 = vmatprep.subr.bf16.mxu0 %v7273_v30 }
0x12e2   :  { %6421 = vmatpush3.bf16.msra.mxu1 %v7331_v56 }
0x12e4   :  { %5425 = vmatpush1.bf16.msra.mxu0 %v7271_v7 }
0x12e5   :  { %5426 = vmatprep.subr.bf16.mxu0 %v7276_v42 }
0x12e8   :  { %5427 = vmatpush1.bf16.msra.mxu0 %v7274_v63 }
0x12e9   :  { %5428 = vmatprep.subr.bf16.mxu0 %v7279_v14 }
0x12ec   :  { %5429 = vmatpush1.bf16.msra.mxu0 %v7277_v2 }
0x12ed   :  { %5430 = vmatprep.subr.bf16.mxu0 %v7282_v50 }
0x12f0   :  { %5431 = vmatpush1.bf16.msra.mxu0 %v7280_v12 }
0x12f1   :  { %5432 = vmatprep.subr.bf16.mxu0 %v7285_v10 }
0x12f4   :  { %5433 = vmatpush1.bf16.msra.mxu0 %v7283_v19 }
0x12f5   :  { %5434 = vmatprep.subr.bf16.mxu0 %v7288_v35 }
0x12f8   :  { %5435 = vmatpush1.bf16.msra.mxu0 %v7286_v28 }
0x12f9   :  { %5436 = vmatprep.subr.bf16.mxu0 %v7291_v38 }
0x12fc   :  { %5437 = vmatpush1.bf16.msra.mxu0 %v7289_v24 }
0x12fd   :  { %5438 = vmatprep.subr.bf16.mxu0 %v7294_v44 }
0x1300   :  { %5439 = vmatpush1.bf16.msra.mxu0 %v7292_v0 }
0x1301   :  { %5440 = vmatprep.subr.bf16.mxu0 %v7297_v29 }
0x1304   :  { %5441 = vmatpush1.bf16.msra.mxu0 %v7295_v16 }
0x1305   :  { %5442 = vmatprep.subr.bf16.mxu0 %v7300_v36 }
0x1308   :  { %5443 = vmatpush1.bf16.msra.mxu0 %v7298_v53 }
0x1309   :  { %5444 = vmatprep.subr.bf16.mxu0 %v7303_v51 }
0x130c   :  { %5445 = vmatpush1.bf16.msra.mxu0 %v7301_v54 }
0x130d   :  { %5446 = vmatprep.subr.bf16.mxu0 %v7306_v57 }
0x1310   :  { %5447 = vmatpush1.bf16.msra.mxu0 %v7304_v13 }
0x1311   :  { %5448 = vmatprep.subr.bf16.mxu0 %v7309_v43 }
0x1314   :  { %5449 = vmatpush1.bf16.msra.mxu0 %v7307_v15 }
0x1315   :  { %5450 = vmatprep.subr.bf16.mxu0 %v7312_v47 }
0x1318   :  { %5451 = vmatpush1.bf16.msra.mxu0 %v7310_v45 }
0x1319   :  { %5452 = vmatprep.subr.bf16.mxu0 %v7315_v1 }
0x131c   :  { %5453 = vmatpush1.bf16.msra.mxu0 %v7313_v18 }
0x131f   :  { %5455 = vmatmul.mubr.bf16.vlgmr.msra.gmra.mrb[84].mxu0 %v5048_v37 }
0x1372   :  { %v4480_v41 = vpop.f32.mrb[80].mxu0 }
0x1373   :  { %v4482_v23 = vpop.f32.mrb[81].mxu0  ;;  %v6748_v33 = vadd.f32 %v4480_v41, %v4398_v60 }
0x1374   :  { %v4484_v31 = vpop.f32.mrb[82].mxu0  ;;  %v6749_v30 = vadd.f32 %v4482_v23, %v4402_v8 }
0x1375   :  { %v4485_v26 = vpop.f32.mrb[83].mxu0  ;;  %v4487_v2 = vmax.f32 %v6748_v33, 0.0 }
0x1376   :  { %v4488_v10 = vmax.f32 %v6749_v30, 0.0 }
0x13f2   :  { %v5456_v5 = vpop.f32.mrb[84].mxu0 }
0x13f3   :  { %v6750_v7 = vadd.f32 %v5456_v5, %v5374_v21  ;;  %v5458_v42 = vpop.f32.mrb[85].mxu0 }
0x13f4   :  { %v6751_v63 = vadd.f32 %v5458_v42, %v5378_v25  ;;  %v5460_v14 = vpop.f32.mrb[86].mxu0 }
0x13f5   :  { %v5463_v50 = vmax.f32 %v6750_v7, 0.0  ;;  %v5461_v12 = vpop.f32.mrb[87].mxu0 }
0x13f6   :  { %v5464_v19 = vmax.f32 %v6751_v63, 0.0 }
0x13f7   :  { %v5465_v35 = vadd.f32 %v5463_v50, %v4487_v2 }
0x13f8   :  { %v5466_v28 = vadd.f32 %v5464_v19, %v4488_v10 }
0x13f9   :  { %v5467_v38 = vmul.f32 0.5, %v5465_v35 }
0x13fa   :  { %v5468_v49 = vmul.f32 0.5, %v5466_v28 }
0x13fb   :  { %v5501_v34 = vpack.c.bf16 %v5467_v38, %v5467_v38 }
0x13fc   :  { %v5502_v27 = vpack.c.bf16 %v5468_v49, %v5468_v49 }
0x13fe   :  { %5632 = vmatprep.mubr.bf16.mxu1 %v5502_v27 }
0x13ff   :  { %5633 = vmatmul.mubr.bf16.vlgmr.msra.gmra.mrb[112].mxu1 %v5501_v34 }
0x14d2   :  { %v6422_v59 = vpop.f32.mrb[112].mxu1 }
0x14d3   :  { %v6423_v24 = vpop.f32.mrb[113].mxu1 }
0x14d4   :  { %v6424_v44 = vadd.f32 %v6423_v24, %v6422_v59  ;;  %v6425_v20 = vpop.f32.mrb[114].mxu1 }
0x14d5   :  { %v6426_v3 = vpop.f32.mrb[115].mxu1 }
0x14d6   :  { %v5635_v0 = vadd.f32 %v6424_v44, %v5503_v11 }
0x14d8   :  { %5640 = vst [vmem:[#allocation26] sm:$0x1] %v5635_v0 }
0x14d9   :  { %7897 = shalt.err (!%p7894_p4)
}
0x14da   :  { %s9891_s3 = sld [smem:[#allocation77_spill]] }
0x14e0   :  { %s7898_s20 = scalar_lea.hbm %s9891_s3, 16 }
0x14e1   :  { %p7899_p5 = scmp.ne.s32.totalorder %s9891_s3, %s7898_s20  ;;  %p7902_p6 = scmp.lt.u32.totalorder %s7898_s20, %s9891_s3 }
0x14e3   :  { %p7904_p7 = pnand %p7902_p6, %p7899_p5 }
0x14e5   :  { %7907 = shalt.err (!%p7904_p7)
}
0x14e6   :  { %5650 = dma.vmem_to_hbm [thread:$0]  %s5648_s7, 16, %s9891_s3, [#allocation5]  }
0x14e7   :  { %7924 = dma.done.wait [#allocation5], 16  }
0x14e8   :  { %7925 = vsyncadd [#allocation5], 4294967280 }
0x14e9   :  { %5654 = vsyncpa [#allocation4], 1 }
0x14ea   :  { %5655 = vsyncpa [#allocation7], 1 }
0x14eb   :  { %5656 = vsyncpa [#allocation10], 1 }
0x14ec   :  { %5657 = vsyncpa [#allocation13], 1 }
0x14ed   :  { %5658 = vsyncpa [#allocation16], 1 }
0x14ee   :  { %5659 = vsyncpa [#allocation19], 1 }
0x14ef   :  { %5660 = vsyncpa [#allocation22], 1 }
0x14f0   :  { %5661 = vsyncpa [#allocation25], 1 }
0x14f1   :  { %5662 = vsyncpa [#allocation5], 1 }

</bundles_post_ra>
